<compile_context>
chip_gen: v6e
topology: v6e:2x2x1
jax: 0.10.0
libtpu: 0.0.40
codegen_flags: <defaults>
</compile_context>

<pallas_src>
import functools

import jax
import jax.numpy as jnp
from jax.experimental import pallas as pl
from jax.experimental.pallas import tpu as pltpu

TEMPERATURE = 0.01  # compute_entropy_loss default temperature


def _tile_sum(x):
    """Full reduction of a 2-D tile to shape (1, 1)."""
    return jnp.sum(jnp.sum(x, axis=-1, keepdims=True), axis=0, keepdims=True)


def _dvq_kernel(z_ref, e2_ref, et_ref, esq_ref,
                idx_ref, zq_ref, stats_ref, avgp_ref,
                *, d1, l2_norm):
    # z block is channel-major: [C, TOK] (channels on sublanes, tokens on lanes).
    z = z_ref[...].astype(jnp.float32)            # [C, TOK]
    e2 = e2_ref[...]                              # [2*nb, C] group-masked codebook
    et = et_ref[...]                              # [C, nb]   concat codebook (transposed)
    c, tok = z.shape
    nb = e2.shape[0] // 2

    # channel-group masks along the sublane axis: sem = rows [0, d1), vq = rows [d1, C)
    ch = jax.lax.broadcasted_iota(jnp.int32, (c, 1), 0)
    mask_k = (ch < d1).astype(jnp.float32)        # [C, 1]
    mask_g = 1.0 - mask_k

    zsq = z * z
    nk = jnp.sum(zsq * mask_k, axis=0, keepdims=True)   # [1, TOK]  ||z_vqkd||^2
    ng = jnp.sum(zsq * mask_g, axis=0, keepdims=True)   # [1, TOK]  ||z_vqgan||^2

    if l2_norm:
        # F.normalize(z, p=2, dim=-1) per group == z * rsqrt(max(||z||^2, eps))
        inv_k = jax.lax.rsqrt(jnp.maximum(nk, 1e-24))
        inv_g = jax.lax.rsqrt(jnp.maximum(ng, 1e-24))
        zn = z * (mask_k * inv_k + mask_g * inv_g)       # [C, TOK]
    else:
        zn = z

    # One wide MXU matmul against the pre-masked concatenated codebook.
    # (bf16 path: the wrapper passes e2 in bf16; zn is cast to match.)
    s = jnp.dot(e2, zn.astype(e2.dtype), preferred_element_type=jnp.float32)  # [2nb, TOK]
    s_k = s[:nb, :]
    s_g = s[nb:, :]

    if l2_norm:
        # both z groups and codebooks are unit-norm:  ||z||^2 + ||e||^2 - 2<z,e> = 2 - 2<z,e>
        dk = 2.0 - 2.0 * s_k
        dg = 2.0 - 2.0 * s_g
    else:
        esq = esq_ref[...]                               # [2nb, 1] hoisted codebook norms
        dk = nk + esq[:nb, :] - 2.0 * s_k
        dg = ng + esq[nb:, :] - 2.0 * s_g
    d = dk + dg                                          # [nb, TOK]

    # nearest code: min over the code (sublane) axis, first-index tie-break.
    dmin = jnp.min(d, axis=0, keepdims=True)             # [1, TOK]
    code_f = jax.lax.broadcasted_iota(jnp.int32, (nb, tok), 0).astype(jnp.float32)
    idx_f = jnp.min(jnp.where(d <= dmin, code_f, float(nb)),
                    axis=0, keepdims=True)               # [1, TOK] (exact small ints)
    idx_ref[...] = idx_f.astype(jnp.int32)               # lane-dense index row

    # gather codebook rows via a one-hot matmul on the MXU: zq[c, n] = e[idx[n], c]
    # (kept f32 so the gathered codes are bit-exact.)
    onehot = (code_f == idx_f).astype(jnp.float32)       # [nb, TOK]
    zq = jnp.dot(et, onehot, preferred_element_type=jnp.float32)   # [C, TOK]
    zq_ref[...] = zq.astype(zq_ref.dtype)

    # entropy-loss pieces: single softmax pass reusing dmin as the row max.
    # aff = -d / T;  aff - max(aff) = (dmin - d) / T  (the reference's +1e-5
    # logit shift cancels exactly inside log_softmax).
    t = (dmin - d) * (1.0 / TEMPERATURE)                 # [nb, TOK], <= 0
    ex = jnp.exp(t)                                      # EUP
    ssum = jnp.sum(ex, axis=0, keepdims=True)            # [1, TOK]
    rinv = pl.reciprocal(ssum, approx=True)
    splsum = jnp.sum(ex * t, axis=0, keepdims=True)      # [1, TOK]
    # per-token sum(p * log p) = sum(ex * t)/ssum - log(ssum)
    plogp = splsum * rinv - jnp.log(ssum)                # [1, TOK]
    probs = ex * rinv                                    # [nb, TOK] (only for avg_probs)

    # per-tile partial reductions, packed into lanes 0..3 of one 128-lane row
    s_dk = _tile_sum(dk * dk)                            # sum d_vqkd^2
    s_dg = _tile_sum(dg * dg)                            # sum d_vqgan^2
    s_sq = _tile_sum((zq - zn) ** 2)                     # sum (z_q - z)^2
    s_pl = jnp.sum(plogp, axis=-1, keepdims=True)        # sum_tokens sum_codes p*log p
    lane = jax.lax.broadcasted_iota(jnp.int32, (1, 128), 1)
    stats_ref[...] = (jnp.where(lane == 0, s_dk, 0.0)
                      + jnp.where(lane == 1, s_dg, 0.0)
                      + jnp.where(lane == 2, s_sq, 0.0)
                      + jnp.where(lane == 3, s_pl, 0.0))

    # per-tile sum of probs over tokens (for avg_probs entropy); tiny column store
    avgp_ref[...] = jnp.sum(probs, axis=1, keepdims=True)   # [nb, 1]


@functools.partial(jax.jit,
                   static_argnames=("beta", "entropy_loss_ratio", "l2_norm", "mxu_bf16"))
def dual_vq_forward(z, emb_vqkd, emb_vqgan, *, beta=0.25, entropy_loss_ratio=0.1,
                    l2_norm=True, mxu_bf16=False):
    """Forward pass of DualVectorQuantizer (training-mode losses computed).

    z:          [B, C, H, W]  NCHW, C = sem_dim + vq_dim (any float dtype)
    emb_vqkd:   [nb_code, sem_dim]
    emb_vqgan:  [nb_code, vq_dim]
    """
    B, C, H, W = z.shape
    nb_code, D1 = emb_vqkd.shape
    D2 = emb_vqgan.shape[1]
    assert C == D1 + D2
    HW = H * W
    N = B * HW

    # NCHW stays NCHW: the kernel is channel-major, so only a free reshape here.
    z3 = z.reshape(B, C, HW)

    if l2_norm:
        ek = emb_vqkd / jnp.maximum(
            jnp.linalg.norm(emb_vqkd, axis=-1, keepdims=True), 1e-12)
        eg = emb_vqgan / jnp.maximum(
            jnp.linalg.norm(emb_vqgan, axis=-1, keepdims=True), 1e-12)
    else:
        ek, eg = emb_vqkd, emb_vqgan
    ek = ek.astype(jnp.float32)
    eg = eg.astype(jnp.float32)

    # group-masked, row-concatenated codebook: rows [0,nb) = [ek | 0], rows [nb,2nb) = [0 | eg]
    ecat2 = jnp.concatenate(
        [jnp.concatenate([ek, jnp.zeros((nb_code, D2), jnp.float32)], axis=1),
         jnp.concatenate([jnp.zeros((nb_code, D1), jnp.float32), eg], axis=1)],
        axis=0)                                                   # [2*nb, C]
    ecat_t = jnp.concatenate([ek, eg], axis=1).T                  # [C, nb]
    e_sq = jnp.sum(ecat2 * ecat2, axis=1, keepdims=True)          # [2*nb, 1] (non-l2 branch)
    if mxu_bf16:
        # opt-in: faster MXU, may flip near-tied argmin indices
        ecat2 = ecat2.astype(jnp.bfloat16)

    # token-tile (lane) width: largest 128-multiple dividing H*W, capped at 1024
    TOK = None
    for cand in (1024, 512, 256, 128):
        if HW % cand == 0:
            TOK = cand
            break
    if TOK is None:
        TOK = HW          # full-row block (allowed since it equals the full dim)
    NTT = HW // TOK
    # make sure there are >= 2 grid steps so both v7x TensorCores get work
    if B * NTT < 2 and TOK % 256 == 0:
        TOK //= 2
        NTT = HW // TOK

    out_shapes = (
        jax.ShapeDtypeStruct((B, NTT, 1, TOK), jnp.int32),         # indices (lane-dense)
        jax.ShapeDtypeStruct((B, C, HW), z.dtype),                 # z_q, NCHW layout
        jax.ShapeDtypeStruct((B, NTT, 1, 128), jnp.float32),       # packed per-tile stats
        jax.ShapeDtypeStruct((B, NTT, nb_code, 1), jnp.float32),   # per-tile sum of probs
    )

    kernel = functools.partial(_dvq_kernel, d1=D1, l2_norm=l2_norm)
    idx_t, zq3, stats, avgp = pl.pallas_call(
        kernel,
        out_shape=out_shapes,
        grid_spec=pltpu.PrefetchScalarGridSpec(
            num_scalar_prefetch=0,
            grid=(B, NTT),
            in_specs=[
                pl.BlockSpec((None, C, TOK), lambda b, t: (b, 0, t)),
                pl.BlockSpec((2 * nb_code, C), lambda b, t: (0, 0)),
                pl.BlockSpec((C, nb_code), lambda b, t: (0, 0)),
                pl.BlockSpec((2 * nb_code, 1), lambda b, t: (0, 0)),
            ],
            out_specs=[
                pl.BlockSpec((None, None, 1, TOK), lambda b, t: (b, t, 0, 0)),
                pl.BlockSpec((None, C, TOK), lambda b, t: (b, 0, t)),
                pl.BlockSpec((None, None, 1, 128), lambda b, t: (b, t, 0, 0)),
                pl.BlockSpec((None, None, nb_code, 1), lambda b, t: (b, t, 0, 0)),
            ],
        ),
        compiler_params=pltpu.CompilerParams(
            dimension_semantics=("parallel", "parallel"),   # no cross-tile state
            vmem_limit_bytes=48 * 1024 * 1024),             # fits v7x's 64 MiB VMEM too
    )(z3, ecat2, ecat_t, e_sq)

    # --- finalize (cheap glue) ---
    min_encoding_indices = idx_t.reshape(N)                 # order = (b, h*W + w)
    # forward value of  z + (z_q - z).detach()  is just z_q (gathered codes)
    z_q = zq3.reshape(B, C, H, W)

    stat_sums = jnp.sum(stats.reshape(-1, 128)[:, :4], axis=0)   # [4] summed over tiles
    vqkd_d_norm = stat_sums[0] / N
    vqgan_d_norm = stat_sums[1] / N
    vq_loss = stat_sums[2] / (N * C)                        # mean((z_q - z)^2)
    commit_loss = beta * vq_loss
    sample_entropy = -stat_sums[3] / N

    avg_probs = jnp.sum(avgp.reshape(-1, nb_code), axis=0) / N
    avg_entropy = -jnp.sum(avg_probs * jnp.log(avg_probs + 1e-5))
    entropy_loss = entropy_loss_ratio * (sample_entropy - avg_entropy)

    codebook_usage = 0     # show_usage=False
    perplexity = None
    min_encodings = None
    return (z_q,
            (vq_loss, commit_loss, entropy_loss, codebook_usage,
             vqkd_d_norm, vqgan_d_norm),
            (perplexity, min_encodings, min_encoding_indices))


def _reference_forward(z, ek_w, eg_w):
    """Pure-JAX reference (mirrors the PyTorch forward) for a sanity check."""
    B, C, H, W = z.shape
    D1 = ek_w.shape[1]
    zf = jnp.transpose(z, (0, 2, 3, 1)).reshape(-1, C)
    zk, zg = zf[:, :D1], zf[:, D1:]
    norm = lambda x: x / jnp.maximum(jnp.linalg.norm(x, axis=-1, keepdims=True), 1e-12)
    zk, zg, ek, eg = norm(zk), norm(zg), norm(ek_w), norm(eg_w)
    dk = (jnp.sum(zk**2, 1, keepdims=True) + jnp.sum(ek**2, 1)[None] - 2 * zk @ ek.T)
    dg = (jnp.sum(zg**2, 1, keepdims=True) + jnp.sum(eg**2, 1)[None] - 2 * zg @ eg.T)
    d = dk + dg
    idx = jnp.argmin(d, axis=1)
    e_all = jnp.concatenate([ek, eg], -1)
    z_all = jnp.concatenate([zk, zg], -1)
    z_q = e_all[idx].reshape(B, H, W, C).transpose(0, 3, 1, 2)
    vq_loss = jnp.mean((e_all[idx] - z_all) ** 2)
    dknorm = jnp.mean(jnp.sum(dk**2, -1))
    dgnorm = jnp.mean(jnp.sum(dg**2, -1))
    return z_q, vq_loss, idx, dknorm, dgnorm


if __name__ == "__main__":
    key = jax.random.PRNGKey(0)
    nb_code = 256
    split = (32, 32)
    B, H, W = 2, 16, 16
    C = split[0] + split[1]

    k_z, k_ek, k_eg = jax.random.split(key, 3)
    z = jax.random.normal(k_z, (B, C, H, W), dtype=jnp.float32)

    # deterministic "__init__": uniform(-1/nb_code, 1/nb_code), then l2-normalize
    emb_vqkd = jax.random.uniform(k_ek, (nb_code, split[0]), jnp.float32,
                                  minval=-1.0 / nb_code, maxval=1.0 / nb_code)
    emb_vqgan = jax.random.uniform(k_eg, (nb_code, split[1]), jnp.float32,
                                   minval=-1.0 / nb_code, maxval=1.0 / nb_code)
    emb_vqkd = emb_vqkd / jnp.linalg.norm(emb_vqkd, axis=-1, keepdims=True)
    emb_vqgan = emb_vqgan / jnp.linalg.norm(emb_vqgan, axis=-1, keepdims=True)

    out = dual_vq_forward(z, emb_vqkd, emb_vqgan,
                          beta=0.25, entropy_loss_ratio=0.1, l2_norm=True)
    z_q, losses, extras = jax.block_until_ready(out)
    vq_loss, commit_loss, entropy_loss, usage, dknorm, dgnorm = losses
    _, _, idx = extras

    # sanity check against pure-JAX reference
    zq_ref, vq_ref, idx_ref, dkn_ref, dgn_ref = _reference_forward(z, emb_vqkd, emb_vqgan)
    assert z_q.shape == (B, C, H, W)
    assert idx.shape == (B * H * W,)
    assert bool(jnp.all(idx == idx_ref))
    assert bool(jnp.allclose(z_q, zq_ref, rtol=1e-5, atol=1e-5))
    assert bool(jnp.allclose(vq_loss, vq_ref, rtol=1e-5, atol=1e-6))
    assert bool(jnp.allclose(dknorm, dkn_ref, rtol=2e-3, atol=1e-2))
    assert bool(jnp.allclose(dgnorm, dgn_ref, rtol=2e-3, atol=1e-2))
    assert all(bool(jnp.isfinite(v)) for v in
               (vq_loss, commit_loss, entropy_loss, dknorm, dgnorm))

    print("KERNEL_OK")
</pallas_src>

<mosaic_0001>
module attributes {stable_mosaic.version = 11 : i64} {
  func.func @_dvq_kernel(%arg0: i32, %arg1: i32, %arg2: memref<1x64x256xf32, #tpu.memory_space<vmem>>, %arg3: memref<512x64xf32, #tpu.memory_space<vmem>>, %arg4: memref<64x256xf32, #tpu.memory_space<vmem>>, %arg5: memref<512x1xf32, #tpu.memory_space<vmem>>, %arg6: memref<1x1x1x256xi32, #tpu.memory_space<vmem>>, %arg7: memref<1x64x256xf32, #tpu.memory_space<vmem>>, %arg8: memref<1x1x1x128xf32, #tpu.memory_space<vmem>>, %arg9: memref<1x1x256x1xf32, #tpu.memory_space<vmem>>) attributes {dimension_semantics = [#tpu.dimension_semantics<parallel>, #tpu.dimension_semantics<parallel>], iteration_bounds = array<i64: 2, 1>, scalar_prefetch = 0 : i64, scratch_operands = 0 : i64, tpu.core_type = #tpu.core_type<tc>, window_params = [{transform_indices = @transform_0, window_bounds = array<i64: 1, 64, 256>}, {pipeline_mode = #tpu.pipeline_mode<synchronous>, transform_indices = @transform_1, window_bounds = array<i64: 512, 64>}, {pipeline_mode = #tpu.pipeline_mode<synchronous>, transform_indices = @transform_2, window_bounds = array<i64: 64, 256>}, {pipeline_mode = #tpu.pipeline_mode<synchronous>, transform_indices = @transform_3, window_bounds = array<i64: 512, 1>}, {transform_indices = @transform_4, window_bounds = array<i64: 1, 1, 1, 256>}, {transform_indices = @transform_5, window_bounds = array<i64: 1, 64, 256>}, {transform_indices = @transform_6, window_bounds = array<i64: 1, 1, 1, 128>}, {transform_indices = @transform_7, window_bounds = array<i64: 1, 1, 256, 1>}]} {
    %c0 = arith.constant 0 : index
    %c0_0 = arith.constant 0 : index
    %c0_1 = arith.constant 0 : index
    %0 = vector.load %arg2[%c0, %c0_0, %c0_1] : memref<1x64x256xf32, #tpu.memory_space<vmem>>, vector<1x64x256xf32>
    %1 = vector.shape_cast %0 : vector<1x64x256xf32> to vector<64x256xf32>
    %c0_2 = arith.constant 0 : index
    %c0_3 = arith.constant 0 : index
    %2 = vector.load %arg3[%c0_2, %c0_3] : memref<512x64xf32, #tpu.memory_space<vmem>>, vector<512x64xf32>
    %c0_4 = arith.constant 0 : index
    %c0_5 = arith.constant 0 : index
    %3 = vector.load %arg4[%c0_4, %c0_5] : memref<64x256xf32, #tpu.memory_space<vmem>>, vector<64x256xf32>
    %4 = tpu.iota {dimensions = array<i32: 0>} : vector<64x1xi32>
    %c32_i32 = arith.constant 32 : i32
    %5 = vector.broadcast %c32_i32 : i32 to vector<64x1xi32>
    %6 = arith.cmpi slt, %4, %5 : vector<64x1xi32>
    %7 = arith.extui %6 : vector<64x1xi1> to vector<64x1xi32>
    %8 = arith.sitofp %7 : vector<64x1xi32> to vector<64x1xf32>
    %cst = arith.constant 1.000000e+00 : f32
    %9 = vector.broadcast %cst : f32 to vector<64x1xf32>
    %10 = arith.subf %9, %8 : vector<64x1xf32>
    %11 = arith.mulf %1, %1 : vector<64x256xf32>
    %12 = vector.broadcast %8 : vector<64x1xf32> to vector<64x256xf32>
    %13 = arith.mulf %11, %12 : vector<64x256xf32>
    %cst_6 = arith.constant dense<0.000000e+00> : vector<256xf32>
    %14 = vector.multi_reduction <add>, %13, %cst_6 [0] : vector<64x256xf32> to vector<256xf32>
    %15 = vector.shape_cast %14 : vector<256xf32> to vector<1x256xf32>
    %16 = vector.broadcast %10 : vector<64x1xf32> to vector<64x256xf32>
    %17 = arith.mulf %11, %16 : vector<64x256xf32>
    %cst_7 = arith.constant dense<0.000000e+00> : vector<256xf32>
    %18 = vector.multi_reduction <add>, %17, %cst_7 [0] : vector<64x256xf32> to vector<256xf32>
    %19 = vector.shape_cast %18 : vector<256xf32> to vector<1x256xf32>
    %cst_8 = arith.constant 1.000000e-24 : f32
    %20 = vector.broadcast %cst_8 : f32 to vector<1x256xf32>
    %21 = arith.maximumf %15, %20 : vector<1x256xf32>
    %22 = math.rsqrt %21 : vector<1x256xf32>
    %cst_9 = arith.constant 1.000000e-24 : f32
    %23 = vector.broadcast %cst_9 : f32 to vector<1x256xf32>
    %24 = arith.maximumf %19, %23 : vector<1x256xf32>
    %25 = math.rsqrt %24 : vector<1x256xf32>
    %26 = vector.broadcast %8 : vector<64x1xf32> to vector<64x256xf32>
    %27 = vector.broadcast %22 : vector<1x256xf32> to vector<64x256xf32>
    %28 = arith.mulf %26, %27 : vector<64x256xf32>
    %29 = vector.broadcast %10 : vector<64x1xf32> to vector<64x256xf32>
    %30 = vector.broadcast %25 : vector<1x256xf32> to vector<64x256xf32>
    %31 = arith.mulf %29, %30 : vector<64x256xf32>
    %32 = arith.addf %28, %31 : vector<64x256xf32>
    %33 = arith.mulf %1, %32 : vector<64x256xf32>
    %cst_10 = arith.constant dense<0.000000e+00> : vector<512x256xf32>
    %34 = tpu.matmul %2, %33, %cst_10 {dimension_numbers = #tpu.dot_dimension_numbers<[1], [0], [0], [1], [0, 0, 1, 1], [], []>} : vector<512x64xf32>, vector<64x256xf32>, vector<512x256xf32> -> vector<512x256xf32>
    %35 = vector.extract_strided_slice %34 {offsets = [0, 0], sizes = [256, 256], strides = [1, 1]} : vector<512x256xf32> to vector<256x256xf32>
    %36 = vector.extract_strided_slice %34 {offsets = [256, 0], sizes = [256, 256], strides = [1, 1]} : vector<512x256xf32> to vector<256x256xf32>
    %cst_11 = arith.constant 2.000000e+00 : f32
    %37 = vector.broadcast %cst_11 : f32 to vector<256x256xf32>
    %38 = arith.mulf %37, %35 : vector<256x256xf32>
    %cst_12 = arith.constant 2.000000e+00 : f32
    %39 = vector.broadcast %cst_12 : f32 to vector<256x256xf32>
    %40 = arith.subf %39, %38 : vector<256x256xf32>
    %cst_13 = arith.constant 2.000000e+00 : f32
    %41 = vector.broadcast %cst_13 : f32 to vector<256x256xf32>
    %42 = arith.mulf %41, %36 : vector<256x256xf32>
    %cst_14 = arith.constant 2.000000e+00 : f32
    %43 = vector.broadcast %cst_14 : f32 to vector<256x256xf32>
    %44 = arith.subf %43, %42 : vector<256x256xf32>
    %45 = arith.addf %40, %44 : vector<256x256xf32>
    %cst_15 = arith.constant dense<0x7F800000> : vector<256xf32>
    %46 = vector.multi_reduction <minimumf>, %45, %cst_15 [0] : vector<256x256xf32> to vector<256xf32>
    %47 = vector.shape_cast %46 : vector<256xf32> to vector<1x256xf32>
    %48 = tpu.iota {dimensions = array<i32: 0>} : vector<256x256xi32>
    %49 = arith.sitofp %48 : vector<256x256xi32> to vector<256x256xf32>
    %50 = vector.broadcast %47 : vector<1x256xf32> to vector<256x256xf32>
    %51 = arith.cmpf ole, %45, %50 : vector<256x256xf32>
    %cst_16 = arith.constant 2.560000e+02 : f32
    %52 = vector.broadcast %cst_16 : f32 to vector<256x256xf32>
    %53 = arith.select %51, %49, %52 : vector<256x256xi1>, vector<256x256xf32>
    %cst_17 = arith.constant dense<0x7F800000> : vector<256xf32>
    %54 = vector.multi_reduction <minimumf>, %53, %cst_17 [0] : vector<256x256xf32> to vector<256xf32>
    %55 = vector.shape_cast %54 : vector<256xf32> to vector<1x256xf32>
    %56 = arith.fptosi %55 : vector<1x256xf32> to vector<1x256xi32>
    %c0_18 = arith.constant 0 : index
    %c0_19 = arith.constant 0 : index
    %c0_20 = arith.constant 0 : index
    %c0_21 = arith.constant 0 : index
    %57 = vector.load %arg6[%c0_18, %c0_19, %c0_20, %c0_21] : memref<1x1x1x256xi32, #tpu.memory_space<vmem>>, vector<1x1x1x256xi32>
    %58 = vector.shape_cast %57 : vector<1x1x1x256xi32> to vector<1x256xi32>
    %59 = vector.shape_cast %56 : vector<1x256xi32> to vector<1x1x1x256xi32>
    tpu.vector_store %arg6[%c0_18, %c0_19, %c0_20, %c0_21], %59 {strides = array<i32>} : memref<1x1x1x256xi32, #tpu.memory_space<vmem>>, vector<1x1x1x256xi32>,
    %60 = vector.broadcast %55 : vector<1x256xf32> to vector<256x256xf32>
    %61 = arith.cmpf oeq, %49, %60 : vector<256x256xf32>
    %62 = arith.extui %61 : vector<256x256xi1> to vector<256x256xi32>
    %63 = arith.sitofp %62 : vector<256x256xi32> to vector<256x256xf32>
    %cst_22 = arith.constant dense<0.000000e+00> : vector<64x256xf32>
    %64 = tpu.matmul %3, %63, %cst_22 {dimension_numbers = #tpu.dot_dimension_numbers<[1], [0], [0], [1], [0, 0, 1, 1], [], []>} : vector<64x256xf32>, vector<256x256xf32>, vector<64x256xf32> -> vector<64x256xf32>
    %c0_23 = arith.constant 0 : index
    %c0_24 = arith.constant 0 : index
    %c0_25 = arith.constant 0 : index
    %65 = vector.load %arg7[%c0_23, %c0_24, %c0_25] : memref<1x64x256xf32, #tpu.memory_space<vmem>>, vector<1x64x256xf32>
    %66 = vector.shape_cast %65 : vector<1x64x256xf32> to vector<64x256xf32>
    %67 = vector.shape_cast %64 : vector<64x256xf32> to vector<1x64x256xf32>
    tpu.vector_store %arg7[%c0_23, %c0_24, %c0_25], %67 {strides = array<i32>} : memref<1x64x256xf32, #tpu.memory_space<vmem>>, vector<1x64x256xf32>,
    %68 = vector.broadcast %47 : vector<1x256xf32> to vector<256x256xf32>
    %69 = arith.subf %68, %45 : vector<256x256xf32>
    %cst_26 = arith.constant 1.000000e+02 : f32
    %70 = vector.broadcast %cst_26 : f32 to vector<256x256xf32>
    %71 = arith.mulf %69, %70 : vector<256x256xf32>
    %72 = math.exp %71 : vector<256x256xf32>
    %cst_27 = arith.constant dense<0.000000e+00> : vector<256xf32>
    %73 = vector.multi_reduction <add>, %72, %cst_27 [0] : vector<256x256xf32> to vector<256xf32>
    %74 = vector.shape_cast %73 : vector<256xf32> to vector<1x256xf32>
    %75 = tpu.reciprocal %74 {approx = true} : vector<1x256xf32> -> vector<1x256xf32>
    %76 = arith.mulf %72, %71 : vector<256x256xf32>
    %cst_28 = arith.constant dense<0.000000e+00> : vector<256xf32>
    %77 = vector.multi_reduction <add>, %76, %cst_28 [0] : vector<256x256xf32> to vector<256xf32>
    %78 = vector.shape_cast %77 : vector<256xf32> to vector<1x256xf32>
    %79 = arith.mulf %78, %75 : vector<1x256xf32>
    %80 = math.log %74 : vector<1x256xf32>
    %81 = arith.subf %79, %80 : vector<1x256xf32>
    %82 = vector.broadcast %75 : vector<1x256xf32> to vector<256x256xf32>
    %83 = arith.mulf %72, %82 : vector<256x256xf32>
    %84 = arith.mulf %40, %40 : vector<256x256xf32>
    %cst_29 = arith.constant dense<0.000000e+00> : vector<256xf32>
    %85 = vector.multi_reduction <add>, %84, %cst_29 [1] : vector<256x256xf32> to vector<256xf32>
    %86 = vector.shape_cast %85 : vector<256xf32> to vector<256x1xf32>
    %cst_30 = arith.constant dense<0.000000e+00> : vector<1xf32>
    %87 = vector.multi_reduction <add>, %86, %cst_30 [0] : vector<256x1xf32> to vector<1xf32>
    %88 = vector.shape_cast %87 : vector<1xf32> to vector<1x1xf32>
    %89 = arith.mulf %44, %44 : vector<256x256xf32>
    %cst_31 = arith.constant dense<0.000000e+00> : vector<256xf32>
    %90 = vector.multi_reduction <add>, %89, %cst_31 [1] : vector<256x256xf32> to vector<256xf32>
    %91 = vector.shape_cast %90 : vector<256xf32> to vector<256x1xf32>
    %cst_32 = arith.constant dense<0.000000e+00> : vector<1xf32>
    %92 = vector.multi_reduction <add>, %91, %cst_32 [0] : vector<256x1xf32> to vector<1xf32>
    %93 = vector.shape_cast %92 : vector<1xf32> to vector<1x1xf32>
    %94 = arith.subf %64, %33 : vector<64x256xf32>
    %95 = arith.mulf %94, %94 : vector<64x256xf32>
    %cst_33 = arith.constant dense<0.000000e+00> : vector<64xf32>
    %96 = vector.multi_reduction <add>, %95, %cst_33 [1] : vector<64x256xf32> to vector<64xf32>
    %97 = vector.shape_cast %96 : vector<64xf32> to vector<64x1xf32>
    %cst_34 = arith.constant dense<0.000000e+00> : vector<1xf32>
    %98 = vector.multi_reduction <add>, %97, %cst_34 [0] : vector<64x1xf32> to vector<1xf32>
    %99 = vector.shape_cast %98 : vector<1xf32> to vector<1x1xf32>
    %cst_35 = arith.constant dense<0.000000e+00> : vector<1xf32>
    %100 = vector.multi_reduction <add>, %81, %cst_35 [1] : vector<1x256xf32> to vector<1xf32>
    %101 = vector.shape_cast %100 : vector<1xf32> to vector<1x1xf32>
    %102 = tpu.iota {dimensions = array<i32: 1>} : vector<1x128xi32>
    %c0_i32 = arith.constant 0 : i32
    %103 = vector.broadcast %c0_i32 : i32 to vector<1x128xi32>
    %104 = arith.cmpi eq, %102, %103 : vector<1x128xi32>
    %cst_36 = arith.constant 0.000000e+00 : f32
    %105 = vector.shape_cast %88 : vector<1x1xf32> to vector<1x1xf32>
    %106 = vector.broadcast %105 : vector<1x1xf32> to vector<1x128xf32>
    %107 = vector.broadcast %cst_36 : f32 to vector<1x128xf32>
    %108 = arith.select %104, %106, %107 : vector<1x128xi1>, vector<1x128xf32>
    %c1_i32 = arith.constant 1 : i32
    %109 = vector.broadcast %c1_i32 : i32 to vector<1x128xi32>
    %110 = arith.cmpi eq, %102, %109 : vector<1x128xi32>
    %cst_37 = arith.constant 0.000000e+00 : f32
    %111 = vector.shape_cast %93 : vector<1x1xf32> to vector<1x1xf32>
    %112 = vector.broadcast %111 : vector<1x1xf32> to vector<1x128xf32>
    %113 = vector.broadcast %cst_37 : f32 to vector<1x128xf32>
    %114 = arith.select %110, %112, %113 : vector<1x128xi1>, vector<1x128xf32>
    %115 = arith.addf %108, %114 : vector<1x128xf32>
    %c2_i32 = arith.constant 2 : i32
    %116 = vector.broadcast %c2_i32 : i32 to vector<1x128xi32>
    %117 = arith.cmpi eq, %102, %116 : vector<1x128xi32>
    %cst_38 = arith.constant 0.000000e+00 : f32
    %118 = vector.shape_cast %99 : vector<1x1xf32> to vector<1x1xf32>
    %119 = vector.broadcast %118 : vector<1x1xf32> to vector<1x128xf32>
    %120 = vector.broadcast %cst_38 : f32 to vector<1x128xf32>
    %121 = arith.select %117, %119, %120 : vector<1x128xi1>, vector<1x128xf32>
    %122 = arith.addf %115, %121 : vector<1x128xf32>
    %c3_i32 = arith.constant 3 : i32
    %123 = vector.broadcast %c3_i32 : i32 to vector<1x128xi32>
    %124 = arith.cmpi eq, %102, %123 : vector<1x128xi32>
    %cst_39 = arith.constant 0.000000e+00 : f32
    %125 = vector.shape_cast %101 : vector<1x1xf32> to vector<1x1xf32>
    %126 = vector.broadcast %125 : vector<1x1xf32> to vector<1x128xf32>
    %127 = vector.broadcast %cst_39 : f32 to vector<1x128xf32>
    %128 = arith.select %124, %126, %127 : vector<1x128xi1>, vector<1x128xf32>
    %129 = arith.addf %122, %128 : vector<1x128xf32>
    %c0_40 = arith.constant 0 : index
    %c0_41 = arith.constant 0 : index
    %c0_42 = arith.constant 0 : index
    %c0_43 = arith.constant 0 : index
    %130 = vector.load %arg8[%c0_40, %c0_41, %c0_42, %c0_43] : memref<1x1x1x128xf32, #tpu.memory_space<vmem>>, vector<1x1x1x128xf32>
    %131 = vector.shape_cast %130 : vector<1x1x1x128xf32> to vector<1x128xf32>
    %132 = vector.shape_cast %129 : vector<1x128xf32> to vector<1x1x1x128xf32>
    tpu.vector_store %arg8[%c0_40, %c0_41, %c0_42, %c0_43], %132 {strides = array<i32>} : memref<1x1x1x128xf32, #tpu.memory_space<vmem>>, vector<1x1x1x128xf32>,
    %cst_44 = arith.constant dense<0.000000e+00> : vector<256xf32>
    %133 = vector.multi_reduction <add>, %83, %cst_44 [1] : vector<256x256xf32> to vector<256xf32>
    %134 = vector.shape_cast %133 : vector<256xf32> to vector<256x1xf32>
    %c0_45 = arith.constant 0 : index
    %c0_46 = arith.constant 0 : index
    %c0_47 = arith.constant 0 : index
    %c0_48 = arith.constant 0 : index
    %135 = vector.load %arg9[%c0_45, %c0_46, %c0_47, %c0_48] : memref<1x1x256x1xf32, #tpu.memory_space<vmem>>, vector<1x1x256x1xf32>
    %136 = vector.shape_cast %135 : vector<1x1x256x1xf32> to vector<256x1xf32>
    %137 = vector.shape_cast %134 : vector<256x1xf32> to vector<1x1x256x1xf32>
    tpu.vector_store %arg9[%c0_45, %c0_46, %c0_47, %c0_48], %137 {strides = array<i32>} : memref<1x1x256x1xf32, #tpu.memory_space<vmem>>, vector<1x1x256x1xf32>,
    return
  }
  func.func @transform_0(%arg0: i32, %arg1: i32) -> (i32, i32, i32) {
    %c0_i32 = arith.constant 0 : i32
    %c0_i32_0 = arith.constant 0 : i32
    return %arg0, %c0_i32, %arg1 : i32, i32, i32
  }
  func.func @transform_1(%arg0: i32, %arg1: i32) -> (i32, i32) {
    %c0_i32 = arith.constant 0 : i32
    %c0_i32_0 = arith.constant 0 : i32
    %c0_i32_1 = arith.constant 0 : i32
    return %c0_i32, %c0_i32_0 : i32, i32
  }
  func.func @transform_2(%arg0: i32, %arg1: i32) -> (i32, i32) {
    %c0_i32 = arith.constant 0 : i32
    %c0_i32_0 = arith.constant 0 : i32
    %c0_i32_1 = arith.constant 0 : i32
    return %c0_i32, %c0_i32_0 : i32, i32
  }
  func.func @transform_3(%arg0: i32, %arg1: i32) -> (i32, i32) {
    %c0_i32 = arith.constant 0 : i32
    %c0_i32_0 = arith.constant 0 : i32
    %c0_i32_1 = arith.constant 0 : i32
    return %c0_i32, %c0_i32_0 : i32, i32
  }
  func.func @transform_4(%arg0: i32, %arg1: i32) -> (i32, i32, i32, i32) {
    %c0_i32 = arith.constant 0 : i32
    %c0_i32_0 = arith.constant 0 : i32
    %c0_i32_1 = arith.constant 0 : i32
    return %arg0, %arg1, %c0_i32, %c0_i32_0 : i32, i32, i32, i32
  }
  func.func @transform_5(%arg0: i32, %arg1: i32) -> (i32, i32, i32) {
    %c0_i32 = arith.constant 0 : i32
    %c0_i32_0 = arith.constant 0 : i32
    return %arg0, %c0_i32, %arg1 : i32, i32, i32
  }
  func.func @transform_6(%arg0: i32, %arg1: i32) -> (i32, i32, i32, i32) {
    %c0_i32 = arith.constant 0 : i32
    %c0_i32_0 = arith.constant 0 : i32
    %c0_i32_1 = arith.constant 0 : i32
    return %arg0, %arg1, %c0_i32, %c0_i32_0 : i32, i32, i32, i32
  }
  func.func @transform_7(%arg0: i32, %arg1: i32) -> (i32, i32, i32, i32) {
    %c0_i32 = arith.constant 0 : i32
    %c0_i32_0 = arith.constant 0 : i32
    %c0_i32_1 = arith.constant 0 : i32
    return %arg0, %arg1, %c0_i32, %c0_i32_0 : i32, i32, i32, i32
  }
}

</mosaic_0001>

<bundles_post_ra>
// kernel: dual_vq_forward.1
= control target key start
LH: loop header
LB: loop body
LE: loop exit
PB: predicated region body
PF: predicated region fallthrough
CT: control target
= control target key end

     0   :  { %s7353_s0 = inlined_call_operand.vmem [shape: f32[2,64,256], index: 0, kind: input, shape index: {}]   ;;  %s7354_s1 = inlined_call_operand.vmem [shape: f32[512,64], index: 1, kind: input, shape index: {}]   ;;  %s7355_s2 = inlined_call_operand.vmem [shape: f32[64,256], index: 2, kind: input, shape index: {}]   ;;  %s7356_s3 = inlined_call_operand.vmem [shape: f32[512,1], index: 3, kind: input, shape index: {}]   ;;  %s7357_s4 = inlined_call_operand.hbm [shape: s32[2,1,1,256], index: 4, kind: output, shape index: {0}]   ;;  %s7358_s5 = inlined_call_operand.vmem [shape: f32[2,64,256], index: 5, kind: output, shape index: {1}]   ;;  %s7359_s6 = inlined_call_operand.vmem [shape: f32[2,1,1,128], index: 6, kind: output, shape index: {2}]   ;;  %s7360_s7 = inlined_call_operand.vmem [shape: f32[2,1,256,1], index: 7, kind: output, shape index: {3}]  }
   0x1   :  { %7603 = sst [smem:[#allocation139_spill]] %s7353_s0 }
   0x2   :  { %13 = vsyncpa [#allocation3], 0 }
   0x3   :  { %15 = vsyncpa [#allocation3 + $0x1], 0  ;;  %s4254_s24 = smov 0   ;;  %s4256_s25 = smov 0  }
   0x4   :  { %s4258_s26 = smov 0   ;;  %s4260_s3 = smov 0  }
   0x5   :  { %s4262_s27 = smov 0   ;;  %s4264_s28 = smov 0  }
   0x6 LB: > { %s3697_s29 = sadd.s32 4294967295, %s4208_s28   ;;  %s3698_s30 = sadd.s32 4294967294, %s4208_s28   ;;  %s4208_s28 = sphi %s4264_s28, %s21_s28   ;;  %s4204_s27 = sphi %s4262_s27, %s8066_s27   ;;  %s4200_s3 = sphi %s4260_s3, %s8065_s3   ;;  %s4196_s26 = sphi %s4258_s26, %s8064_s26   ;;  %s4192_s25 = sphi %s4256_s25, %s8063_s25   ;;  %s4188_s24 = sphi %s4254_s24, %s8062_s24  }
   0x7   : > { %s33_s8 = sadd.s32 1, %s4204_s27  ;;  %s133_s9 = sadd.s32 1, %s4196_s26 }
   0x8   : > { %p35_p0 = scmp.ge.s32.totalorder %s33_s8, 2  ;;  %p143_p1 = scmp.ne.s32.totalorder %s4196_s26, %s4192_s25 }
   0x9   : > { %p144_p2 = scmp.eq.s32.totalorder %s3697_s29, 1  ;;  %p149_p3 = scmp.ne.s32.totalorder %s4192_s25, %s4188_s24 }
   0xa   : > { %s8068_s8 = smov (%p35_p0, %s33_s8), 0  ;;  %p150_p5 = scmp.eq.s32.totalorder %s3698_s30, 1 }
   0xb   : > { %p4294_p4 = por %p144_p2, %p143_p1  ;;  %s128_s11 = ssub.s32 %s4204_s27, %s8068_s8 }
   0xc   : > { %p3701_p6 = scmp.ge.s32.totalorder %s4208_s28, 1  ;;  %p131_p7 = scmp.eq.s32.totalorder %s128_s11, 0 }
   0xd   : > { %p4301_p8 = por %p150_p5, %p149_p3  ;;  %p274_p9 = scmp.lt.s32.totalorder %s4208_s28, 3 }
   0xe   : > { %s4307_s13 = scalar_select %p131_p7, %s4196_s26, %s133_s9  }
   0xf   : > { %p275_p10 = pnand %p3701_p6, %p274_p9 }
  0x11   : > { %278 = sbr.rel (%p275_p10) target bundleno = 1042 (0x412), region = 36 }
  0x16   : > { %p335_p11 = scmp.lt.s32.totalorder %s4200_s3, 1  ;;  %v4210_v0 = vmov 0.0   ;;  %s7606_s0 = sld [smem:[#allocation139_spill]]  ;;  %vm678_vm0 = vcmask 523264  }
  0x17   : > { %935 = vmatprep.mubr.f32.mxu0 %v4210_v0  ;;  %1151 = vmatprep.mubr.f32.mxu1 %v4210_v0  ;;  %s301_s17 = sand.u32 1, %s4192_s25   ;;  %s4213_s16 = smov [#allocation2]  }
  0x18   : > { %s4313_s14 = scalar_select %p335_p11, %s4200_s3, 1 }
  0x19   : > { %s3467_s30 = scalar_lea.sflag [#allocation3], %s301_s17 }
  0x1a   : > { %s3906_s15 = sshll.u32 %s4313_s14, 7  ;;  %s3908_s23 = sshll.u32 %s4313_s14, 8 }
  0x1b   : > { %s7187_s9 = scalar_lea.vmem %s7360_s7, %s3908_s23  ;;  %s7230_s19 = scalar_lea.vmem %s7358_s5, %s3906_s15 }
  0x1c   : > { %s4321_s18 = scalar_lea.vmem %s7606_s0, %s3906_s15  ;;  %s3909_s15 = sshll.u32 %s4200_s3, 5 }
  0x1d   : > { %v4324_v1 = vld [vmem:[%s4321_s18 + $0x8] sm:$0xff]  ;;  %v4327_v2 = vld [vmem:[%s4321_s18 + $0x18] sm:$0xff]  ;;  %v4357_v16 = vld [vmem:[%s4321_s18] sm:$0xff]  ;;  %s3505_s23 = scalar_lea.hbm %s7357_s4, %s3909_s15 }
  0x1e   : > { %v4330_v3 = vld [vmem:[%s4321_s18 + $0x28] sm:$0xff]  ;;  %v4333_v4 = vld [vmem:[%s4321_s18 + $0x38] sm:$0xff]  ;;  %v507_v7 = vmul.f32 %v4324_v1, %v4324_v1  ;;  %v509_v8 = vmul.f32 %v4327_v2, %v4327_v2  ;;  %v4360_v17 = vld [vmem:[%s4321_s18 + $0x10] sm:$0xff]  ;;  %v506_v30 = vmul.f32 %v4357_v16, %v4357_v16 }
  0x1f   : > { %v4336_v5 = vld [vmem:[%s4321_s18 + $0x48] sm:$0xff]  ;;  %v4339_v6 = vld [vmem:[%s4321_s18 + $0x58] sm:$0xff]  ;;  %v511_v9 = vmul.f32 %v4330_v3, %v4330_v3  ;;  %v513_v11 = vmul.f32 %v4333_v4, %v4333_v4  ;;  %v4363_v18 = vld [vmem:[%s4321_s18 + $0x20] sm:$0xff]  ;;  %v508_v31 = vmul.f32 %v4360_v17, %v4360_v17 }
  0x20   : > { %v4348_v10 = vld [vmem:[%s4321_s18 + $0x68] sm:$0xff]  ;;  %v515_v12 = vmul.f32 %v4336_v5, %v4336_v5  ;;  %v517_v13 = vmul.f32 %v4339_v6, %v4339_v6  ;;  %v551_v14 = vadd.f32 %v509_v8, %v507_v7  ;;  %v565_v15 = vmul.f32 0.0, %v507_v7  ;;  %v4366_v19 = vld [vmem:[%s4321_s18 + $0x78] sm:$0xff]  ;;  %v4369_v22 = vld [vmem:[%s4321_s18 + $0x40] sm:$0xff] }
  0x21   : > { %v567_v20 = vmul.f32 0.0, %v509_v8  ;;  %v569_v21 = vmul.f32 0.0, %v511_v9  ;;  %v519_v23 = vmul.f32 %v4348_v10, %v4348_v10  ;;  %v571_v26 = vmul.f32 0.0, %v513_v11  ;;  %v4374_v27 = vld [vmem:[%s4321_s18 + $0x30] sm:$0xff]  ;;  %v4388_v36 = vld [vmem:[%s4321_s18 + $0x60] sm:$0xff] }
  0x22   : > { %v531_v24 = vmul.f32 0.0, %v515_v12  ;;  %v552_v25 = vadd.f32 %v551_v14, %v511_v9  ;;  %v4377_v28 = vld [vmem:[%s4321_s18 + $0x50] sm:$0xff]  ;;  %v510_v32 = vmul.f32 %v4363_v18, %v4363_v18  ;;  %v521_v33 = vmul.f32 %v4366_v19, %v4366_v19 }
  0x23   : > { %v593_v29 = vadd.f32 %v567_v20, %v565_v15  ;;  %v533_v34 = vmul.f32 0.0, %v517_v13  ;;  %v514_v37 = vmul.f32 %v4369_v22, %v4369_v22  ;;  %v512_v39 = vmul.f32 %v4374_v27, %v4374_v27  ;;  %v4397_v44 = vld [vmem:[%s4321_s18 + $0x70] sm:$0xff]  ;;  %s6873_s18 = sshll.u32 %s301_s17, 1 }
  0x24   : > { %v553_v35 = vadd.f32 %v552_v25, %v513_v11  ;;  %v516_v40 = vmul.f32 %v4377_v28, %v4377_v28  ;;  %v538_v41 = vadd.f32 %v508_v31, %v506_v30  ;;  %v535_v42 = vmul.f32 0.0, %v519_v23  ;;  %s303_s21 = scalar_lea.vmem [#allocation2], %s6873_s18 }
  0x25   : > { %v594_v38 = vadd.f32 %v593_v29, %v569_v21  ;;  %v564_v45 = vmul.f32 0.0, %v506_v30  ;;  %v518_v47 = vmul.f32 %v4388_v36, %v4388_v36  ;;  %v530_v48 = vmul.f32 0.0, %v514_v37  ;;  %s3507_s29 = sshll.u32 %s303_s21, 4  ;;  %s3508_s29 = int_to_ptr.vmem [resolvable:$true] %s3507_s29 }
  0x26   : > { %v554_v43 = vadd.f32 %v553_v35, %v531_v24  ;;  %v539_v49 = vadd.f32 %v538_v41, %v510_v32  ;;  %v537_v50 = vmul.f32 0.0, %v521_v33  ;;  %v566_v52 = vmul.f32 0.0, %v508_v31  ;;  %s4132_s11 = scalar_lea.vmem %s3508_s29, 32 }
  0x27   : > { %v595_v46 = vadd.f32 %v594_v38, %v571_v26  ;;  %v568_v53 = vmul.f32 0.0, %v510_v32  ;;  %v520_v55 = vmul.f32 %v4397_v44, %v4397_v44  ;;  %v532_v56 = vmul.f32 0.0, %v516_v40  ;;  %p4133_p12 = scmp.ne.s32.totalorder %s3508_s29, %s4132_s11 }
  0x28   : > { %v555_v51 = vadd.f32 %v554_v43, %v533_v34  ;;  %v540_v57 = vadd.f32 %v539_v49, %v512_v39  ;;  %v570_v59 = vmul.f32 0.0, %v512_v39  ;;  %v580_v60 = vadd.f32 %v566_v52, %v564_v45 }
  0x29   : > { %v596_v54 = vadd.f32 %v595_v46, %v515_v12  ;;  %v534_v62 = vmul.f32 0.0, %v518_v47  ;;  %v536_v11 = vmul.f32 0.0, %v520_v55  ;;  %p4134_p13 = pnand %p4133_p12, %p4294_p4 }
  0x2a   : > { %v556_v58 = vadd.f32 %v555_v51, %v535_v42  ;;  %v541_v63 = vadd.f32 %v540_v57, %v530_v48  ;;  %v581_v8 = vadd.f32 %v580_v60, %v568_v53 }
  0x2b   : > { %v597_v61 = vadd.f32 %v596_v54, %v517_v13  ;;  %p4135_p0 = pneg %p4134_p13 }
  0x2c   : > { %v557_v7 = vadd.f32 %v556_v58, %v537_v50  ;;  %v542_v14 = vadd.f32 %v541_v63, %v532_v56  ;;  %v582_v20 = vadd.f32 %v581_v8, %v570_v59 }
  0x2d   : > { %v598_v9 = vadd.f32 %v597_v61, %v519_v23 }
  0x2e   : > { %v558_v15 = vrot.slane %v557_v7, 4  ;;  %v543_v12 = vadd.f32 %v542_v14, %v534_v62  ;;  %v583_v25 = vadd.f32 %v582_v20, %v514_v37 }
  0x2f   : > { %v599_v21 = vadd.f32 %v598_v9, %v521_v33 }
  0x30   : > { %v559_v24 = vadd.f32 %v558_v15, %v557_v7  ;;  %v544_v29 = vadd.f32 %v543_v12, %v536_v11  ;;  %v584_v31 = vadd.f32 %v583_v25, %v516_v40 }
  0x31   : > { %v600_v26 = vrot.slane %v599_v21, 4 }
  0x32   : > { %v560_v30 = vrot.slane %v559_v24, 2  ;;  %v545_v34 = vrot.slane %v544_v29, 4  ;;  %v585_v35 = vadd.f32 %v584_v31, %v518_v47  ;;  %v389_v31 = vld [vmem:[%s7354_s1 + $0x20] sm:$0xff] }
  0x33   : > { %v601_v32 = vadd.f32 %v600_v26, %v599_v21  ;;  %v423_v26 = vld [vmem:[%s7354_s1 + $0x130] sm:$0xff] }
  0x34   : > { %v561_v13 = vadd.f32 %v560_v30, %v559_v24  ;;  %v546_v39 = vadd.f32 %v545_v34, %v544_v29  ;;  %v586_v23 = vadd.f32 %v585_v35, %v520_v55  ;;  %v388_v29 = vld [vmem:[%s7354_s1 + $0x18] sm:$0xff]  ;;  %v390_v34 = vld [vmem:[%s7354_s1 + $0x28] sm:$0xff]  ;;  %v391_v35 = vld [vmem:[%s7354_s1 + $0x30] sm:$0xff] }
  0x35   : > { %v602_v38 = vrot.slane %v601_v32, 2  ;;  %v424_v30 = vld [vmem:[%s7354_s1 + $0x138] sm:$0xff] }
  0x36   : > { %v562_v41 = vrot.slane %v561_v13, 1  ;;  %v547_v43 = vrot.slane %v546_v39, 2  ;;  %v587_v46 = vrot.slane %v586_v23, 4 }
  0x37   : > { %v603_v42 = vadd.f32 %v602_v38, %v601_v32  ;;  %v425_v32 = vld [vmem:[%s7354_s1 + $0x140] sm:$0xff]  ;;  %v427_v38 = vld [vmem:[%s7354_s1 + $0x150] sm:$0xff] }
  0x38   : > { %v563_v45 = vadd.f32 %v562_v41, %v561_v13  ;;  %v548_v48 = vadd.f32 %v547_v43, %v546_v39  ;;  %v588_v37 = vadd.f32 %v587_v46, %v586_v23  ;;  %v426_v13 = vld [vmem:[%s7354_s1 + $0x148] sm:$0xff]  ;;  %v392_v39 = vld [vmem:[%s7354_s1 + $0x38] sm:$0xff]  ;;  %v393_v23 = vld [vmem:[%s7354_s1 + $0x40] sm:$0xff] }
  0x39   : > { %v604_v33 = vrot.slane %v603_v42, 1  ;;  %v428_v41 = vld [vmem:[%s7354_s1 + $0x158] sm:$0xff]  ;;  %v394_v43 = vld [vmem:[%s7354_s1 + $0x48] sm:$0xff]  ;;  %v395_v46 = vld [vmem:[%s7354_s1 + $0x50] sm:$0xff] }
  0x3a   : > { %v607_v49 = vmax.f32 %v563_v45, 1e-24  ;;  %v549_v51 = vrot.slane %v548_v48, 1  ;;  %v589_v40 = vrot.slane %v588_v37, 2  ;;  %v430_v45 = vld [vmem:[%s7354_s1 + $0x168] sm:$0xff] }
  0x3b   : > { %v605_v50 = vadd.f32 %v604_v33, %v603_v42  ;;  %v429_v42 = vld [vmem:[%s7354_s1 + $0x160] sm:$0xff]  ;;  %v431_v33 = vld [vmem:[%s7354_s1 + $0x170] sm:$0xff] }
  0x3c   : > { %3988 = vrsqrt.f32 %v607_v49  ;;  %v550_v53 = vadd.f32 %v549_v51, %v548_v48  ;;  %v590_v54 = vadd.f32 %v589_v40, %v588_v37  ;;  %v396_v48 = vld [vmem:[%s7354_s1 + $0x58] sm:$0xff]  ;;  %v397_v37 = vld [vmem:[%s7354_s1 + $0x60] sm:$0xff]  ;;  %v398_v51 = vld [vmem:[%s7354_s1 + $0x68] sm:$0xff] }
  0x3d   : > { %v611_v52 = vmax.f32 %v605_v50, 1e-24  ;;  %v432_v49 = vld [vmem:[%s7354_s1 + $0x178] sm:$0xff]  ;;  %v433_v50 = vld [vmem:[%s7354_s1 + $0x180] sm:$0xff]  ;;  %v434_v40 = vld [vmem:[%s7354_s1 + $0x188] sm:$0xff] }
  0x3e   : > { %v606_v47 = vmax.f32 %v550_v53, 1e-24  ;;  %v591_v56 = vrot.slane %v590_v54, 1  ;;  %v435_v53 = vld [vmem:[%s7354_s1 + $0x190] sm:$0xff] }
  0x3f   : > { %3990 = vrsqrt.f32 %v611_v52  ;;  %v399_v52 = vld [vmem:[%s7354_s1 + $0x70] sm:$0xff] }
  0x40   : > { %3992 = vrsqrt.f32 %v606_v47  ;;  %v592_v55 = vadd.f32 %v591_v56, %v590_v54  ;;  %v400_v54 = vld [vmem:[%s7354_s1 + $0x78] sm:$0xff]  ;;  %v401_v56 = vld [vmem:[%s7354_s1 + $0x80] sm:$0xff] }
  0x41   : > { %v436_v47 = vld [vmem:[%s7354_s1 + $0x198] sm:$0xff] }
  0x42   : > { %v610_v57 = vmax.f32 %v592_v55, 1e-24  ;;  %v437_v55 = vld [vmem:[%s7354_s1 + $0x1a0] sm:$0xff] }
  0x44   : > { %3994 = vrsqrt.f32 %v610_v57  ;;  %v402_v57 = vld [vmem:[%s7354_s1 + $0x88] sm:$0xff] }
  0x49   : > { %v3989_v58 = vpop.eup %3988 }
  0x4a   : > { %v623_v59 = vmul.f32 0.0, %v3989_v58 }
  0x4c   : > { %v3991_v60 = vpop.eup %3990 }
  0x4d   : > { %v655_v61 = vadd.f32 %v3991_v60, %v623_v59  ;;  %v3993_v62 = vpop.eup %3992  ;;  %v631_v9 = vmul.f32 0.0, %v3991_v60  ;;  %v403_v59 = vld [vmem:[%s7354_s1 + $0x90] sm:$0xff] }
  0x4e   : > { %v622_v7 = vmul.f32 0.0, %v3993_v62  ;;  %v439_v60 = vld [vmem:[%s7354_s1 + $0x1b0] sm:$0xff] }
  0x4f   : > { %v4404_v63 = vmul.f32 %v655_v61, %v4366_v19  ;;  %v4409_v15 = vmul.f32 %v655_v61, %v4348_v10  ;;  %v4418_v19 = vmul.f32 %v655_v61, %v4339_v6  ;;  %v647_v12 = vadd.f32 %v3989_v58, %v631_v9  ;;  %v438_v58 = vld [vmem:[%s7354_s1 + $0x1a8] sm:$0xff] }
  0x50   : > { %v4428_v10 = vmul.f32 %v655_v61, %v4336_v5  ;;  %v404_v61 = vld [vmem:[%s7354_s1 + $0x98] sm:$0xff]  ;;  %v406_v9 = vld [vmem:[%s7354_s1 + $0xa8] sm:$0xff] }
  0x51   : > { %7607 = vst [vmem:[#allocation5_spill] sm:$0xff] %v4404_v63  ;;  %887 = vmatprep.subr.mxu0 %v4404_v63  ;;  %3910 = vmatprep.subr.mxu1 %v4404_v63  ;;  %v3995_v8 = vpop.eup %3994  ;;  %7608 = vst [vmem:[#allocation6_spill] sm:$0xff] %v4409_v15 }
  0x52   : > { %v654_v11 = vadd.f32 %v3995_v8, %v622_v7  ;;  %v630_v14 = vmul.f32 0.0, %v3995_v8  ;;  %7611 = vst [vmem:[#allocation9_spill] sm:$0xff] %v4418_v19  ;;  %7613 = vst [vmem:[#allocation11_spill] sm:$0xff] %v4428_v10  ;;  %v405_v7 = vld [vmem:[%s7354_s1 + $0xa0] sm:$0xff] }
  0x53   : > { %v441_v8 = vld [vmem:[%s7354_s1 + $0x1c0] sm:$0xff] }
  0x54   : > { %v4412_v20 = vmul.f32 %v654_v11, %v4397_v44  ;;  %v4415_v21 = vmul.f32 %v654_v11, %v4388_v36  ;;  %v4423_v24 = vmul.f32 %v654_v11, %v4377_v28  ;;  %v646_v25 = vadd.f32 %v3993_v62, %v630_v14  ;;  %v422_v36 = vld [vmem:[%s7354_s1 + $0x128] sm:$0xff]  ;;  %v387_v44 = vld [vmem:[%s7354_s1 + $0x10] sm:$0xff]  ;;  %v440_v62 = vld [vmem:[%s7354_s1 + $0x1b8] sm:$0xff] }
  0x55   : > { %v4433_v6 = vmul.f32 %v654_v11, %v4369_v22  ;;  %v4438_v28 = vmul.f32 %v647_v12, %v4333_v4  ;;  %v4448_v22 = vmul.f32 %v647_v12, %v4330_v3  ;;  %v442_v11 = vld [vmem:[%s7354_s1 + $0x1c8] sm:$0xff]  ;;  %v407_v14 = vld [vmem:[%s7354_s1 + $0xb0] sm:$0xff] }
  0x56   : > { %7609 = vst [vmem:[#allocation7_spill] sm:$0xff] %v4412_v20  ;;  %7610 = vst [vmem:[#allocation8_spill] sm:$0xff] %v4415_v21  ;;  %888 = vmatpush1.msra.mxu0 %v4412_v20  ;;  %3918 = vmatpush1.msra.mxu1 %v4412_v20  ;;  %v4443_v5 = vmul.f32 %v646_v25, %v4374_v27  ;;  %v4453_v4 = vmul.f32 %v646_v25, %v4363_v18 }
  0x57   : > { %7612 = vst [vmem:[#allocation10_spill] sm:$0xff] %v4423_v24  ;;  %889 = vmatprep.subr.mxu0 %v4409_v15  ;;  %3911 = vmatprep.subr.mxu1 %v4409_v15  ;;  %7614 = vst [vmem:[#allocation12_spill] sm:$0xff] %v4433_v6  ;;  %v4458_v27 = vmul.f32 %v647_v12, %v4327_v2  ;;  %v4463_v3 = vmul.f32 %v646_v25, %v4360_v17  ;;  %v421_v17 = vld [vmem:[%s7354_s1 + $0x120] sm:$0xff] }
  0x58   : > { %890 = vmatpush1.msra.mxu0 %v4415_v21  ;;  %3919 = vmatpush1.msra.mxu1 %v4415_v21  ;;  %7615 = vst [vmem:[#allocation13_spill] sm:$0xff] %v4438_v28  ;;  %7616 = vst [vmem:[#allocation14_spill] sm:$0xff] %v4443_v5  ;;  %v4468_v18 = vmul.f32 %v647_v12, %v4324_v1  ;;  %v4473_v2 = vmul.f32 %v646_v25, %v4357_v16  ;;  %v385_v1 = vld [vmem:[%s7354_s1] sm:$0xff]  ;;  %v386_v16 = vld [vmem:[%s7354_s1 + $0x8] sm:$0xff] }
  0x59   : > { %891 = vmatprep.subr.mxu0 %v4418_v19  ;;  %3912 = vmatprep.subr.mxu1 %v4418_v19  ;;  %7617 = vst [vmem:[#allocation15_spill] sm:$0xff] %v4448_v22  ;;  %7618 = vst [vmem:[#allocation16_spill] sm:$0xff] %v4453_v4  ;;  %v443_v12 = vld [vmem:[%s7354_s1 + $0x1d0] sm:$0xff]  ;;  %v408_v25 = vld [vmem:[%s7354_s1 + $0xb8] sm:$0xff] }
  0x5a   : > { %892 = vmatpush1.msra.mxu0 %v4423_v24  ;;  %3920 = vmatpush1.msra.mxu1 %v4423_v24  ;;  %7619 = vst [vmem:[#allocation17_spill] sm:$0xff] %v4458_v27  ;;  %7620 = vst [vmem:[#allocation18_spill] sm:$0xff] %v4463_v3 }
  0x5b   : > { %893 = vmatprep.subr.mxu0 %v4428_v10  ;;  %3913 = vmatprep.subr.mxu1 %v4428_v10  ;;  %7621 = vst [vmem:[#allocation19_spill] sm:$0xff] %v4468_v18  ;;  %7622 = vst [vmem:[#allocation20_spill] sm:$0xff] %v4473_v2 }
  0x5c   : > { %894 = vmatpush1.msra.mxu0 %v4433_v6  ;;  %3921 = vmatpush1.msra.mxu1 %v4433_v6 }
  0x5d   : > { %895 = vmatprep.subr.mxu0 %v4438_v28  ;;  %3914 = vmatprep.subr.mxu1 %v4438_v28 }
  0x5e   : > { %896 = vmatpush1.msra.mxu0 %v4443_v5  ;;  %3922 = vmatpush1.msra.mxu1 %v4443_v5 }
  0x5f   : > { %897 = vmatprep.subr.mxu0 %v4448_v22  ;;  %3915 = vmatprep.subr.mxu1 %v4448_v22 }
  0x60   : > { %898 = vmatpush1.msra.mxu0 %v4453_v4  ;;  %3923 = vmatpush1.msra.mxu1 %v4453_v4 }
  0x61   : > { %899 = vmatprep.subr.mxu0 %v4458_v27  ;;  %3916 = vmatprep.subr.mxu1 %v4458_v27 }
  0x62   : > { %900 = vmatpush1.msra.mxu0 %v4463_v3  ;;  %3924 = vmatpush1.msra.mxu1 %v4463_v3 }
  0x63   : > { %901 = vmatprep.subr.mxu0 %v4468_v18  ;;  %3917 = vmatprep.subr.mxu1 %v4468_v18 }
  0x64   : > { %902 = vmatpush1.msra.mxu0 %v4473_v2  ;;  %3925 = vmatpush1.msra.mxu1 %v4473_v2 }
  0x65   : > { %3709 = vmatmul.mubr.msk.f32.vlgmr.msra.gmra.mxu0 %vm678_vm0, %v385_v1  ;;  %3745 = vmatmul.mubr.msk.f32.vlgmr.msra.gmra.mxu1 %vm678_vm0, %v421_v17  ;;  %v444_v1 = vld [vmem:[%s7354_s1 + $0x1d8] sm:$0xff]  ;;  %v409_v17 = vld [vmem:[%s7354_s1 + $0xc0] sm:$0xff] }
  0x66   : > { %941 = vmatprep.mubr.f32.mxu0 %v4210_v0  ;;  %1157 = vmatprep.mubr.f32.mxu1 %v4210_v0 }
  0x69   : > { %3710 = vmatmul.mubr.msk.f32.gmra.mxu0 %vm678_vm0, %v386_v16  ;;  %3746 = vmatmul.mubr.msk.f32.gmra.mxu1 %vm678_vm0, %v422_v36  ;;  %v445_v16 = vld [vmem:[%s7354_s1 + $0x1e0] sm:$0xff]  ;;  %v410_v36 = vld [vmem:[%s7354_s1 + $0xc8] sm:$0xff] }
  0x6a   : > { %947 = vmatprep.mubr.f32.mxu0 %v4210_v0  ;;  %1163 = vmatprep.mubr.f32.mxu1 %v4210_v0 }
  0x6d   : > { %3711 = vmatmul.mubr.msk.f32.gmra.mxu0 %vm678_vm0, %v387_v44  ;;  %3747 = vmatmul.mubr.msk.f32.gmra.mxu1 %vm678_vm0, %v423_v26  ;;  %v446_v44 = vld [vmem:[%s7354_s1 + $0x1e8] sm:$0xff]  ;;  %v411_v26 = vld [vmem:[%s7354_s1 + $0xd0] sm:$0xff] }
  0x6e   : > { %953 = vmatprep.mubr.f32.mxu0 %v4210_v0  ;;  %1169 = vmatprep.mubr.f32.mxu1 %v4210_v0 }
  0x71   : > { %3712 = vmatmul.mubr.msk.f32.gmra.mxu0 %vm678_vm0, %v388_v29  ;;  %3748 = vmatmul.mubr.msk.f32.gmra.mxu1 %vm678_vm0, %v424_v30  ;;  %v447_v29 = vld [vmem:[%s7354_s1 + $0x1f0] sm:$0xff]  ;;  %v412_v30 = vld [vmem:[%s7354_s1 + $0xd8] sm:$0xff] }
  0x72   : > { %959 = vmatprep.mubr.f32.mxu0 %v4210_v0  ;;  %1175 = vmatprep.mubr.f32.mxu1 %v4210_v0 }
  0x75   : > { %3713 = vmatmul.mubr.msk.f32.gmra.mxu0 %vm678_vm0, %v389_v31  ;;  %3749 = vmatmul.mubr.msk.f32.gmra.mxu1 %vm678_vm0, %v425_v32  ;;  %v448_v31 = vld [vmem:[%s7354_s1 + $0x1f8] sm:$0xff]  ;;  %v413_v32 = vld [vmem:[%s7354_s1 + $0xe0] sm:$0xff] }
  0x76   : > { %965 = vmatprep.mubr.f32.mxu0 %v4210_v0  ;;  %1181 = vmatprep.mubr.f32.mxu1 %v4210_v0 }
  0x79   : > { %3714 = vmatmul.mubr.msk.f32.gmra.mxu0 %vm678_vm0, %v390_v34  ;;  %3750 = vmatmul.mubr.msk.f32.gmra.mxu1 %vm678_vm0, %v426_v13  ;;  %v414_v34 = vld [vmem:[%s7354_s1 + $0xe8] sm:$0xff]  ;;  %v415_v13 = vld [vmem:[%s7354_s1 + $0xf0] sm:$0xff] }
  0x7a   : > { %971 = vmatprep.mubr.f32.mxu0 %v4210_v0  ;;  %1187 = vmatprep.mubr.f32.mxu1 %v4210_v0 }
  0x7d   : > { %3715 = vmatmul.mubr.msk.f32.gmra.mxu0 %vm678_vm0, %v391_v35  ;;  %3751 = vmatmul.mubr.msk.f32.gmra.mxu1 %vm678_vm0, %v427_v38  ;;  %v416_v35 = vld [vmem:[%s7354_s1 + $0xf8] sm:$0xff]  ;;  %v417_v38 = vld [vmem:[%s7354_s1 + $0x100] sm:$0xff] }
  0x7e   : > { %977 = vmatprep.mubr.f32.mxu0 %v4210_v0  ;;  %1193 = vmatprep.mubr.f32.mxu1 %v4210_v0 }
  0x81   : > { %3716 = vmatmul.mubr.msk.f32.gmra.mxu0 %vm678_vm0, %v392_v39  ;;  %3752 = vmatmul.mubr.msk.f32.gmra.mxu1 %vm678_vm0, %v428_v41  ;;  %v418_v39 = vld [vmem:[%s7354_s1 + $0x108] sm:$0xff]  ;;  %v419_v41 = vld [vmem:[%s7354_s1 + $0x110] sm:$0xff] }
  0x82   : > { %983 = vmatprep.mubr.f32.mxu0 %v4210_v0  ;;  %1199 = vmatprep.mubr.f32.mxu1 %v4210_v0 }
  0x85   : > { %3717 = vmatmul.mubr.msk.f32.gmra.mxu0 %vm678_vm0, %v393_v23  ;;  %3753 = vmatmul.mubr.msk.f32.gmra.mxu1 %vm678_vm0, %v429_v42  ;;  %v420_v23 = vld [vmem:[%s7354_s1 + $0x118] sm:$0xff] }
  0x86   : > { %989 = vmatprep.mubr.f32.mxu0 %v4210_v0  ;;  %1205 = vmatprep.mubr.f32.mxu1 %v4210_v0 }
  0x89   : > { %3718 = vmatmul.mubr.msk.f32.gmra.mxu0 %vm678_vm0, %v394_v43  ;;  %3754 = vmatmul.mubr.msk.f32.gmra.mxu1 %vm678_vm0, %v430_v45 }
  0x8a   : > { %995 = vmatprep.mubr.f32.mxu0 %v4210_v0  ;;  %1211 = vmatprep.mubr.f32.mxu1 %v4210_v0 }
  0x8d   : > { %3719 = vmatmul.mubr.msk.f32.gmra.mxu0 %vm678_vm0, %v395_v46  ;;  %3755 = vmatmul.mubr.msk.f32.gmra.mxu1 %vm678_vm0, %v431_v33 }
  0x8e   : > { %1001 = vmatprep.mubr.f32.mxu0 %v4210_v0  ;;  %1217 = vmatprep.mubr.f32.mxu1 %v4210_v0 }
  0x91   : > { %3720 = vmatmul.mubr.msk.f32.gmra.mxu0 %vm678_vm0, %v396_v48  ;;  %3756 = vmatmul.mubr.msk.f32.gmra.mxu1 %vm678_vm0, %v432_v49 }
  0x92   : > { %1007 = vmatprep.mubr.f32.mxu0 %v4210_v0  ;;  %1223 = vmatprep.mubr.f32.mxu1 %v4210_v0 }
  0x95   : > { %3721 = vmatmul.mubr.msk.f32.gmra.mxu0 %vm678_vm0, %v397_v37  ;;  %3757 = vmatmul.mubr.msk.f32.gmra.mxu1 %vm678_vm0, %v433_v50 }
  0x96   : > { %1013 = vmatprep.mubr.f32.mxu0 %v4210_v0  ;;  %1229 = vmatprep.mubr.f32.mxu1 %v4210_v0 }
  0x99   : > { %3722 = vmatmul.mubr.msk.f32.gmra.mxu0 %vm678_vm0, %v398_v51  ;;  %3758 = vmatmul.mubr.msk.f32.gmra.mxu1 %vm678_vm0, %v434_v40 }
  0x9a   : > { %1019 = vmatprep.mubr.f32.mxu0 %v4210_v0  ;;  %1235 = vmatprep.mubr.f32.mxu1 %v4210_v0 }
  0x9d   : > { %3723 = vmatmul.mubr.msk.f32.gmra.mxu0 %vm678_vm0, %v399_v52  ;;  %3759 = vmatmul.mubr.msk.f32.gmra.mxu1 %vm678_vm0, %v435_v53 }
  0x9e   : > { %1025 = vmatprep.mubr.f32.mxu0 %v4210_v0  ;;  %1241 = vmatprep.mubr.f32.mxu1 %v4210_v0 }
  0xa1   : > { %3724 = vmatmul.mubr.msk.f32.gmra.mxu0 %vm678_vm0, %v400_v54  ;;  %3760 = vmatmul.mubr.msk.f32.gmra.mxu1 %vm678_vm0, %v436_v47 }
  0xa2   : > { %1031 = vmatprep.mubr.f32.mxu0 %v4210_v0  ;;  %1247 = vmatprep.mubr.f32.mxu1 %v4210_v0 }
  0xa5   : > { %3725 = vmatmul.mubr.msk.f32.gmra.mxu0 %vm678_vm0, %v401_v56  ;;  %3761 = vmatmul.mubr.msk.f32.gmra.mxu1 %vm678_vm0, %v437_v55 }
  0xa6   : > { %1037 = vmatprep.mubr.f32.mxu0 %v4210_v0  ;;  %1253 = vmatprep.mubr.f32.mxu1 %v4210_v0 }
  0xa9   : > { %3726 = vmatmul.mubr.msk.f32.gmra.mxu0 %vm678_vm0, %v402_v57  ;;  %3762 = vmatmul.mubr.msk.f32.gmra.mxu1 %vm678_vm0, %v438_v58 }
  0xaa   : > { %1043 = vmatprep.mubr.f32.mxu0 %v4210_v0  ;;  %1259 = vmatprep.mubr.f32.mxu1 %v4210_v0 }
  0xad   : > { %3727 = vmatmul.mubr.msk.f32.gmra.mxu0 %vm678_vm0, %v403_v59  ;;  %3763 = vmatmul.mubr.msk.f32.gmra.mxu1 %vm678_vm0, %v439_v60 }
  0xae   : > { %1049 = vmatprep.mubr.f32.mxu0 %v4210_v0  ;;  %1265 = vmatprep.mubr.f32.mxu1 %v4210_v0 }
  0xb1   : > { %3728 = vmatmul.mubr.msk.f32.gmra.mxu0 %vm678_vm0, %v404_v61  ;;  %3764 = vmatmul.mubr.msk.f32.gmra.mxu1 %vm678_vm0, %v440_v62 }
  0xb2   : > { %1055 = vmatprep.mubr.f32.mxu0 %v4210_v0  ;;  %1271 = vmatprep.mubr.f32.mxu1 %v4210_v0 }
  0xb5   : > { %3729 = vmatmul.mubr.msk.f32.gmra.mxu0 %vm678_vm0, %v405_v7  ;;  %3765 = vmatmul.mubr.msk.f32.gmra.mxu1 %vm678_vm0, %v441_v8 }
  0xb6   : > { %1061 = vmatprep.mubr.f32.mxu0 %v4210_v0  ;;  %1277 = vmatprep.mubr.f32.mxu1 %v4210_v0 }
  0xb9   : > { %3730 = vmatmul.mubr.msk.f32.gmra.mxu0 %vm678_vm0, %v406_v9  ;;  %3766 = vmatmul.mubr.msk.f32.gmra.mxu1 %vm678_vm0, %v442_v11 }
  0xba   : > { %1067 = vmatprep.mubr.f32.mxu0 %v4210_v0  ;;  %1283 = vmatprep.mubr.f32.mxu1 %v4210_v0 }
  0xbd   : > { %3731 = vmatmul.mubr.msk.f32.gmra.mxu0 %vm678_vm0, %v407_v14  ;;  %3767 = vmatmul.mubr.msk.f32.gmra.mxu1 %vm678_vm0, %v443_v12 }
  0xbe   : > { %1073 = vmatprep.mubr.f32.mxu0 %v4210_v0  ;;  %1289 = vmatprep.mubr.f32.mxu1 %v4210_v0 }
  0xc1   : > { %3732 = vmatmul.mubr.msk.f32.gmra.mxu0 %vm678_vm0, %v408_v25  ;;  %3768 = vmatmul.mubr.msk.f32.gmra.mxu1 %vm678_vm0, %v444_v1 }
  0xc2   : > { %1079 = vmatprep.mubr.f32.mxu0 %v4210_v0  ;;  %1295 = vmatprep.mubr.f32.mxu1 %v4210_v0 }
  0xc5   : > { %3733 = vmatmul.mubr.msk.f32.gmra.mxu0 %vm678_vm0, %v409_v17  ;;  %3769 = vmatmul.mubr.msk.f32.gmra.mxu1 %vm678_vm0, %v445_v16 }
  0xc6   : > { %1085 = vmatprep.mubr.f32.mxu0 %v4210_v0  ;;  %1301 = vmatprep.mubr.f32.mxu1 %v4210_v0 }
  0xc9   : > { %3734 = vmatmul.mubr.msk.f32.gmra.mxu0 %vm678_vm0, %v410_v36  ;;  %3770 = vmatmul.mubr.msk.f32.gmra.mxu1 %vm678_vm0, %v446_v44 }
  0xca   : > { %1091 = vmatprep.mubr.f32.mxu0 %v4210_v0  ;;  %1307 = vmatprep.mubr.f32.mxu1 %v4210_v0 }
  0xcd   : > { %3735 = vmatmul.mubr.msk.f32.gmra.mxu0 %vm678_vm0, %v411_v26  ;;  %3771 = vmatmul.mubr.msk.f32.gmra.mxu1 %vm678_vm0, %v447_v29 }
  0xce   : > { %1097 = vmatprep.mubr.f32.mxu0 %v4210_v0  ;;  %1313 = vmatprep.mubr.f32.mxu1 %v4210_v0 }
  0xd1   : > { %3736 = vmatmul.mubr.msk.f32.gmra.mxu0 %vm678_vm0, %v412_v30  ;;  %3772 = vmatmul.mubr.msk.f32.gmra.mxu1 %vm678_vm0, %v448_v31 }
  0xd2   : > { %1103 = vmatprep.mubr.f32.mxu0 %v4210_v0 }
  0xd5   : > { %3737 = vmatmul.mubr.msk.f32.gmra.mxu0 %vm678_vm0, %v413_v32 }
  0xd6   : > { %1109 = vmatprep.mubr.f32.mxu0 %v4210_v0 }
  0xd9   : > { %3738 = vmatmul.mubr.msk.f32.gmra.mxu0 %vm678_vm0, %v414_v34 }
  0xda   : > { %1115 = vmatprep.mubr.f32.mxu0 %v4210_v0 }
  0xdd   : > { %3739 = vmatmul.mubr.msk.f32.gmra.mxu0 %vm678_vm0, %v415_v13 }
  0xde   : > { %1121 = vmatprep.mubr.f32.mxu0 %v4210_v0 }
  0xe1   : > { %3740 = vmatmul.mubr.msk.f32.gmra.mxu0 %vm678_vm0, %v416_v35 }
  0xe2   : > { %1127 = vmatprep.mubr.f32.mxu0 %v4210_v0 }
  0xe5   : > { %3741 = vmatmul.mubr.msk.f32.gmra.mxu0 %vm678_vm0, %v417_v38 }
  0xe6   : > { %1133 = vmatprep.mubr.f32.mxu0 %v4210_v0 }
  0xe9   : > { %3742 = vmatmul.mubr.msk.f32.gmra.mxu0 %vm678_vm0, %v418_v39 }
  0xea   : > { %1139 = vmatprep.mubr.f32.mxu0 %v4210_v0 }
  0xed   : > { %3743 = vmatmul.mubr.msk.f32.gmra.mxu0 %vm678_vm0, %v419_v41 }
  0xee   : > { %1145 = vmatprep.mubr.f32.mxu0 %v4210_v0 }
  0xf1   : > { %3744 = vmatmul.mubr.msk.f32.gmra.mxu0 %vm678_vm0, %v420_v23 }
 0x125   : > { %v937_v42 = vpop.f32.mrf.mxu0  ;;  %v1153_v43 = vpop.f32.mrf.mxu1 }
 0x126   : > { %v1320_v45 = vmul.f32 2.0, %v937_v42  ;;  %v1456_v46 = vmul.f32 2.0, %v1153_v43 }
 0x127   : > { %v939_v33 = vpop.f32.mrf.mxu0  ;;  %v1155_v48 = vpop.f32.mrf.mxu1 }
 0x128   : > { %v4801_v49 = vsub.f32 2.0, %v1456_v46  ;;  %v1321_v37 = vmul.f32 2.0, %v939_v33  ;;  %v1457_v50 = vmul.f32 2.0, %v1155_v48  ;;  %v4803_v51 = vsub.f32 2.0, %v1320_v45 }
 0x129   : > { %v943_v40 = vpop.f32.mrf.mxu0  ;;  %v1159_v0 = vpop.f32.mrf.mxu1 }
 0x12a   : > { %v4805_v52 = vsub.f32 2.0, %v1321_v37  ;;  %v4807_v53 = vsub.f32 2.0, %v1457_v50  ;;  %v1322_v54 = vmul.f32 2.0, %v943_v40  ;;  %v1458_v47 = vmul.f32 2.0, %v1159_v0 }
 0x12b   : > { %v945_v56 = vpop.f32.mrf.mxu0  ;;  %v1161_v55 = vpop.f32.mrf.mxu1  ;;  %v3062_v57 = vmul.f32 %v4801_v49, %v4801_v49  ;;  %v2857_v7 = vmul.f32 %v4803_v51, %v4803_v51 }
 0x12c   : > { %v1323_v58 = vmul.f32 2.0, %v945_v56  ;;  %v1459_v59 = vmul.f32 2.0, %v1161_v55  ;;  %v3063_v60 = vmul.f32 %v4807_v53, %v4807_v53  ;;  %v4813_v61 = vsub.f32 2.0, %v1458_v47 }
 0x12d   : > { %v949_v62 = vpop.f32.mrf.mxu0  ;;  %v2858_v8 = vmul.f32 %v4805_v52, %v4805_v52  ;;  %v1165_v9 = vpop.f32.mrf.mxu1  ;;  %v4819_v11 = vsub.f32 2.0, %v1322_v54 }
 0x12e   : > { %v4821_v14 = vsub.f32 2.0, %v1459_v59  ;;  %v1324_v12 = vmul.f32 2.0, %v949_v62  ;;  %v4823_v25 = vsub.f32 2.0, %v1323_v58  ;;  %v1460_v16 = vmul.f32 2.0, %v1165_v9 }
 0x12f   : > { %v951_v1 = vpop.f32.mrf.mxu0  ;;  %v2921_v17 = vadd.f32 %v2858_v8, %v2857_v7  ;;  %v1167_v36 = vpop.f32.mrf.mxu1  ;;  %v3064_v44 = vmul.f32 %v4813_v61, %v4813_v61  ;;  %v3130_v13 = vadd.f32 %v3063_v60, %v3062_v57  ;;  %v2859_v23 = vmul.f32 %v4819_v11, %v4819_v11 }
 0x130   : > { %v4827_v26 = vsub.f32 2.0, %v1324_v12  ;;  %v1325_v29 = vmul.f32 2.0, %v951_v1  ;;  %v1461_v30 = vmul.f32 2.0, %v1167_v36  ;;  %v4829_v32 = vsub.f32 2.0, %v1460_v16 }
 0x131   : > { %2922 = vadd.xlane.f32.xlu0 %v2921_v17  ;;  %v955_v31 = vpop.f32.mrf.mxu0  ;;  %v3065_v34 = vmul.f32 %v4821_v14, %v4821_v14  ;;  %v1171_v35 = vpop.f32.mrf.mxu1  ;;  %v2860_v42 = vmul.f32 %v4823_v25, %v4823_v25 }
 0x132   : > { %v4833_v38 = vsub.f32 2.0, %v1325_v29  ;;  %v1326_v39 = vmul.f32 2.0, %v955_v31  ;;  %v4835_v41 = vsub.f32 2.0, %v1461_v30  ;;  %v1462_v46 = vmul.f32 2.0, %v1171_v35 }
 0x133   : > { %v957_v43 = vpop.f32.mrf.mxu0  ;;  %v3133_v45 = vadd.f32 %v3065_v34, %v3064_v44  ;;  %v1173_v33 = vpop.f32.mrf.mxu1  ;;  %v2861_v48 = vmul.f32 %v4827_v26, %v4827_v26  ;;  %v3066_v0 = vmul.f32 %v4829_v32, %v4829_v32  ;;  %v2924_v9 = vadd.f32 %v2860_v42, %v2859_v23 }
 0x134   : > { %v2862_v37 = vmul.f32 %v4833_v38, %v4833_v38  ;;  %v4845_v50 = vsub.f32 2.0, %v1326_v39  ;;  %v1327_v40 = vmul.f32 2.0, %v957_v43  ;;  %v3067_v54 = vmul.f32 %v4835_v41, %v4835_v41 }
 0x135   : > { %3134 = vadd.xlane.f32.xlu1 %v3133_v45  ;;  %3131 = vadd.xlane.f32.xlu0 %v3130_v13  ;;  %v961_v47 = vpop.f32.mrf.mxu0  ;;  %v4851_v56 = vsub.f32 2.0, %v1462_v46  ;;  %v1463_v55 = vmul.f32 2.0, %v1173_v33  ;;  %v1177_v57 = vpop.f32.mrf.mxu1 }
 0x136   : > { %v4853_v58 = vsub.f32 2.0, %v1327_v40  ;;  %v1328_v59 = vmul.f32 2.0, %v961_v47  ;;  %v2927_v60 = vadd.f32 %v2862_v37, %v2861_v48  ;;  %v2863_v62 = vmul.f32 %v4845_v50, %v4845_v50 }
 0x137   : > { %v963_v7 = vpop.f32.mrf.mxu0  ;;  %v4857_v8 = vsub.f32 2.0, %v1463_v55  ;;  %v1464_v12 = vmul.f32 2.0, %v1177_v57  ;;  %v1179_v1 = vpop.f32.mrf.mxu1  ;;  %v3068_v29 = vmul.f32 %v4851_v56, %v4851_v56  ;;  %v3136_v13 = vadd.f32 %v3067_v54, %v3066_v0 }
 0x138   : > { %v2864_v17 = vmul.f32 %v4853_v58, %v4853_v58  ;;  %v1392_v16 = vsub.f32 2.0, %v1328_v59  ;;  %v1329_v36 = vmul.f32 2.0, %v963_v7  ;;  %v1465_v44 = vmul.f32 2.0, %v1179_v1 }
 0x139   : > { %v3069_v30 = vmul.f32 %v4857_v8, %v4857_v8  ;;  %2925 = vadd.xlane.f32.xlu0 %v2924_v9  ;;  %2928 = vadd.xlane.f32.xlu1 %v2927_v60  ;;  %v967_v31 = vpop.f32.mrf.mxu0  ;;  %v4865_v34 = vsub.f32 2.0, %v1464_v12  ;;  %v1183_v35 = vpop.f32.mrf.mxu1 }
 0x13a   : > { %v4868_v39 = vadd.f32 %v4801_v49, %v1392_v16  ;;  %v1393_v23 = vsub.f32 2.0, %v1329_v36  ;;  %v1330_v42 = vmul.f32 2.0, %v967_v31  ;;  %v4870_v45 = vsub.f32 2.0, %v1465_v44 }
 0x13b   : > { %v969_v43 = vpop.f32.mrf.mxu0  ;;  %v2930_v46 = vadd.f32 %v2864_v17, %v2863_v62  ;;  %v1466_v33 = vmul.f32 2.0, %v1183_v35  ;;  %v1185_v48 = vpop.f32.mrf.mxu1  ;;  %v2865_v57 = vmul.f32 %v1392_v16, %v1392_v16  ;;  %v3070_v0 = vmul.f32 %v4865_v34, %v4865_v34 }
 0x13c   : > { %v4873_v37 = vadd.f32 %v4807_v53, %v1393_v23  ;;  %v2866_v40 = vmul.f32 %v1393_v23, %v1393_v23  ;;  %v1394_v47 = vsub.f32 2.0, %v1330_v42  ;;  %v1331_v55 = vmul.f32 2.0, %v969_v43 }
 0x13d   : > { %3137 = vadd.xlane.f32.xlu0 %v3136_v13  ;;  %2931 = vadd.xlane.f32.xlu1 %v2930_v46  ;;  %v973_v49 = vpop.f32.mrf.mxu0  ;;  %v1467_v54 = vmul.f32 2.0, %v1185_v48  ;;  %v3139_v59 = vadd.f32 %v3069_v30, %v3068_v29  ;;  %v1189_v60 = vpop.f32.mrf.mxu1  ;;  %v4880_v53 = vsub.f32 2.0, %v1466_v33  ;;  %v3071_v12 = vmul.f32 %v4870_v45, %v4870_v45 }
 0x13e   : > { %7623 = vst [vmem:[#allocation21_spill] sm:$0xff] %v4873_v37  ;;  %v4878_v62 = vadd.f32 %v4813_v61, %v1394_v47  ;;  %v1395_v7 = vsub.f32 2.0, %v1331_v55  ;;  %v1332_v9 = vmul.f32 2.0, %v973_v49  ;;  %v2933_v16 = vadd.f32 %v2866_v40, %v2865_v57 }
 0x13f   : > { %v975_v1 = vpop.f32.mrf.mxu0  ;;  %v4884_v17 = vsub.f32 2.0, %v1467_v54  ;;  %v1468_v36 = vmul.f32 2.0, %v1189_v60  ;;  %v1191_v44 = vpop.f32.mrf.mxu1  ;;  %v2867_v61 = vmul.f32 %v1394_v47, %v1394_v47  ;;  %v3072_v33 = vmul.f32 %v4880_v53, %v4880_v53 }
 0x140   : > { %v4887_v31 = vadd.f32 %v4821_v14, %v1395_v7  ;;  %v2868_v29 = vmul.f32 %v1395_v7, %v1395_v7  ;;  %v1396_v30 = vsub.f32 2.0, %v1332_v9  ;;  %v1333_v13 = vmul.f32 2.0, %v975_v1 }
 0x141   : > { %3140 = vadd.xlane.f32.xlu1 %v3139_v59  ;;  %2934 = vadd.xlane.f32.xlu0 %v2933_v16  ;;  %v979_v35 = vpop.f32.mrf.mxu0  ;;  %v1469_v23 = vmul.f32 2.0, %v1191_v44  ;;  %v1195_v42 = vpop.f32.mrf.mxu1  ;;  %v1642_v43 = vmin.f32 %v4878_v62, %v4868_v39  ;;  %v3073_v40 = vmul.f32 %v4884_v17, %v4884_v17  ;;  %v4898_v47 = vsub.f32 2.0, %v1468_v36 }
 0x142   : > { %7624 = vst [vmem:[#allocation22_spill] sm:$0xff] %v4887_v31  ;;  %v4892_v46 = vadd.f32 %v4829_v32, %v1396_v30  ;;  %v1334_v14 = vmul.f32 2.0, %v979_v35  ;;  %v1397_v48 = vsub.f32 2.0, %v1333_v13  ;;  %v3142_v57 = vadd.f32 %v3071_v12, %v3070_v0 }
 0x143   : > { %v981_v55 = vpop.f32.mrf.mxu0  ;;  %v1197_v49 = vpop.f32.mrf.mxu1  ;;  %v4900_v60 = vsub.f32 2.0, %v1469_v23  ;;  %v2936_v7 = vadd.f32 %v2868_v29, %v2867_v61  ;;  %v1679_v32 = vmin.f32 %v4887_v31, %v4873_v37  ;;  %v1470_v44 = vmul.f32 2.0, %v1195_v42 }
 0x144   : > { %v1398_v54 = vsub.f32 2.0, %v1334_v14  ;;  %v1335_v59 = vmul.f32 2.0, %v981_v55  ;;  %v4905_v9 = vadd.f32 %v4835_v41, %v1397_v48  ;;  %v2870_v1 = vmul.f32 %v1397_v48, %v1397_v48 }
 0x145   : > { %3143 = vadd.xlane.f32.xlu0 %v3142_v57  ;;  %v985_v16 = vpop.f32.mrf.mxu0  ;;  %v1201_v36 = vpop.f32.mrf.mxu1  ;;  %v2869_v13 = vmul.f32 %v1396_v30, %v1396_v30  ;;  %2937 = vadd.xlane.f32.xlu1 %v2936_v7  ;;  %v1644_v29 = vmin.f32 %v1642_v43, %v4892_v46  ;;  %v3074_v61 = vmul.f32 %v4898_v47, %v4898_v47  ;;  %v1471_v41 = vmul.f32 2.0, %v1197_v49 }
 0x146   : > { %7625 = vst [vmem:[#allocation23_spill] sm:$0xff] %v4905_v9  ;;  %v4908_v0 = vadd.f32 %v4851_v56, %v1398_v54  ;;  %v1399_v12 = vsub.f32 2.0, %v1335_v59  ;;  %v1336_v35 = vmul.f32 2.0, %v985_v16  ;;  %v3145_v14 = vadd.f32 %v3073_v40, %v3072_v33 }
 0x147   : > { %v987_v23 = vpop.f32.mrf.mxu0  ;;  %v1203_v48 = vpop.f32.mrf.mxu1  ;;  %v3075_v30 = vmul.f32 %v4900_v60, %v4900_v60  ;;  %v4918_v42 = vsub.f32 2.0, %v1470_v44  ;;  %v2871_v57 = vmul.f32 %v1398_v54, %v1398_v54  ;;  %v4920_v7 = vsub.f32 2.0, %v1471_v41 }
 0x148   : > { %v4914_v55 = vadd.f32 %v4857_v8, %v1399_v12  ;;  %v1400_v56 = vsub.f32 2.0, %v1336_v35  ;;  %v1337_v59 = vmul.f32 2.0, %v987_v23  ;;  %v2939_v43 = vadd.f32 %v2870_v1, %v2869_v13 }
 0x149   : > { %v991_v16 = vpop.f32.mrf.mxu0  ;;  %v1207_v63 = vpop.f32.mrf.mxu1  ;;  %v1681_v49 = vmin.f32 %v1679_v32, %v4905_v9  ;;  %v2872_v33 = vmul.f32 %v1399_v12, %v1399_v12  ;;  %3146 = vadd.xlane.f32.xlu1 %v3145_v14  ;;  %v1646_v20 = vmin.f32 %v1644_v29, %v4908_v0  ;;  %v1472_v44 = vmul.f32 2.0, %v1201_v36 }
 0x14a   : > { %7626 = vst [vmem:[#allocation24_spill] sm:$0xff] %v4914_v55  ;;  %v4924_v40 = vadd.f32 %v4865_v34, %v1400_v56  ;;  %v1338_v8 = vmul.f32 2.0, %v991_v16  ;;  %v1401_v35 = vsub.f32 2.0, %v1337_v59  ;;  %2940 = vadd.xlane.f32.xlu0 %v2939_v43  ;;  %v1473_v23 = vmul.f32 2.0, %v1203_v48 }
 0x14b   : > { %v993_v54 = vpop.f32.mrf.mxu0  ;;  %v1209_v41 = vpop.f32.mrf.mxu1  ;;  %v3076_v1 = vmul.f32 %v4918_v42, %v4918_v42  ;;  %v3148_v32 = vadd.f32 %v3075_v30, %v3074_v61  ;;  %v3077_v14 = vmul.f32 %v4920_v7, %v4920_v7  ;;  %v4934_v29 = vsub.f32 2.0, %v1472_v44 }
 0x14c   : > { %v1402_v13 = vsub.f32 2.0, %v1338_v8  ;;  %v1339_v15 = vmul.f32 2.0, %v993_v54  ;;  %v4930_v12 = vadd.f32 %v4870_v45, %v1401_v35  ;;  %v2874_v34 = vmul.f32 %v1401_v35, %v1401_v35 }
 0x14d   : > { %v997_v59 = vpop.f32.mrf.mxu0  ;;  %v1213_v36 = vpop.f32.mrf.mxu1  ;;  %v4939_v16 = vsub.f32 2.0, %v1473_v23  ;;  %v2942_v8 = vadd.f32 %v2872_v33, %v2871_v57  ;;  %v1683_v61 = vmin.f32 %v1681_v49, %v4914_v55  ;;  %v2873_v30 = vmul.f32 %v1400_v56, %v1400_v56 }
 0x14e   : > { %7627 = vst [vmem:[#allocation25_spill] sm:$0xff] %v4930_v12  ;;  %v4937_v48 = vadd.f32 %v4880_v53, %v1402_v13  ;;  %v1403_v43 = vsub.f32 2.0, %v1339_v15  ;;  %3149 = vadd.xlane.f32.xlu0 %v3148_v32  ;;  %v1340_v45 = vmul.f32 2.0, %v997_v59  ;;  %v4943_v21 = vmin.f32 %v1646_v20, %v4924_v40 }
 0x14f   : > { %v999_v35 = vpop.f32.mrf.mxu0  ;;  %v1215_v54 = vpop.f32.mrf.mxu1  ;;  %v3078_v44 = vmul.f32 %v4934_v29, %v4934_v29  ;;  %2943 = vadd.xlane.f32.xlu1 %v2942_v8  ;;  %v1474_v15 = vmul.f32 2.0, %v1207_v63  ;;  %v1475_v33 = vmul.f32 2.0, %v1209_v41  ;;  %v3151_v49 = vadd.f32 %v3077_v14, %v3076_v1 }
 0x150   : > { %v4948_v53 = vadd.f32 %v4884_v17, %v1403_v43  ;;  %v1404_v23 = vsub.f32 2.0, %v1340_v45  ;;  %v1341_v57 = vmul.f32 2.0, %v999_v35  ;;  %v3079_v59 = vmul.f32 %v4939_v16, %v4939_v16 }
 0x151   : > { %v1003_v56 = vpop.f32.mrf.mxu0  ;;  %v1219_v32 = vpop.f32.mrf.mxu1  ;;  %v4952_v19 = vsub.f32 2.0, %v1474_v15  ;;  %v2945_v20 = vadd.f32 %v2874_v34, %v2873_v30  ;;  %v2876_v10 = vmul.f32 %v1403_v43, %v1403_v43  ;;  %v4957_v8 = vsub.f32 2.0, %v1475_v33 }
 0x152   : > { %7628 = vst [vmem:[#allocation26_spill] sm:$0xff] %v4948_v53  ;;  %v1342_v24 = vmul.f32 2.0, %v1003_v56  ;;  %v4955_v6 = vadd.f32 %v4898_v47, %v1404_v23  ;;  %v1405_v17 = vsub.f32 2.0, %v1341_v57  ;;  %v2875_v41 = vmul.f32 %v1402_v13, %v1402_v13 }
 0x153   : > { %v1005_v63 = vpop.f32.mrf.mxu0  ;;  %v1221_v45 = vpop.f32.mrf.mxu1  ;;  %3152 = vadd.xlane.f32.xlu1 %v3151_v49  ;;  %2946 = vadd.xlane.f32.xlu0 %v2945_v20  ;;  %v1476_v14 = vmul.f32 2.0, %v1213_v36  ;;  %v1685_v15 = vmin.f32 %v1683_v61, %v4930_v12  ;;  %v3080_v34 = vmul.f32 %v4952_v19, %v4952_v19  ;;  %v3081_v33 = vmul.f32 %v4957_v8, %v4957_v8 }
 0x154   : > { %v1406_v1 = vsub.f32 2.0, %v1342_v24  ;;  %v1343_v35 = vmul.f32 2.0, %v1005_v63  ;;  %v4963_v43 = vadd.f32 %v4900_v60, %v1405_v17  ;;  %v2878_v47 = vmul.f32 %v1405_v17, %v1405_v17 }
 0x155   : > { %v1009_v30 = vpop.f32.mrf.mxu0  ;;  %v1225_v57 = vpop.f32.mrf.mxu1  ;;  %v4970_v24 = vsub.f32 2.0, %v1476_v14  ;;  %v1477_v49 = vmul.f32 2.0, %v1215_v54  ;;  %v3154_v61 = vadd.f32 %v3079_v59, %v3078_v44  ;;  %v2948_v56 = vadd.f32 %v2876_v10, %v2875_v41 }
 0x156   : > { %7629 = vst [vmem:[#allocation27_spill] sm:$0xff] %v4963_v43  ;;  %v4968_v13 = vadd.f32 %v4918_v42, %v1406_v1  ;;  %v1407_v36 = vsub.f32 2.0, %v1343_v35  ;;  %v1650_v60 = vmin.f32 %v4943_v21, %v4937_v48  ;;  %v1687_v17 = vmin.f32 %v1685_v15, %v4948_v53 }
 0x157   : > { %v1011_v20 = vpop.f32.mrf.mxu0  ;;  %v1227_v63 = vpop.f32.mrf.mxu1  ;;  %v2877_v28 = vmul.f32 %v1404_v23, %v1404_v23  ;;  %v4978_v22 = vsub.f32 2.0, %v1477_v49  ;;  %3155 = vadd.xlane.f32.xlu0 %v3154_v61  ;;  %2949 = vadd.xlane.f32.xlu1 %v2948_v56  ;;  %v1344_v42 = vmul.f32 2.0, %v1009_v30  ;;  %v1478_v14 = vmul.f32 2.0, %v1219_v32 }
 0x158   : > { %v4976_v5 = vadd.f32 %v4920_v7, %v1407_v36  ;;  %v1345_v54 = vmul.f32 2.0, %v1011_v20  ;;  %v3082_v59 = vmul.f32 %v4970_v24, %v4970_v24  ;;  %v1479_v41 = vmul.f32 2.0, %v1221_v45 }
 0x159   : > { %v1015_v44 = vpop.f32.mrf.mxu0  ;;  %v1231_v10 = vpop.f32.mrf.mxu1  ;;  %v3157_v21 = vadd.f32 %v3081_v33, %v3080_v34  ;;  %v2951_v35 = vadd.f32 %v2878_v47, %v2877_v28  ;;  %v3083_v23 = vmul.f32 %v4978_v22, %v4978_v22  ;;  %v1408_v7 = vsub.f32 2.0, %v1344_v42 }
 0x15a   : > { %7630 = vst [vmem:[#allocation28_spill] sm:$0xff] %v4976_v5  ;;  %v4984_v15 = vsub.f32 2.0, %v1478_v14  ;;  %v1409_v49 = vsub.f32 2.0, %v1345_v54  ;;  %v4986_v30 = vsub.f32 2.0, %v1479_v41  ;;  %v1346_v32 = vmul.f32 2.0, %v1015_v44 }
 0x15b   : > { %v1017_v61 = vpop.f32.mrf.mxu0  ;;  %v1233_v56 = vpop.f32.mrf.mxu1  ;;  %v1480_v20 = vmul.f32 2.0, %v1225_v57  ;;  %v1652_v27 = vmin.f32 %v1650_v60, %v4955_v6  ;;  %v2880_v3 = vmul.f32 %v1407_v36, %v1407_v36  ;;  %v4990_v45 = vadd.f32 %v4934_v29, %v1408_v7  ;;  %3158 = vadd.xlane.f32.xlu1 %v3157_v21  ;;  %2952 = vadd.xlane.f32.xlu0 %v2951_v35 }
 0x15c   : > { %v1347_v4 = vmul.f32 2.0, %v1017_v61  ;;  %v4993_v28 = vadd.f32 %v4939_v16, %v1409_v49  ;;  %v1689_v33 = vmin.f32 %v1687_v17, %v4963_v43  ;;  %v2879_v42 = vmul.f32 %v1406_v1, %v1406_v1 }
 0x15d   : > { %v1021_v34 = vpop.f32.mrf.mxu0  ;;  %v1237_v47 = vpop.f32.mrf.mxu1  ;;  %v3084_v14 = vmul.f32 %v4984_v15, %v4984_v15  ;;  %v1410_v57 = vsub.f32 2.0, %v1346_v32  ;;  %v3085_v36 = vmul.f32 %v4986_v30, %v4986_v30  ;;  %v5000_v60 = vsub.f32 2.0, %v1480_v20 }
 0x15e   : > { %7631 = vst [vmem:[#allocation29_spill] sm:$0xff] %v4993_v28  ;;  %v1411_v29 = vsub.f32 2.0, %v1347_v4  ;;  %v1481_v54 = vmul.f32 2.0, %v1227_v63  ;;  %v1654_v41 = vmin.f32 %v1652_v27, %v4968_v13  ;;  %v2882_v21 = vmul.f32 %v1409_v49, %v1409_v49 }
 0x15f   : > { %v1023_v16 = vpop.f32.mrf.mxu0  ;;  %v1239_v44 = vpop.f32.mrf.mxu1  ;;  %v5004_v17 = vadd.f32 %v4952_v19, %v1410_v57  ;;  %v3160_v1 = vadd.f32 %v3083_v23, %v3082_v59  ;;  %v1691_v61 = vmin.f32 %v1689_v33, %v4976_v5  ;;  %v2954_v20 = vadd.f32 %v2880_v3, %v2879_v42 }
 0x160   : > { %v5008_v35 = vadd.f32 %v4957_v8, %v1411_v29  ;;  %v5010_v32 = vsub.f32 2.0, %v1481_v54  ;;  %v2881_v63 = vmul.f32 %v1408_v7, %v1408_v7  ;;  %v1348_v2 = vmul.f32 2.0, %v1021_v34 }
 0x161   : > { %7632 = vst [vmem:[#allocation30_spill] sm:$0xff] %v5004_v17  ;;  %v1027_v18 = vpop.f32.mrf.mxu0  ;;  %v1243_v4 = vpop.f32.mrf.mxu1  ;;  %3161 = vadd.xlane.f32.xlu0 %v3160_v1  ;;  %v1482_v43 = vmul.f32 2.0, %v1231_v10  ;;  %v1349_v27 = vmul.f32 2.0, %v1023_v16  ;;  %v3086_v19 = vmul.f32 %v5000_v60, %v5000_v60  ;;  %2955 = vadd.xlane.f32.xlu1 %v2954_v20  ;;  %v1483_v23 = vmul.f32 2.0, %v1233_v56 }
 0x162   : > { %7633 = vst [vmem:[#allocation31_spill] sm:$0xff] %v5008_v35  ;;  %v3087_v59 = vmul.f32 %v5010_v32, %v5010_v32  ;;  %v3163_v8 = vadd.f32 %v3085_v36, %v3084_v14  ;;  %v1412_v54 = vsub.f32 2.0, %v1348_v2  ;;  %v2957_v7 = vadd.f32 %v2882_v21, %v2881_v63 }
 0x163   : > { %v1029_v49 = vpop.f32.mrf.mxu0  ;;  %v1245_v33 = vpop.f32.mrf.mxu1  ;;  %v5016_v3 = vsub.f32 2.0, %v1482_v43  ;;  %v1413_v42 = vsub.f32 2.0, %v1349_v27  ;;  %v5018_v1 = vsub.f32 2.0, %v1483_v23  ;;  %v1350_v10 = vmul.f32 2.0, %v1027_v18 }
 0x164   : > { %v1484_v34 = vmul.f32 2.0, %v1237_v47  ;;  %v1351_v16 = vmul.f32 2.0, %v1029_v49  ;;  %v1656_v12 = vmin.f32 %v1654_v41, %v4990_v45  ;;  %v2884_v55 = vmul.f32 %v1411_v29, %v1411_v29 }
 0x165   : > { %v1033_v5 = vpop.f32.mrf.mxu0  ;;  %v1249_v53 = vpop.f32.mrf.mxu1  ;;  %v5022_v56 = vadd.f32 %v4970_v24, %v1412_v54  ;;  %v5025_v14 = vadd.f32 %v4978_v22, %v1413_v42  ;;  %2958 = vadd.xlane.f32.xlu0 %v2957_v7  ;;  %v1693_v2 = vmin.f32 %v1691_v61, %v4993_v28  ;;  %v2883_v43 = vmul.f32 %v1410_v57, %v1410_v57 }
 0x166   : > { %v3088_v18 = vmul.f32 %v5016_v3, %v5016_v3  ;;  %3164 = vadd.xlane.f32.xlu1 %v3163_v8  ;;  %v1414_v47 = vsub.f32 2.0, %v1350_v10  ;;  %v3089_v29 = vmul.f32 %v5018_v1, %v5018_v1  ;;  %v5032_v41 = vsub.f32 2.0, %v1484_v34 }
 0x167   : > { %7634 = vst [vmem:[#allocation32_spill] sm:$0xff] %v5022_v56  ;;  %7635 = vst [vmem:[#allocation33_spill] sm:$0xff] %v5025_v14  ;;  %v1035_v36 = vpop.f32.mrf.mxu0  ;;  %v1251_v21 = vpop.f32.mrf.mxu1  ;;  %v1415_v24 = vsub.f32 2.0, %v1351_v16  ;;  %v1485_v20 = vmul.f32 2.0, %v1239_v44  ;;  %v1658_v22 = vmin.f32 %v1656_v12, %v5004_v17  ;;  %v2886_v63 = vmul.f32 %v1413_v42, %v1413_v42 }
 0x168   : > { %v5036_v61 = vadd.f32 %v4984_v15, %v1414_v47  ;;  %v3166_v57 = vadd.f32 %v3087_v59, %v3086_v19  ;;  %v1695_v8 = vmin.f32 %v1693_v2, %v5008_v35  ;;  %v2960_v10 = vadd.f32 %v2884_v55, %v2883_v43 }
 0x169   : > { %v1039_v27 = vpop.f32.mrf.mxu0  ;;  %v1255_v23 = vpop.f32.mrf.mxu1  ;;  %v5040_v49 = vadd.f32 %v4986_v30, %v1415_v24  ;;  %v5042_v7 = vsub.f32 2.0, %v1485_v20  ;;  %v2885_v34 = vmul.f32 %v1412_v54, %v1412_v54  ;;  %v1352_v44 = vmul.f32 2.0, %v1033_v5 }
 0x16a   : > { %7636 = vst [vmem:[#allocation34_spill] sm:$0xff] %v5036_v61  ;;  %3167 = vadd.xlane.f32.xlu0 %v3166_v57  ;;  %v1486_v16 = vmul.f32 2.0, %v1243_v4  ;;  %v1353_v12 = vmul.f32 2.0, %v1035_v36  ;;  %v3090_v15 = vmul.f32 %v5032_v41, %v5032_v41  ;;  %2961 = vadd.xlane.f32.xlu1 %v2960_v10  ;;  %v1487_v59 = vmul.f32 2.0, %v1245_v33 }
 0x16b   : > { %7637 = vst [vmem:[#allocation35_spill] sm:$0xff] %v5040_v49  ;;  %v1041_v42 = vpop.f32.mrf.mxu0  ;;  %v1257_v28 = vpop.f32.mrf.mxu1  ;;  %v3091_v19 = vmul.f32 %v5042_v7, %v5042_v7  ;;  %v3169_v30 = vadd.f32 %v3089_v29, %v3088_v18  ;;  %v1416_v2 = vsub.f32 2.0, %v1352_v44  ;;  %v2963_v54 = vadd.f32 %v2886_v63, %v2885_v34 }
 0x16c   : > { %v5048_v20 = vsub.f32 2.0, %v1486_v16  ;;  %v1417_v55 = vsub.f32 2.0, %v1353_v12  ;;  %v5050_v4 = vsub.f32 2.0, %v1487_v59  ;;  %v1354_v36 = vmul.f32 2.0, %v1039_v27 }
 0x16d   : > { %v1045_v43 = vpop.f32.mrf.mxu0  ;;  %v1261_v5 = vpop.f32.mrf.mxu1  ;;  %v1488_v57 = vmul.f32 2.0, %v1249_v53  ;;  %v1355_v35 = vmul.f32 2.0, %v1041_v42  ;;  %v1660_v9 = vmin.f32 %v1658_v22, %v5022_v56  ;;  %v2888_v31 = vmul.f32 %v1415_v24, %v1415_v24 }
 0x16e   : > { %v5054_v37 = vadd.f32 %v5000_v60, %v1416_v2  ;;  %v5057_v33 = vadd.f32 %v5010_v32, %v1417_v55  ;;  %2964 = vadd.xlane.f32.xlu0 %v2963_v54  ;;  %v1697_v63 = vmin.f32 %v1695_v8, %v5025_v14  ;;  %v2887_v10 = vmul.f32 %v1414_v47, %v1414_v47 }
 0x16f   : > { %v1047_v18 = vpop.f32.mrf.mxu0  ;;  %v1263_v29 = vpop.f32.mrf.mxu1  ;;  %v3092_v27 = vmul.f32 %v5048_v20, %v5048_v20  ;;  %3170 = vadd.xlane.f32.xlu1 %v3169_v30  ;;  %v1418_v53 = vsub.f32 2.0, %v1354_v36  ;;  %v3093_v24 = vmul.f32 %v5050_v4, %v5050_v4  ;;  %v5064_v22 = vsub.f32 2.0, %v1488_v57 }
 0x170   : > { %7638 = vst [vmem:[#allocation36_spill] sm:$0xff] %v5054_v37  ;;  %7639 = vst [vmem:[#allocation37_spill] sm:$0xff] %v5057_v33  ;;  %v1419_v60 = vsub.f32 2.0, %v1355_v35  ;;  %v1489_v34 = vmul.f32 2.0, %v1251_v21  ;;  %v1662_v16 = vmin.f32 %v1660_v9, %v5036_v61  ;;  %v2890_v12 = vmul.f32 %v1417_v55, %v1417_v55 }
 0x171   : > { %v1051_v32 = vpop.f32.mrf.mxu0  ;;  %v1267_v44 = vpop.f32.mrf.mxu1  ;;  %v5068_v8 = vadd.f32 %v5016_v3, %v1418_v53  ;;  %v3172_v47 = vadd.f32 %v3091_v19, %v3090_v15  ;;  %v1699_v42 = vmin.f32 %v1697_v63, %v5040_v49  ;;  %v2966_v54 = vadd.f32 %v2888_v31, %v2887_v10 }
 0x172   : > { %v5072_v59 = vadd.f32 %v5018_v1, %v1419_v60  ;;  %v5074_v30 = vsub.f32 2.0, %v1489_v34  ;;  %v2889_v21 = vmul.f32 %v1416_v2, %v1416_v2  ;;  %v1356_v57 = vmul.f32 2.0, %v1045_v43 }
 0x173   : > { %7640 = vst [vmem:[#allocation38_spill] sm:$0xff] %v5068_v8  ;;  %v1053_v36 = vpop.f32.mrf.mxu0  ;;  %v1269_v35 = vpop.f32.mrf.mxu1  ;;  %3173 = vadd.xlane.f32.xlu0 %v3172_v47  ;;  %v1490_v14 = vmul.f32 2.0, %v1255_v23  ;;  %v1357_v9 = vmul.f32 2.0, %v1047_v18  ;;  %v3094_v3 = vmul.f32 %v5064_v22, %v5064_v22  ;;  %2967 = vadd.xlane.f32.xlu1 %v2966_v54  ;;  %v1491_v19 = vmul.f32 2.0, %v1257_v28 }
 0x174   : > { %7641 = vst [vmem:[#allocation39_spill] sm:$0xff] %v5072_v59  ;;  %v3095_v15 = vmul.f32 %v5074_v30, %v5074_v30  ;;  %v3175_v1 = vadd.f32 %v3093_v24, %v3092_v27  ;;  %v1420_v34 = vsub.f32 2.0, %v1356_v57  ;;  %v2969_v2 = vadd.f32 %v2890_v12, %v2889_v21 }
 0x175   : > { %v1057_v55 = vpop.f32.mrf.mxu0  ;;  %v1273_v63 = vpop.f32.mrf.mxu1  ;;  %v5080_v31 = vsub.f32 2.0, %v1490_v14  ;;  %v1421_v10 = vsub.f32 2.0, %v1357_v9  ;;  %v5082_v47 = vsub.f32 2.0, %v1491_v19  ;;  %v1358_v23 = vmul.f32 2.0, %v1051_v32 }
 0x176   : > { %v1492_v43 = vmul.f32 2.0, %v1261_v5  ;;  %v1359_v18 = vmul.f32 2.0, %v1053_v36  ;;  %v1664_v56 = vmin.f32 %v1662_v16, %v5054_v37  ;;  %v2892_v54 = vmul.f32 %v1419_v60, %v1419_v60 }
 0x177   : > { %v1059_v49 = vpop.f32.mrf.mxu0  ;;  %v5084_v61 = vpop.f32.mrf.mxu1  ;;  %v5088_v28 = vadd.f32 %v5032_v41, %v1420_v34  ;;  %v5091_v27 = vadd.f32 %v5042_v7, %v1421_v10  ;;  %2970 = vadd.xlane.f32.xlu0 %v2969_v2  ;;  %v1701_v14 = vmin.f32 %v1699_v42, %v5057_v33  ;;  %v2891_v24 = vmul.f32 %v1418_v53, %v1418_v53 }
 0x178   : > { %v3096_v5 = vmul.f32 %v5080_v31, %v5080_v31  ;;  %3176 = vadd.xlane.f32.xlu1 %v3175_v1  ;;  %v1422_v32 = vsub.f32 2.0, %v1358_v23  ;;  %v3097_v60 = vmul.f32 %v5082_v47, %v5082_v47  ;;  %v5100_v41 = vsub.f32 2.0, %v1492_v43 }
 0x179   : > { %7642 = vst [vmem:[#allocation40_spill] sm:$0xff] %v5088_v28  ;;  %7643 = vst [vmem:[#allocation41_spill] sm:$0xff] %v5091_v27  ;;  %v1063_v12 = vpop.f32.mrf.mxu0  ;;  %v5096_v36 = vpop.f32.mrf.mxu1  ;;  %v1423_v16 = vsub.f32 2.0, %v1359_v18  ;;  %v1493_v7 = vmul.f32 2.0, %v1263_v29  ;;  %v1666_v21 = vmin.f32 %v1664_v56, %v5068_v8  ;;  %v2894_v57 = vmul.f32 %v1421_v10, %v1421_v10 }
 0x17a   : > { %v5104_v53 = vadd.f32 %v5048_v20, %v1422_v32  ;;  %v3178_v42 = vadd.f32 %v3095_v15, %v3094_v3  ;;  %v1703_v1 = vmin.f32 %v1701_v14, %v5072_v59  ;;  %v2972_v43 = vadd.f32 %v2892_v54, %v2891_v24 }
 0x17b   : > { %v1065_v9 = vpop.f32.mrf.mxu0  ;;  %v1281_v19 = vpop.f32.mrf.mxu1  ;;  %v5108_v2 = vadd.f32 %v5050_v4, %v1423_v16  ;;  %v5110_v23 = vsub.f32 2.0, %v1493_v7  ;;  %v2893_v33 = vmul.f32 %v1420_v34, %v1420_v34  ;;  %v1360_v29 = vmul.f32 2.0, %v1057_v55 }
 0x17c   : > { %7644 = vst [vmem:[#allocation42_spill] sm:$0xff] %v5104_v53  ;;  %3179 = vadd.xlane.f32.xlu0 %v3178_v42  ;;  %v1494_v18 = vmul.f32 2.0, %v1267_v44  ;;  %v1361_v56 = vmul.f32 2.0, %v1059_v49  ;;  %v3098_v20 = vmul.f32 %v5100_v41, %v5100_v41  ;;  %2973 = vadd.xlane.f32.xlu1 %v2972_v43  ;;  %v1495_v15 = vmul.f32 2.0, %v1269_v35 }
 0x17d   : > { %7645 = vst [vmem:[#allocation43_spill] sm:$0xff] %v5108_v2  ;;  %v1069_v10 = vpop.f32.mrf.mxu0  ;;  %v1285_v8 = vpop.f32.mrf.mxu1  ;;  %v3099_v3 = vmul.f32 %v5110_v23, %v5110_v23  ;;  %v3181_v4 = vadd.f32 %v3097_v60, %v3096_v5  ;;  %v1424_v14 = vsub.f32 2.0, %v1360_v29  ;;  %v2975_v34 = vadd.f32 %v2894_v57, %v2893_v33 }
 0x17e   : > { %v5116_v7 = vsub.f32 2.0, %v1494_v18  ;;  %v1425_v54 = vsub.f32 2.0, %v1361_v56  ;;  %v5120_v49 = vsub.f32 2.0, %v1495_v15  ;;  %v1362_v44 = vmul.f32 2.0, %v1063_v12 }
 0x17f   : > { %v1071_v24 = vpop.f32.mrf.mxu0  ;;  %v5118_v55 = vpop.f32.mrf.mxu1  ;;  %v1496_v42 = vmul.f32 2.0, %v1273_v63  ;;  %v1363_v59 = vmul.f32 2.0, %v1065_v9  ;;  %v1668_v37 = vmin.f32 %v1666_v21, %v5088_v28  ;;  %v2896_v17 = vmul.f32 %v1423_v16, %v1423_v16 }
 0x180   : > { %v5124_v43 = vadd.f32 %v5064_v22, %v1424_v14  ;;  %v5127_v35 = vadd.f32 %v5074_v30, %v1425_v54  ;;  %2976 = vadd.xlane.f32.xlu0 %v2975_v34  ;;  %v1705_v60 = vmin.f32 %v1703_v1, %v5091_v27  ;;  %v2895_v57 = vmul.f32 %v1422_v32, %v1422_v32 }
 0x181   : > { %v1075_v5 = vpop.f32.mrf.mxu0  ;;  %v5129_v33 = vpop.f32.mrf.mxu1  ;;  %v3100_v63 = vmul.f32 %v5116_v7, %v5116_v7  ;;  %3182 = vadd.xlane.f32.xlu1 %v3181_v4  ;;  %v1426_v12 = vsub.f32 2.0, %v1362_v44  ;;  %v3101_v16 = vmul.f32 %v5120_v49, %v5120_v49  ;;  %v5136_v22 = vsub.f32 2.0, %v1496_v42 }
 0x182   : > { %7646 = vst [vmem:[#allocation44_spill] sm:$0xff] %v5127_v35  ;;  %v1427_v21 = vsub.f32 2.0, %v1363_v59  ;;  %v1497_v30 = vmul.f32 2.0, %v5084_v61  ;;  %v1643_v18 = vmin.f32 %v5104_v53, %v1668_v37  ;;  %v2898_v1 = vmul.f32 %v1425_v54, %v1425_v54 }
 0x183   : > { %v1077_v9 = vpop.f32.mrf.mxu0  ;;  %v5139_v29 = vpop.f32.mrf.mxu1  ;;  %v5143_v32 = vadd.f32 %v5080_v31, %v1426_v12  ;;  %v3184_v56 = vadd.f32 %v3099_v3, %v3098_v20  ;;  %v1678_v15 = vmin.f32 %v5108_v2, %v1705_v60  ;;  %v2978_v59 = vadd.f32 %v2896_v17, %v2895_v57 }
 0x184   : > { %v5147_v4 = vadd.f32 %v5082_v47, %v1427_v21  ;;  %v5149_v34 = vsub.f32 2.0, %v1497_v30  ;;  %v2897_v61 = vmul.f32 %v1424_v14, %v1424_v14  ;;  %v1364_v42 = vmul.f32 2.0, %v1069_v10 }
 0x185   : > { %7647 = vst [vmem:[#allocation45_spill] sm:$0xff] %v5143_v32  ;;  %v1081_v44 = vpop.f32.mrf.mxu0  ;;  %3185 = vadd.xlane.f32.xlu0 %v3184_v56  ;;  %v1498_v27 = vmul.f32 2.0, %v5096_v36  ;;  %v1365_v37 = vmul.f32 2.0, %v1071_v24  ;;  %v3102_v31 = vmul.f32 %v5136_v22, %v5136_v22  ;;  %2979 = vadd.xlane.f32.xlu1 %v2978_v59  ;;  %v1499_v3 = vmul.f32 2.0, %v1281_v19  ;;  %v1297_v60 = vpop.f32.mrf.mxu1 }
 0x186   : > { %7648 = vst [vmem:[#allocation46_spill] sm:$0xff] %v5147_v4  ;;  %v3103_v20 = vmul.f32 %v5149_v34, %v5149_v34  ;;  %v3187_v47 = vadd.f32 %v3101_v16, %v3100_v63  ;;  %v1428_v30 = vsub.f32 2.0, %v1364_v42  ;;  %v2981_v57 = vadd.f32 %v2898_v1, %v2897_v61 }
 0x187   : > { %v1083_v54 = vpop.f32.mrf.mxu0  ;;  %v5156_v17 = vsub.f32 2.0, %v1498_v27  ;;  %v1429_v14 = vsub.f32 2.0, %v1365_v37  ;;  %v5158_v10 = vsub.f32 2.0, %v1499_v3  ;;  %v1366_v36 = vmul.f32 2.0, %v1075_v5 }
 0x188   : > { %v1500_v24 = vmul.f32 2.0, %v1285_v8  ;;  %v1367_v56 = vmul.f32 2.0, %v1077_v9  ;;  %v1645_v53 = vmin.f32 %v1643_v18, %v5124_v43  ;;  %v2900_v28 = vmul.f32 %v1427_v21, %v1427_v21  ;;  %v1299_v9 = vpop.f32.mrf.mxu1 }
 0x189   : > { %v1087_v2 = vpop.f32.mrf.mxu0  ;;  %v5162_v59 = vadd.f32 %v5100_v41, %v1428_v30  ;;  %v5165_v19 = vadd.f32 %v5110_v23, %v1429_v14  ;;  %2982 = vadd.xlane.f32.xlu0 %v2981_v57  ;;  %v1680_v27 = vmin.f32 %v1678_v15, %v5127_v35  ;;  %v2899_v63 = vmul.f32 %v1426_v12, %v1426_v12 }
 0x18a   : > { %v3104_v16 = vmul.f32 %v5156_v17, %v5156_v17  ;;  %3188 = vadd.xlane.f32.xlu1 %v3187_v47  ;;  %v1430_v8 = vsub.f32 2.0, %v1366_v36  ;;  %v3105_v21 = vmul.f32 %v5158_v10, %v5158_v10  ;;  %v5172_v18 = vsub.f32 2.0, %v1500_v24 }
 0x18b   : > { %7649 = vst [vmem:[#allocation47_spill] sm:$0xff] %v5165_v19  ;;  %v1089_v5 = vpop.f32.mrf.mxu0  ;;  %v1431_v41 = vsub.f32 2.0, %v1367_v56  ;;  %v1501_v23 = vmul.f32 2.0, %v5118_v55  ;;  %v1647_v1 = vmin.f32 %v1645_v53, %v5143_v32  ;;  %v2902_v61 = vmul.f32 %v1429_v14, %v1429_v14  ;;  %v1303_v14 = vpop.f32.mrf.mxu1 }
 0x18c   : > { %v5177_v12 = vadd.f32 %v5116_v7, %v1430_v8  ;;  %v3190_v15 = vadd.f32 %v3103_v20, %v3102_v31  ;;  %v1682_v37 = vmin.f32 %v1680_v27, %v5147_v4  ;;  %v2984_v57 = vadd.f32 %v2900_v28, %v2899_v63 }
 0x18d   : > { %v1093_v42 = vpop.f32.mrf.mxu0  ;;  %v5181_v3 = vadd.f32 %v5120_v49, %v1431_v41  ;;  %v5183_v47 = vsub.f32 2.0, %v1501_v23  ;;  %v2901_v36 = vmul.f32 %v1428_v30, %v1428_v30  ;;  %v1368_v24 = vmul.f32 2.0, %v1081_v44 }
 0x18e   : > { %7650 = vst [vmem:[#allocation48_spill] sm:$0xff] %v5177_v12  ;;  %3191 = vadd.xlane.f32.xlu0 %v3190_v15  ;;  %v1502_v55 = vmul.f32 2.0, %v5129_v33  ;;  %v1369_v53 = vmul.f32 2.0, %v1083_v54  ;;  %v3106_v7 = vmul.f32 %v5172_v18, %v5172_v18  ;;  %2985 = vadd.xlane.f32.xlu1 %v2984_v57  ;;  %v1503_v49 = vmul.f32 2.0, %v5139_v29 }
 0x18f   : > { %7651 = vst [vmem:[#allocation49_spill] sm:$0xff] %v5181_v3  ;;  %v1095_v56 = vpop.f32.mrf.mxu0  ;;  %v3107_v31 = vmul.f32 %v5183_v47, %v5183_v47  ;;  %v3193_v20 = vadd.f32 %v3105_v21, %v3104_v16  ;;  %v1432_v27 = vsub.f32 2.0, %v1368_v24  ;;  %v2987_v44 = vadd.f32 %v2902_v61, %v2901_v36  ;;  %v1305_v16 = vpop.f32.mrf.mxu1 }
 0x190   : > { %v5191_v28 = vsub.f32 2.0, %v1502_v55  ;;  %v1433_v30 = vsub.f32 2.0, %v1369_v53  ;;  %v5193_v33 = vsub.f32 2.0, %v1503_v49  ;;  %v1370_v54 = vmul.f32 2.0, %v1087_v2 }
 0x191   : > { %v1099_v63 = vpop.f32.mrf.mxu0  ;;  %v1504_v23 = vmul.f32 2.0, %v1297_v60  ;;  %v1371_v15 = vmul.f32 2.0, %v1089_v5  ;;  %v1649_v4 = vmin.f32 %v1647_v1, %v5162_v59  ;;  %v2904_v35 = vmul.f32 %v1431_v41, %v1431_v41 }
 0x192   : > { %v5197_v32 = vadd.f32 %v5136_v22, %v1432_v27  ;;  %v5200_v29 = vadd.f32 %v5149_v34, %v1433_v30  ;;  %2988 = vadd.xlane.f32.xlu0 %v2987_v44  ;;  %v5203_v61 = vmin.f32 %v1682_v37, %v5165_v19  ;;  %v2903_v57 = vmul.f32 %v1430_v8, %v1430_v8  ;;  %v1309_v44 = vpop.f32.mrf.mxu1 }
 0x193   : > { %v1101_v21 = vpop.f32.mrf.mxu0  ;;  %v3108_v2 = vmul.f32 %v5191_v28, %v5191_v28  ;;  %3194 = vadd.xlane.f32.xlu1 %v3193_v20  ;;  %v1434_v60 = vsub.f32 2.0, %v1370_v54  ;;  %v3109_v5 = vmul.f32 %v5193_v33, %v5193_v33  ;;  %v5209_v22 = vsub.f32 2.0, %v1504_v23 }
 0x194   : > { %7652 = vst [vmem:[#allocation50_spill] sm:$0xff] %v5197_v32  ;;  %7653 = vst [vmem:[#allocation51_spill] sm:$0xff] %v5200_v29  ;;  %v1435_v41 = vsub.f32 2.0, %v1371_v15  ;;  %v1505_v34 = vmul.f32 2.0, %v1299_v9  ;;  %v1651_v36 = vmin.f32 %v1649_v4, %v5177_v12  ;;  %v2906_v24 = vmul.f32 %v1433_v30, %v1433_v30 }
 0x195   : > { %v1105_v1 = vpop.f32.mrf.mxu0  ;;  %v5213_v37 = vadd.f32 %v5156_v17, %v1434_v60  ;;  %v3196_v8 = vadd.f32 %v3107_v31, %v3106_v7  ;;  %v2905_v55 = vmul.f32 %v1432_v27, %v1432_v27  ;;  %v2990_v20 = vadd.f32 %v2904_v35, %v2903_v57 }
 0x196   : > { %v5216_v53 = vadd.f32 %v5158_v10, %v1435_v41  ;;  %v5218_v49 = vsub.f32 2.0, %v1505_v34  ;;  %v1653_v23 = vmin.f32 %v1651_v36, %v5197_v32  ;;  %v1372_v9 = vmul.f32 2.0, %v1093_v42 }
 0x197   : > { %7654 = vst [vmem:[#allocation52_spill] sm:$0xff] %v5213_v37  ;;  %v1107_v54 = vpop.f32.mrf.mxu0  ;;  %3197 = vadd.xlane.f32.xlu0 %v3196_v8  ;;  %v1506_v15 = vmul.f32 2.0, %v1303_v14  ;;  %v1373_v4 = vmul.f32 2.0, %v1095_v56  ;;  %v3110_v17 = vmul.f32 %v5209_v22, %v5209_v22  ;;  %2991 = vadd.xlane.f32.xlu1 %v2990_v20  ;;  %v1507_v10 = vmul.f32 2.0, %v1305_v16  ;;  %v1311_v56 = vpop.f32.mrf.mxu1 }
 0x198   : > { %7655 = vst [vmem:[#allocation53_spill] sm:$0xff] %v5216_v53  ;;  %v3111_v7 = vmul.f32 %v5218_v49, %v5218_v49  ;;  %v3199_v31 = vadd.f32 %v3109_v5, %v3108_v2  ;;  %v1436_v30 = vsub.f32 2.0, %v1372_v9  ;;  %v2993_v34 = vadd.f32 %v2906_v24, %v2905_v55 }
 0x199   : > { %v1111_v27 = vpop.f32.mrf.mxu0  ;;  %v1570_v35 = vsub.f32 2.0, %v1506_v15  ;;  %v1437_v57 = vsub.f32 2.0, %v1373_v4  ;;  %v5225_v19 = vsub.f32 2.0, %v1507_v10  ;;  %v1374_v36 = vmul.f32 2.0, %v1099_v63 }
 0x19a   : > { %v1508_v42 = vmul.f32 2.0, %v1309_v44  ;;  %v1375_v14 = vmul.f32 2.0, %v1101_v21  ;;  %v1686_v32 = vmin.f32 %v5203_v61, %v5181_v3  ;;  %v2908_v12 = vmul.f32 %v1435_v41, %v1435_v41 }
 0x19b   : > { %v1113_v8 = vpop.f32.mrf.mxu0  ;;  %v5230_v20 = vadd.f32 %v5172_v18, %v1436_v30  ;;  %v5233_v16 = vadd.f32 %v5183_v47, %v1437_v57  ;;  %2994 = vadd.xlane.f32.xlu0 %v2993_v34  ;;  %v1655_v2 = vmin.f32 %v1653_v23, %v5213_v37  ;;  %v2910_v5 = vmul.f32 %v1437_v57, %v1437_v57 }
 0x19c   : > { %3200 = vadd.xlane.f32.xlu1 %v3199_v31  ;;  %v1438_v63 = vsub.f32 2.0, %v1374_v36  ;;  %v1572_v24 = vsub.f32 2.0, %v1508_v42  ;;  %v2909_v55 = vmul.f32 %v1436_v30, %v1436_v30  ;;  %v3112_v44 = vmul.f32 %v1570_v35, %v1570_v35 }
 0x19d   : > { %7656 = vst [vmem:[#allocation54_spill] sm:$0xff] %v5230_v20  ;;  %7657 = vst [vmem:[#allocation55_spill] sm:$0xff] %v5233_v16  ;;  %v1117_v21 = vpop.f32.mrf.mxu0  ;;  %v1439_v9 = vsub.f32 2.0, %v1375_v14  ;;  %v1509_v15 = vmul.f32 2.0, %v1311_v56  ;;  %v1657_v61 = vmin.f32 %v1655_v2, %v5230_v20  ;;  %v3113_v18 = vmul.f32 %v5225_v19, %v5225_v19 }
 0x19e   : > { %v5240_v47 = vadd.f32 %v5191_v28, %v1438_v63  ;;  %v3202_v41 = vadd.f32 %v3111_v7, %v3110_v17  ;;  %v3114_v23 = vmul.f32 %v1572_v24, %v1572_v24  ;;  %v1376_v57 = vmul.f32 2.0, %v1105_v1 }
 0x19f   : > { %v1119_v4 = vpop.f32.mrf.mxu0  ;;  %v5243_v10 = vadd.f32 %v5193_v33, %v1439_v9  ;;  %v1573_v31 = vsub.f32 2.0, %v1509_v15  ;;  %v1688_v30 = vmin.f32 %v1686_v32, %v5200_v29  ;;  %v2907_v34 = vmul.f32 %v1434_v60, %v1434_v60 }
 0x1a0   : > { %3203 = vadd.xlane.f32.xlu1 %v3202_v41  ;;  %v1377_v36 = vmul.f32 2.0, %v1107_v54  ;;  %v2999_v42 = vadd.f32 %v2910_v5, %v2909_v55  ;;  %v1659_v56 = vmin.f32 %v1657_v61, %v5240_v47  ;;  %v1440_v28 = vsub.f32 2.0, %v1376_v57  ;;  %v1315_v54 = vpop.f32.mrf.mxu1 }
 0x1a1   : > { %7658 = vst [vmem:[#allocation56_spill] sm:$0xff] %v5243_v10  ;;  %v1123_v14 = vpop.f32.mrf.mxu0  ;;  %v3115_v2 = vmul.f32 %v1573_v31, %v1573_v31  ;;  %v1378_v3 = vmul.f32 2.0, %v1111_v27  ;;  %v2996_v7 = vadd.f32 %v2908_v12, %v2907_v34  ;;  %v1379_v20 = vmul.f32 2.0, %v1113_v8 }
 0x1a2   : > { %v1441_v17 = vsub.f32 2.0, %v1377_v36  ;;  %3000 = vadd.xlane.f32.xlu0 %v2999_v42  ;;  %v1380_v33 = vmul.f32 2.0, %v1117_v21  ;;  %v5248_v1 = vadd.f32 %v5209_v22, %v1440_v28  ;;  %v3205_v60 = vadd.f32 %v3113_v18, %v3112_v44  ;;  %v1317_v36 = vpop.f32.mrf.mxu1 }
 0x1a3   : > { %v1125_v37 = vpop.f32.mrf.mxu0  ;;  %v1442_v32 = vsub.f32 2.0, %v1378_v3  ;;  %v3208_v15 = vadd.f32 %v3115_v2, %v3114_v23  ;;  %v1443_v61 = vsub.f32 2.0, %v1379_v20  ;;  %v1690_v12 = vmin.f32 %v1688_v30, %v5216_v53 }
 0x1a4   : > { %v5251_v5 = vadd.f32 %v5218_v49, %v1441_v17  ;;  %v2914_v55 = vmul.f32 %v1441_v17, %v1441_v17  ;;  %2997 = vadd.xlane.f32.xlu1 %v2996_v7  ;;  %v1444_v27 = vsub.f32 2.0, %v1380_v33  ;;  %v1661_v8 = vmin.f32 %v1659_v56, %v5248_v1 }
 0x1a5   : > { %v1129_v41 = vpop.f32.mrf.mxu0  ;;  %v5255_v21 = vadd.f32 %v1570_v35, %v1442_v32  ;;  %v1381_v22 = vmul.f32 2.0, %v1119_v4  ;;  %v2912_v57 = vmul.f32 %v1439_v9, %v1439_v9  ;;  %v2913_v3 = vmul.f32 %v1440_v28, %v1440_v28 }
 0x1a6   : > { %7659 = vst [vmem:[#allocation57_spill] sm:$0xff] %v5251_v5  ;;  %v5258_v44 = vadd.f32 %v5225_v19, %v1443_v61  ;;  %3209 = vadd.xlane.f32.xlu0 %v3208_v15  ;;  %v5260_v49 = vadd.f32 %v1572_v24, %v1444_v27  ;;  %v1692_v20 = vmin.f32 %v1690_v12, %v5233_v16  ;;  %v1382_v4 = vmul.f32 2.0, %v1123_v14 }
 0x1a7   : > { %v1131_v18 = vpop.f32.mrf.mxu0  ;;  %v2911_v23 = vmul.f32 %v1438_v63, %v1438_v63  ;;  %v1663_v34 = vmin.f32 %v1661_v8, %v5255_v21  ;;  %v1445_v30 = vsub.f32 2.0, %v1381_v22  ;;  %v2916_v42 = vmul.f32 %v1443_v61, %v1443_v61 }
 0x1a8   : > { %7660 = vst [vmem:[#allocation58_spill] sm:$0xff] %v5258_v44  ;;  %3206 = vadd.xlane.f32.xlu1 %v3205_v60  ;;  %v3005_v35 = vadd.f32 %v2914_v55, %v2913_v3  ;;  %v1510_v9 = vmul.f32 2.0, %v1315_v54  ;;  %v2915_v2 = vmul.f32 %v1442_v32, %v1442_v32  ;;  %v1383_v28 = vmul.f32 2.0, %v1125_v37 }
 0x1a9   : > { %v1135_v56 = vpop.f32.mrf.mxu0  ;;  %v5265_v19 = vmin.f32 %v1663_v34, %v5260_v49  ;;  %v5267_v24 = vadd.f32 %v1573_v31, %v1445_v30  ;;  %v3002_v17 = vadd.f32 %v2912_v57, %v2911_v23  ;;  %v1446_v63 = vsub.f32 2.0, %v1382_v4 }
 0x1aa   : > { %3006 = vadd.xlane.f32.xlu0 %v3005_v35  ;;  %v5269_v7 = vsub.f32 2.0, %v1510_v9  ;;  %v1511_v33 = vmul.f32 2.0, %v1317_v36  ;;  %v2918_v61 = vmul.f32 %v1445_v30, %v1445_v30  ;;  %v1447_v60 = vsub.f32 2.0, %v1383_v28 }
 0x1ab   : > { %7661 = vst [vmem:[#allocation59_spill] sm:$0xff] %v5267_v24  ;;  %v1137_v15 = vpop.f32.mrf.mxu0  ;;  %v1448_v55 = vmul.f32 2.0, %v1129_v41  ;;  %v1449_v14 = vmul.f32 2.0, %v1131_v18  ;;  %v1694_v54 = vmin.f32 %v1692_v20, %v5243_v10  ;;  %v2917_v32 = vmul.f32 %v1444_v27, %v1444_v27 }
 0x1ac   : > { %3003 = vadd.xlane.f32.xlu1 %v3002_v17  ;;  %v5273_v12 = vadd.f32 %v5269_v7, %v1446_v63  ;;  %v3008_v31 = vadd.f32 %v2916_v42, %v2915_v2  ;;  %v2920_v8 = vmul.f32 %v1447_v60, %v1447_v60  ;;  %v1575_v22 = vsub.f32 2.0, %v1511_v33 }
 0x1ad   : > { %v1141_v37 = vpop.f32.mrf.mxu0  ;;  %v1512_v57 = vsub.f32 2.0, %v1448_v55  ;;  %v1513_v3 = vsub.f32 2.0, %v1449_v14  ;;  %v2919_v23 = vmul.f32 %v1446_v63, %v1446_v63  ;;  %v1696_v41 = vmin.f32 %v1694_v54, %v5251_v5 }
 0x1ae   : > { %v1667_v34 = vmin.f32 %v5265_v19, %v5273_v12  ;;  %v3011_v20 = vadd.f32 %v2918_v61, %v2917_v32  ;;  %v1450_v36 = vmul.f32 2.0, %v1135_v56  ;;  %v1451_v35 = vmul.f32 2.0, %v1137_v15 }
 0x1af   : > { %v1143_v30 = vpop.f32.mrf.mxu0  ;;  %v3055_v18 = vmul.f32 %v1513_v3, %v1513_v3  ;;  %v3054_v27 = vmul.f32 %v1512_v57, %v1512_v57  ;;  %v3014_v4 = vadd.f32 %v2920_v8, %v2919_v23  ;;  %v1698_v9 = vmin.f32 %v1696_v41, %v5258_v44 }
 0x1b0   : > { %3009 = vadd.xlane.f32.xlu1 %v3008_v31  ;;  %v5279_v2 = vadd.f32 %v1575_v22, %v1447_v60  ;;  %v1452_v28 = vmul.f32 2.0, %v1141_v37  ;;  %v1453_v17 = vmul.f32 2.0, %v1143_v30  ;;  %v1515_v63 = vsub.f32 2.0, %v1451_v35 }
 0x1b1   : > { %v1147_v42 = vpop.f32.mrf.mxu0  ;;  %3015 = vadd.xlane.f32.xlu0 %v3014_v4  ;;  %v3118_v19 = vadd.f32 %v3055_v18, %v3054_v27  ;;  %v1700_v33 = vmin.f32 %v1698_v9, %v5267_v24  ;;  %v5287_v56 = vadd.f32 %v1512_v57, %v4803_v51  ;;  %v1514_v15 = vsub.f32 2.0, %v1450_v36 }
 0x1b2   : > { %7662 = vst [vmem:[#allocation60_spill] sm:$0xff] %v5279_v2  ;;  %v5282_v55 = vsub.f32 2.0, %v1452_v28  ;;  %v5284_v61 = vsub.f32 2.0, %v1453_v17  ;;  %v1454_v14 = vmul.f32 2.0, %v1147_v42  ;;  %v5290_v60 = vadd.f32 %v1515_v63, %v4823_v25 }
 0x1b3   : > { %v1702_v54 = vmin.f32 %v1700_v33, %v5279_v2  ;;  %v5294_v32 = vadd.f32 %v1513_v3, %v4805_v52  ;;  %v5312_v57 = vadd.f32 %v1514_v15, %v4819_v11  ;;  %v3057_v42 = vmul.f32 %v1515_v63, %v1515_v63 }
 0x1b4   : > { %7663 = vst [vmem:[#allocation61_spill] sm:$0xff] %v5284_v61  ;;  %3012 = vadd.xlane.f32.xlu1 %v3011_v20  ;;  %7664 = vst [vmem:[#allocation62_spill] sm:$0xff] %v5290_v60  ;;  %v5298_v31 = vadd.f32 %v5282_v55, %v4827_v26  ;;  %v5302_v37 = vadd.f32 %v5284_v61, %v4833_v38  ;;  %v5304_v51 = vsub.f32 2.0, %v1454_v14  ;;  %v7441_v38 = vlaneseq  ;;  %v1149_v20 = vpop.f32.mrf.mxu0 }
 0x1b5   : > { %7665 = vst [vmem:[#allocation63_spill] sm:$0xff] %v5294_v32  ;;  %3119 = vadd.xlane.f32.xlu0 %v3118_v19  ;;  %v1704_v8 = vmin.f32 %v1702_v54, %v5290_v60  ;;  %v1455_v35 = vmul.f32 2.0, %v1149_v20  ;;  %v3116_v9 = vmul.f32 %v5269_v7, %v5269_v7  ;;  %v3117_v28 = vmul.f32 %v1575_v22, %v1575_v22 }
 0x1b6   : > { %7666 = vst [vmem:[#allocation64_spill] sm:$0xff] %v5302_v37  ;;  %7667 = vst [vmem:[#allocation65_spill] sm:$0xff] %v5304_v51  ;;  %v1640_v25 = vmin.f32 %v5287_v56, %v5298_v31  ;;  %v1677_v52 = vmin.f32 %v5294_v32, %v5302_v37  ;;  %v5316_v26 = vadd.f32 %v5304_v51, %v4845_v50  ;;  %v5321_v18 = vshrl.u32 %v7441_v38, 7 }
 0x1b7   : > { %v3056_v17 = vmul.f32 %v1514_v15, %v1514_v15  ;;  %v5328_v33 = vsub.f32 2.0, %v1455_v35 }
 0x1b8   : > { %v1669_v3 = vmin.f32 %v1667_v34, %v1640_v25  ;;  %v1706_v23 = vmin.f32 %v1704_v8, %v1677_v52  ;;  %v1641_v30 = vmin.f32 %v5312_v57, %v5316_v26  ;;  %7668 = vst [vmem:[#allocation66_spill] sm:$0xff] %v5321_v18  ;;  %v470_v11 = vadd.s32 32, %v5321_v18 }
 0x1b9   : > { %v471_v4 = vadd.s32 40, %v5321_v18  ;;  %v472_v50 = vadd.s32 48, %v5321_v18  ;;  %7669 = vst [vmem:[#allocation67_spill] sm:$0xff] %v5328_v33  ;;  %v473_v25 = vadd.s32 56, %v5321_v18  ;;  %v1714_v63 = vadd.s32 64, %v5321_v18 }
 0x1ba   : > { %v1670_v41 = vmin.f32 %v1641_v30, %v1669_v3  ;;  %v5330_v14 = vcvt.s32.f32 %v470_v11  ;;  %v3121_v3 = vadd.f32 %v3057_v42, %v3056_v17  ;;  %v1715_v30 = vadd.s32 72, %v5321_v18 }
 0x1bb   : > { %v5332_v54 = vcvt.s32.f32 %v471_v4  ;;  %v5334_v8 = vcvt.s32.f32 %v472_v50  ;;  %v1716_v7 = vadd.s32 80, %v5321_v18  ;;  %v1717_v22 = vadd.s32 88, %v5321_v18 }
 0x1bc   : > { %v1671_v27 = vrot.slane %v1670_v41, 4  ;;  %7670 = vst [vmem:[#allocation68_spill] sm:$0xff] %v5330_v14  ;;  %v1718_v15 = vadd.s32 96, %v5321_v18  ;;  %v5346_v20 = vadd.f32 %v5328_v33, %v4853_v58  ;;  %3122 = vadd.xlane.f32.xlu1 %v3121_v3  ;;  %v1720_v35 = vadd.s32 112, %v5321_v18 }
 0x1bd   : > { %7671 = vst [vmem:[#allocation69_spill] sm:$0xff] %v5332_v54  ;;  %7672 = vst [vmem:[#allocation70_spill] sm:$0xff] %v5334_v8  ;;  %v1721_v11 = vadd.s32 120, %v5321_v18  ;;  %v1722_v4 = vadd.s32 128, %v5321_v18  ;;  %v1723_v50 = vadd.s32 136, %v5321_v18  ;;  %v1724_v42 = vadd.s32 144, %v5321_v18 }
 0x1be   : > { %v1672_v36 = vmin.f32 %v1670_v41, %v1671_v27  ;;  %7673 = vst [vmem:[#allocation71_spill] sm:$0xff] %v5346_v20  ;;  %v5348_v27 = vadd.f32 %v3117_v28, %v3116_v9  ;;  %v5360_v58 = vcvt.s32.f32 %v473_v25  ;;  %v5364_v9 = vcvt.s32.f32 %v1715_v30  ;;  %v5437_v51 = vpop.xlane.xlu1 %3134 }
 0x1bf   : > { %v1725_v28 = vadd.s32 152, %v5321_v18  ;;  %v5367_v17 = vcvt.s32.f32 %v1716_v7  ;;  %v1707_v3 = vmin.f32 %v5346_v20, %v1706_v23  ;;  %v5378_v25 = vcvt.s32.f32 %v1721_v11  ;;  %7699 = vst [vmem:[#allocation97_spill] sm:$0xff] %v5437_v51 }
 0x1c0   : > { %v1673_v34 = vrot.slane %v1672_v36, 2  ;;  %7674 = vst [vmem:[#allocation72_spill] sm:$0xff] %v5348_v27  ;;  %7675 = vst [vmem:[#allocation73_spill] sm:$0xff] %v5360_v58  ;;  %v5376_v27 = vcvt.s32.f32 %v1720_v35  ;;  %v5382_v30 = vcvt.s32.f32 %v1723_v50  ;;  %v5384_v33 = vcvt.s32.f32 %v1724_v42 }
 0x1c1   : > { %7677 = vst [vmem:[#allocation75_spill] sm:$0xff] %v5364_v9  ;;  %7678 = vst [vmem:[#allocation76_spill] sm:$0xff] %v5367_v17  ;;  %v1726_v7 = vadd.s32 160, %v5321_v18  ;;  %v467_v23 = vadd.s32 8, %v5321_v18  ;;  %v469_v35 = vadd.s32 24, %v5321_v18  ;;  %v1728_v11 = vadd.s32 176, %v5321_v18 }
 0x1c2   : > { %v1674_v19 = vmin.f32 %v1672_v36, %v1673_v34  ;;  %v1719_v36 = vadd.s32 104, %v5321_v18  ;;  %v5362_v34 = vcvt.s32.f32 %v1714_v63  ;;  %7682 = vst [vmem:[#allocation80_spill] sm:$0xff] %v5376_v27  ;;  %7683 = vst [vmem:[#allocation81_spill] sm:$0xff] %v5378_v25  ;;  %v5380_v63 = vcvt.s32.f32 %v1722_v4 }
 0x1c3   : > { %7685 = vst [vmem:[#allocation83_spill] sm:$0xff] %v5382_v30  ;;  %7686 = vst [vmem:[#allocation84_spill] sm:$0xff] %v5384_v33  ;;  %v1729_v4 = vadd.s32 184, %v5321_v18  ;;  %v1730_v50 = vadd.s32 192, %v5321_v18  ;;  %v1708_v42 = vrot.slane %v1707_v3, 4  ;;  %v1731_v24 = vadd.s32 200, %v5321_v18 }
 0x1c4   : > { %v1675_v52 = vrot.slane %v1674_v19, 1  ;;  %7676 = vst [vmem:[#allocation74_spill] sm:$0xff] %v5362_v34  ;;  %v5374_v38 = vcvt.s32.f32 %v1719_v36  ;;  %7684 = vst [vmem:[#allocation82_spill] sm:$0xff] %v5380_v63  ;;  %v468_v36 = vadd.s32 16, %v5321_v18  ;;  %v1732_v44 = vadd.s32 208, %v5321_v18 }
 0x1c5   : > { %v5411_v5 = vcvt.s32.f32 %v5321_v18  ;;  %v5413_v10 = vcvt.s32.f32 %v467_v23  ;;  %v5417_v53 = vcvt.s32.f32 %v469_v35  ;;  %v1733_v29 = vadd.s32 216, %v5321_v18 }
 0x1c6   : > { %v5342_v41 = vmin.f32 %v1674_v19, %v1675_v52  ;;  %v5369_v19 = vcvt.s32.f32 %v1717_v22  ;;  %v5371_v52 = vcvt.s32.f32 %v1718_v15  ;;  %7681 = vst [vmem:[#allocation79_spill] sm:$0xff] %v5374_v38  ;;  %v1727_v22 = vadd.s32 168, %v5321_v18 }
 0x1c7   : > { %v5388_v15 = vcvt.s32.f32 %v1725_v28  ;;  %v5404_v28 = vcvt.s32.f32 %v1726_v7  ;;  %7690 = vst [vmem:[#allocation88_spill] sm:$0xff] %v5411_v5  ;;  %7691 = vst [vmem:[#allocation89_spill] sm:$0xff] %v5413_v10  ;;  %v5415_v16 = vcvt.s32.f32 %v468_v36  ;;  %v1734_v7 = vadd.s32 224, %v5321_v18 }
 0x1c8   : > { %vm1770_vm1 = vcmp.le.f32.partialorder %v5287_v56, %v5342_v41  ;;  %vm1772_vm2 = vcmp.le.f32.partialorder %v5312_v57, %v5342_v41  ;;  %7679 = vst [vmem:[#allocation77_spill] sm:$0xff] %v5369_v19  ;;  %7680 = vst [vmem:[#allocation78_spill] sm:$0xff] %v5371_v52  ;;  %vm1826_vm3 = vcmp.le.f32.partialorder %v5248_v1, %v5342_v41  ;;  %v5406_v2 = vcvt.s32.f32 %v1727_v22 }
 0x1c9   : > { %7687 = vst [vmem:[#allocation85_spill] sm:$0xff] %v5388_v15  ;;  %vm1828_vm4 = vcmp.le.f32.partialorder %v5255_v21, %v5342_v41  ;;  %vm1830_vm5 = vcmp.le.f32.partialorder %v5260_v49, %v5342_v41  ;;  %vm1832_vm6 = vcmp.le.f32.partialorder %v5273_v12, %v5342_v41  ;;  %7688 = vst [vmem:[#allocation86_spill] sm:$0xff] %v5404_v28  ;;  %v5425_v22 = vcvt.s32.f32 %v1728_v11 }
 0x1ca   : > { %7689 = vst [vmem:[#allocation87_spill] sm:$0xff] %v5406_v2  ;;  %7692 = vst [vmem:[#allocation90_spill] sm:$0xff] %v5415_v16  ;;  %vm1774_vm7 = vcmp.le.f32.partialorder %v5298_v31, %v5342_v41  ;;  %vm1776_vm8 = vcmp.le.f32.partialorder %v5316_v26, %v5342_v41  ;;  %v5427_v20 = vcvt.s32.f32 %v1729_v4  ;;  %v5429_v23 = vcvt.s32.f32 %v1730_v50 }
 0x1cb   : > { %7693 = vst [vmem:[#allocation91_spill] sm:$0xff] %v5417_v53  ;;  %7694 = vst [vmem:[#allocation92_spill] sm:$0xff] %v5425_v22  ;;  %v1709_v36 = vmin.f32 %v1707_v3, %v1708_v42  ;;  %v5431_v60 = vcvt.s32.f32 %v1731_v24  ;;  %v5433_v35 = vcvt.s32.f32 %v1732_v44  ;;  %v1735_v37 = vadd.s32 232, %v5321_v18 }
 0x1cc   : > { %7695 = vst [vmem:[#allocation93_spill] sm:$0xff] %v5427_v20  ;;  %7696 = vst [vmem:[#allocation94_spill] sm:$0xff] %v5429_v23  ;;  %v1736_v32 = vadd.s32 240, %v5321_v18  ;;  %v1834_v11 = vsel %vm1770_vm1, %v5411_v5, 256.0  ;;  %v1836_v3 = vsel %vm1772_vm2, %v5413_v10, 256.0  ;;  %v1838_v24 = vsel %vm1774_vm7, %v5415_v16, 256.0 }
 0x1cd   : > { %7697 = vst [vmem:[#allocation95_spill] sm:$0xff] %v5431_v60  ;;  %7698 = vst [vmem:[#allocation96_spill] sm:$0xff] %v5433_v35  ;;  %v1840_v44 = vsel %vm1776_vm8, %v5417_v53, 256.0  ;;  %v5449_v4 = vcvt.s32.f32 %v1733_v29  ;;  %v5451_v50 = vcvt.s32.f32 %v1734_v7  ;;  %vm1778_vm9 = vcmp.le.f32.partialorder %v4868_v39, %v5342_v41 }
 0x1ce   : > { %vm1780_vm10 = vcmp.le.f32.partialorder %v4878_v62, %v5342_v41  ;;  %v1737_v42 = vadd.s32 248, %v5321_v18  ;;  %vm1782_vm11 = vcmp.le.f32.partialorder %v4892_v46, %v5342_v41  ;;  %vm1784_vm12 = vcmp.le.f32.partialorder %v4908_v0, %v5342_v41 }
 0x1cf   : > { %7700 = vst [vmem:[#allocation98_spill] sm:$0xff] %v5449_v4  ;;  %7701 = vst [vmem:[#allocation99_spill] sm:$0xff] %v5451_v50  ;;  %v1710_v51 = vrot.slane %v1709_v36, 2  ;;  %v1898_v53 = vmin.f32 %v1834_v11, %v1838_v24  ;;  %v1899_v29 = vmin.f32 %v1836_v3, %v1840_v44  ;;  %v5466_v16 = vcvt.s32.f32 %v1735_v37  ;;  %v5476_v24 = vpop.xlane.xlu1 %2928 }
 0x1d0   : > { %v5468_v5 = vcvt.s32.f32 %v1736_v32  ;;  %v1842_v18 = vsel %vm1778_vm9, %v5330_v14, 256.0  ;;  %v1844_v61 = vsel %vm1780_vm10, %v5332_v54, 256.0  ;;  %vm1786_vm13 = vcmp.le.f32.partialorder %v4924_v40, %v5342_v41  ;;  %7704 = vst [vmem:[#allocation102_spill] sm:$0xff] %v5476_v24 }
 0x1d1   : > { %7702 = vst [vmem:[#allocation100_spill] sm:$0xff] %v5466_v16  ;;  %vm1788_vm14 = vcmp.le.f32.partialorder %v4937_v48, %v5342_v41  ;;  %v1900_v11 = vmin.f32 %v1898_v53, %v1842_v18  ;;  %v1901_v3 = vmin.f32 %v1899_v29, %v1844_v61  ;;  %v5478_v44 = vcvt.s32.f32 %v1737_v42  ;;  %v7706_v18 = vld [vmem:[#allocation30_spill] sm:$0xff] }
 0x1d2   : > { %7703 = vst [vmem:[#allocation101_spill] sm:$0xff] %v5468_v5  ;;  %v1846_v32 = vsel %vm1782_vm11, %v5334_v8, 256.0  ;;  %v1848_v37 = vsel %vm1784_vm12, %v5360_v58, 256.0  ;;  %v5488_v10 = vmin.f32 %v1709_v36, %v1710_v51  ;;  %vm1790_vm15 = vcmp.le.f32.partialorder %v4955_v6, %v5342_v41  ;;  %v7707_v51 = vld [vmem:[#allocation32_spill] sm:$0xff]  ;;  %v7708_v36 = vld [vmem:[#allocation34_spill] sm:$0xff] }
 0x1d3   : > { %7705 = vst [vmem:[#allocation103_spill] sm:$0xff] %v5478_v44  ;;  %vm1792_vm0 = vcmp.le.f32.partialorder %v4968_v13, %v5342_v41  ;;  %v1902_v53 = vmin.f32 %v1900_v11, %v1846_v32  ;;  %v1903_v61 = vmin.f32 %v1901_v3, %v1848_v37  ;;  %vm1794_vm1 = vcmp.le.f32.partialorder %v4990_v45, %v5342_v41  ;;  %v7709_v11 = vld [vmem:[#allocation36_spill] sm:$0xff]  ;;  %v7710_v3 = vld [vmem:[#allocation38_spill] sm:$0xff] }
 0x1d4   : > { %vm1796_vm2 = vcmp.le.f32.partialorder %v7706_v18, %v5342_v41  ;;  %v1850_v42 = vsel %vm1786_vm13, %v5362_v34, 256.0  ;;  %v1852_v29 = vsel %vm1788_vm14, %v5364_v9, 256.0  ;;  %vm1798_vm7 = vcmp.le.f32.partialorder %v7707_v51, %v5342_v41  ;;  %v7711_v9 = vld [vmem:[#allocation40_spill] sm:$0xff]  ;;  %v7712_v34 = vld [vmem:[#allocation42_spill] sm:$0xff] }
 0x1d5   : > { %vm1800_vm8 = vcmp.le.f32.partialorder %v7708_v36, %v5342_v41  ;;  %v1904_v7 = vmin.f32 %v1902_v53, %v1850_v42  ;;  %v1905_v24 = vmin.f32 %v1903_v61, %v1852_v29  ;;  %vm1802_vm9 = vcmp.le.f32.partialorder %v7709_v11, %v5342_v41  ;;  %v5514_v53 = vpop.xlane.xlu0 %2922  ;;  %v5516_v61 = vpop.xlane.xlu1 %2931 }
 0x1d6   : > { %vm1804_vm10 = vcmp.le.f32.partialorder %v7710_v3, %v5342_v41  ;;  %v1854_v32 = vsel %vm1790_vm15, %v5367_v17, 256.0  ;;  %v1856_v37 = vsel %vm1792_vm0, %v5369_v19, 256.0  ;;  %vm1806_vm11 = vcmp.le.f32.partialorder %v7711_v9, %v5342_v41  ;;  %7713 = vst [vmem:[#allocation30_spill] sm:$0xff] %v5514_v53  ;;  %7714 = vst [vmem:[#allocation32_spill] sm:$0xff] %v5516_v61  ;;  %v7715_v53 = vld [vmem:[#allocation45_spill] sm:$0xff]  ;;  %v7717_v61 = vld [vmem:[#allocation50_spill] sm:$0xff] }
 0x1d7   : > { %vm1808_vm12 = vcmp.le.f32.partialorder %v7712_v34, %v5342_v41  ;;  %v1906_v58 = vmin.f32 %v1904_v7, %v1854_v32  ;;  %v1907_v8 = vmin.f32 %v1905_v24, %v1856_v37  ;;  %v1858_v42 = vsel %vm1794_vm1, %v5371_v52, 256.0  ;;  %v7718_v37 = vld [vmem:[#allocation52_spill] sm:$0xff] }
 0x1d8   : > { %v1860_v29 = vsel %vm1796_vm2, %v5374_v38, 256.0  ;;  %vm1810_vm13 = vcmp.le.f32.partialorder %v5124_v43, %v5342_v41  ;;  %vm1812_vm14 = vcmp.le.f32.partialorder %v7715_v53, %v5342_v41  ;;  %v1862_v19 = vsel %vm1798_vm7, %v5376_v27, 256.0  ;;  %v7719_v27 = vld [vmem:[#allocation54_spill] sm:$0xff] }
 0x1d9   : > { %v1908_v24 = vmin.f32 %v1906_v58, %v1858_v42  ;;  %v1909_v32 = vmin.f32 %v1907_v8, %v1860_v29  ;;  %v1864_v8 = vsel %vm1800_vm8, %v5378_v25, 256.0  ;;  %vm1814_vm15 = vcmp.le.f32.partialorder %v5162_v59, %v5342_v41  ;;  %v7716_v58 = vld [vmem:[#allocation48_spill] sm:$0xff]  ;;  %v5568_v38 = vpop.xlane.xlu1 %3140 }
 0x1da   : > { %vm1816_vm0 = vcmp.le.f32.partialorder %v7716_v58, %v5342_v41  ;;  %vm1818_vm1 = vcmp.le.f32.partialorder %v7717_v61, %v5342_v41  ;;  %vm1820_vm2 = vcmp.le.f32.partialorder %v7718_v37, %v5342_v41  ;;  %v1866_v7 = vsel %vm1802_vm9, %v5380_v63, 256.0  ;;  %7721 = vst [vmem:[#allocation36_spill] sm:$0xff] %v5568_v38 }
 0x1db   : > { %v1910_v42 = vmin.f32 %v1908_v24, %v1862_v19  ;;  %v1911_v29 = vmin.f32 %v1909_v32, %v1864_v8  ;;  %v1868_v25 = vsel %vm1804_vm10, %v5382_v30, 256.0  ;;  %vm1822_vm7 = vcmp.le.f32.partialorder %v7719_v27, %v5342_v41  ;;  %v5566_v8 = vpop.xlane.xlu0 %3131 }
 0x1dc   : > { %v2319_v32 = vsub.f32 %v5342_v41, %v5298_v31  ;;  %7720 = vst [vmem:[#allocation34_spill] sm:$0xff] %v5566_v8  ;;  %vm1824_vm8 = vcmp.le.f32.partialorder %v5240_v47, %v5342_v41  ;;  %v1870_v30 = vsel %vm1806_vm11, %v5384_v33, 256.0  ;;  %v2321_v31 = vsub.f32 %v5342_v41, %v5316_v26 }
 0x1dd   : > { %v1912_v19 = vmin.f32 %v1910_v42, %v1866_v7  ;;  %v1913_v24 = vmin.f32 %v1911_v29, %v1868_v25  ;;  %v1872_v25 = vsel %vm1808_vm12, %v5388_v15, 256.0  ;;  %v1874_v7 = vsel %vm1810_vm13, %v5404_v28, 256.0 }
 0x1de   : > { %v1876_v42 = vsel %vm1812_vm14, %v5406_v2, 256.0  ;;  %v1878_v8 = vsel %vm1814_vm15, %v5425_v22, 256.0  ;;  %v2323_v26 = vsub.f32 %v5342_v41, %v4868_v39  ;;  %v7722_v15 = vsub.f32 %v5342_v41, %v5287_v56 }
 0x1df   : > { %v1914_v29 = vmin.f32 %v1912_v19, %v1870_v30  ;;  %v1915_v38 = vmin.f32 %v1913_v24, %v1872_v25  ;;  %v7723_v28 = vsub.f32 %v5342_v41, %v5312_v57  ;;  %v1880_v30 = vsel %vm1816_vm0, %v5427_v20, 256.0 }
 0x1e0   : > { %v5599_v33 = vmul.f32 100.0, %v7722_v15  ;;  %v5610_v25 = vmul.f32 100.0, %v2319_v32  ;;  %v1882_v39 = vsel %vm1818_vm1, %v5429_v23, 256.0  ;;  %v1884_v56 = vsel %vm1820_vm2, %v5431_v60, 256.0 }
 0x1e1   : > { %v5604_v63 = vmul.f32 100.0, %v7723_v28  ;;  %v1916_v19 = vmin.f32 %v1914_v29, %v1874_v7  ;;  %v1917_v24 = vmin.f32 %v1915_v38, %v1876_v42  ;;  %v2325_v57 = vsub.f32 %v5342_v41, %v4878_v62  ;;  %v5632_v42 = vpop.xlane.xlu0 %2925  ;;  %v5634_v29 = vpop.xlane.xlu1 %2937 }
 0x1e2   : > { %v5622_v15 = vmul.f32 100.0, %v2321_v31  ;;  %v1886_v38 = vsel %vm1822_vm7, %v5433_v35, 256.0  ;;  %v1888_v28 = vsel %vm1824_vm8, %v5449_v4, 256.0  ;;  %7724 = vst [vmem:[#allocation38_spill] sm:$0xff] %v5632_v42  ;;  %7725 = vst [vmem:[#allocation40_spill] sm:$0xff] %v5634_v29  ;;  %v2327_v62 = vsub.f32 %v5342_v41, %v4892_v46 }
 0x1e3   : > { %v1918_v32 = vmin.f32 %v1916_v19, %v1878_v8  ;;  %v1919_v7 = vmin.f32 %v1917_v24, %v1880_v30  ;;  %v5638_v31 = vmul.f32 100.0, %v2323_v26  ;;  %v2443_v60 = vmul.f32 1.442695, %v5599_v33 }
 0x1e4   : > { %v2447_v35 = vmul.f32 1.442695, %v5604_v63  ;;  %v1890_v4 = vsel %vm1826_vm3, %v5451_v50, 256.0  ;;  %v2451_v19 = vmul.f32 1.442695, %v5610_v25  ;;  %v2329_v24 = vsub.f32 %v5342_v41, %v4908_v0 }
 0x1e5   : > { %v1920_v8 = vmin.f32 %v1918_v32, %v1882_v39  ;;  %v1921_v30 = vmin.f32 %v1919_v7, %v1884_v56  ;;  %v5649_v29 = vmul.f32 100.0, %v2325_v57  ;;  %3996 = vpow2.f32 %v2443_v60 }
 0x1e6   : > { %v2455_v46 = vmul.f32 1.442695, %v5622_v15  ;;  %v1892_v26 = vsel %vm1828_vm4, %v5466_v16, 256.0  ;;  %3998 = vpow2.f32 %v2447_v35  ;;  %v2331_v39 = vsub.f32 %v5342_v41, %v4924_v40  ;;  %v5671_v40 = vpop.xlane.xlu1 %3146 }
 0x1e7   : > { %v1922_v42 = vmin.f32 %v1920_v8, %v1886_v38  ;;  %v1923_v23 = vmin.f32 %v1921_v30, %v1888_v28  ;;  %v5658_v56 = vmul.f32 100.0, %v2327_v62  ;;  %4000 = vpow2.f32 %v2451_v19  ;;  %v5669_v28 = vpop.xlane.xlu0 %3137  ;;  %7727 = vst [vmem:[#allocation45_spill] sm:$0xff] %v5671_v40 }
 0x1e8   : > { %v2459_v0 = vmul.f32 1.442695, %v5638_v31  ;;  %v1894_v60 = vsel %vm1830_vm5, %v5468_v5, 256.0  ;;  %v1896_v57 = vsel %vm1832_vm6, %v5478_v44, 256.0  ;;  %7726 = vst [vmem:[#allocation42_spill] sm:$0xff] %v5669_v28  ;;  %v2333_v32 = vsub.f32 %v5342_v41, %v4937_v48 }
 0x1e9   : > { %v1924_v38 = vmin.f32 %v1922_v42, %v1890_v4  ;;  %v1925_v35 = vmin.f32 %v1923_v23, %v1892_v26  ;;  %v5675_v7 = vmul.f32 100.0, %v2329_v24  ;;  %4002 = vpow2.f32 %v2455_v46 }
 0x1ea   : > { %v2463_v62 = vmul.f32 1.442695, %v5649_v29  ;;  %v2335_v19 = vsub.f32 %v5342_v41, %v4955_v6  ;;  %v5680_v44 = vmul.f32 100.0, %v2331_v39  ;;  %4004 = vpow2.f32 %v2459_v0  ;;  %v5693_v6 = vpop.xlane.xlu1 %2943 }
 0x1eb   : > { %v1926_v8 = vmin.f32 %v1924_v38, %v1894_v60  ;;  %v1927_v30 = vmin.f32 %v1925_v35, %v1896_v57  ;;  %v2467_v23 = vmul.f32 1.442695, %v5658_v56  ;;  %v1712_v42 = vrot.slane %v5488_v10, 1  ;;  %v5691_v26 = vpop.xlane.xlu0 %2934  ;;  %7729 = vst [vmem:[#allocation50_spill] sm:$0xff] %v5693_v6  ;;  %v7731_v57 = vld [vmem:[#allocation61_spill] sm:$0xff] }
 0x1ec   : > { %v2337_v48 = vsub.f32 %v5342_v41, %v4968_v13  ;;  %v5688_v24 = vmul.f32 100.0, %v2333_v32  ;;  %4006 = vpow2.f32 %v2463_v62  ;;  %v2471_v46 = vmul.f32 1.442695, %v5675_v7  ;;  %7728 = vst [vmem:[#allocation48_spill] sm:$0xff] %v5691_v26  ;;  %v7733_v35 = vld [vmem:[#allocation65_spill] sm:$0xff] }
 0x1ed   : > { %v5683_v4 = vmin.f32 %v1926_v8, %v1927_v30  ;;  %v2339_v39 = vsub.f32 %v5342_v41, %v4990_v45  ;;  %v5697_v0 = vmul.f32 100.0, %v2335_v19  ;;  %4008 = vpow2.f32 %v2467_v23  ;;  %v7844_v26 = vld [vmem:[#allocation85_spill] sm:$0xff] }
 0x1ee   : > { %v2475_v60 = vmul.f32 1.442695, %v5680_v44  ;;  %v5702_v13 = vmul.f32 %v5282_v55, %v5282_v55  ;;  %v5706_v38 = vmul.f32 %v7731_v57, %v7731_v57  ;;  %v5710_v32 = vmul.f32 %v7733_v35, %v7733_v35  ;;  %v5749_v35 = vpop.xlane.xlu1 %3152 }
 0x1ef   : > { %v5713_v62 = vmin.f32 %v5488_v10, %v1712_v42  ;;  %v2341_v45 = vsub.f32 %v5342_v41, %v7706_v18  ;;  %v5717_v8 = vmul.f32 100.0, %v2337_v48  ;;  %4010 = vpow2.f32 %v2471_v46  ;;  %7739 = vst [vmem:[#allocation107_spill] sm:$0xff] %v5749_v35 }
 0x1f0   : > { %7730 = vst [vmem:[#allocation52_spill] sm:$0xff] %v5702_v13  ;;  %7732 = vst [vmem:[#allocation54_spill] sm:$0xff] %v5706_v38  ;;  %v2479_v55 = vmul.f32 1.442695, %v5688_v24  ;;  %v2343_v19 = vsub.f32 %v5342_v41, %v7707_v51  ;;  %v2345_v23 = vsub.f32 %v5342_v41, %v7708_v36  ;;  %v2347_v10 = vsub.f32 %v5342_v41, %v7709_v11  ;;  %v7854_v38 = vld [vmem:[#allocation98_spill] sm:$0xff] }
 0x1f1   : > { %7734 = vst [vmem:[#allocation61_spill] sm:$0xff] %v5710_v32  ;;  %v2349_v42 = vsub.f32 %v5342_v41, %v7710_v3  ;;  %v5732_v48 = vmul.f32 100.0, %v2339_v39  ;;  %4012 = vpow2.f32 %v2475_v60  ;;  %v2483_v46 = vmul.f32 1.442695, %v5697_v0  ;;  %v5747_v60 = vpop.xlane.xlu0 %3143  ;;  %v7846_v32 = vld [vmem:[#allocation86_spill] sm:$0xff] }
 0x1f2   : > { %v5720_v30 = vpop.eup %3996  ;;  %v2351_v36 = vsub.f32 %v5342_v41, %v7711_v9  ;;  %v2353_v11 = vsub.f32 %v5342_v41, %v7712_v34  ;;  %7738 = vst [vmem:[#allocation106_spill] sm:$0xff] %v5747_v60  ;;  %v5753_v40 = vmul.f32 100.0, %v2341_v45  ;;  %4014 = vpow2.f32 %v2479_v55 }
 0x1f3   : > { %7735 = vst [vmem:[#allocation65_spill] sm:$0xff] %v5720_v30  ;;  %v5730_v18 = vpop.eup %3998  ;;  %v2647_v57 = vmul.f32 %v5720_v30, %v5599_v33  ;;  %v2355_v33 = vsub.f32 %v5342_v41, %v5124_v43  ;;  %v2487_v9 = vmul.f32 1.442695, %v5717_v8  ;;  %v2357_v34 = vsub.f32 %v5342_v41, %v7715_v53 }
 0x1f4   : > { %7736 = vst [vmem:[#allocation104_spill] sm:$0xff] %v5730_v18  ;;  %v5737_v51 = vpop.eup %4000  ;;  %v2571_v3 = vadd.f32 %v5730_v18, %v5720_v30  ;;  %v2649_v39 = vmul.f32 %v5730_v18, %v5604_v63  ;;  %v2359_v63 = vsub.f32 %v5342_v41, %v5162_v59  ;;  %v5762_v30 = vmul.f32 100.0, %v2343_v19 }
 0x1f5   : > { %7737 = vst [vmem:[#allocation105_spill] sm:$0xff] %v5737_v51  ;;  %4016 = vpow2.f32 %v2483_v46  ;;  %v2491_v43 = vmul.f32 1.442695, %v5732_v48  ;;  %v2651_v45 = vmul.f32 %v5737_v51, %v5610_v25  ;;  %v2361_v18 = vsub.f32 %v5342_v41, %v7716_v58 }
 0x1f6   : > { %v5756_v28 = vpop.eup %4002  ;;  %v2572_v35 = vadd.f32 %v5737_v51, %v2571_v3  ;;  %v2711_v55 = vadd.f32 %v2649_v39, %v2647_v57  ;;  %v2363_v53 = vsub.f32 %v5342_v41, %v7717_v61  ;;  %v5774_v59 = vmul.f32 100.0, %v2345_v23 }
 0x1f7   : > { %7740 = vst [vmem:[#allocation108_spill] sm:$0xff] %v5756_v28  ;;  %v5768_v60 = vpop.eup %4004  ;;  %4018 = vpow2.f32 %v2487_v9  ;;  %v2495_v46 = vmul.f32 1.442695, %v5753_v40  ;;  %v2653_v3 = vmul.f32 %v5756_v28, %v5622_v15  ;;  %v2365_v39 = vsub.f32 %v5342_v41, %v7718_v37  ;;  %v5791_v9 = vpop.xlane.xlu1 %2949 }
 0x1f8   : > { %7741 = vst [vmem:[#allocation109_spill] sm:$0xff] %v5768_v60  ;;  %v2573_v19 = vadd.f32 %v5756_v28, %v2572_v35  ;;  %v2712_v25 = vadd.f32 %v2711_v55, %v2651_v45  ;;  %v2367_v58 = vsub.f32 %v5342_v41, %v7719_v27  ;;  %v5786_v61 = vmul.f32 100.0, %v2347_v10  ;;  %v5789_v35 = vpop.xlane.xlu0 %2940  ;;  %7744 = vst [vmem:[#allocation112_spill] sm:$0xff] %v5791_v9 }
 0x1f9   : > { %v5780_v57 = vpop.eup %4006  ;;  %7743 = vst [vmem:[#allocation111_spill] sm:$0xff] %v5789_v35  ;;  %4020 = vpow2.f32 %v2491_v43  ;;  %v2499_v15 = vmul.f32 1.442695, %v5762_v30  ;;  %v2655_v45 = vmul.f32 %v5768_v60, %v5638_v31  ;;  %v2369_v27 = vsub.f32 %v5342_v41, %v5240_v47 }
 0x1fa   : > { %7742 = vst [vmem:[#allocation110_spill] sm:$0xff] %v5780_v57  ;;  %v2574_v23 = vadd.f32 %v5768_v60, %v2573_v19  ;;  %v2713_v55 = vadd.f32 %v2712_v25, %v2653_v3  ;;  %v5796_v51 = vpop.eup %4008  ;;  %v5800_v37 = vmul.f32 100.0, %v2349_v42  ;;  %v5802_v10 = vmul.f32 100.0, %v2351_v36 }
 0x1fb   : > { %7745 = vst [vmem:[#allocation113_spill] sm:$0xff] %v5796_v51  ;;  %4022 = vpow2.f32 %v2495_v46  ;;  %v2503_v43 = vmul.f32 1.442695, %v5774_v59  ;;  %v2657_v28 = vmul.f32 %v5780_v57, %v5649_v29  ;;  %v1929_v3 = vrot.slane %v5683_v4, 4 }
 0x1fc   : > { %7746 = vst [vmem:[#allocation114_spill] sm:$0xff] %v5802_v10  ;;  %v2575_v19 = vadd.f32 %v5780_v57, %v2574_v23  ;;  %v2714_v9 = vadd.f32 %v2713_v55, %v2655_v45  ;;  %v5808_v31 = vpop.eup %4010  ;;  %v5811_v25 = vmul.f32 100.0, %v2353_v11  ;;  %v5813_v47 = vmul.f32 100.0, %v2355_v33  ;;  %v5828_v33 = vpop.xlane.xlu0 %3149 }
 0x1fd   : > { %7747 = vst [vmem:[#allocation115_spill] sm:$0xff] %v5808_v31  ;;  %4024 = vpow2.f32 %v2499_v15  ;;  %v2507_v36 = vmul.f32 1.442695, %v5786_v61  ;;  %v2659_v46 = vmul.f32 %v5796_v51, %v5658_v56  ;;  %v5821_v29 = vmul.f32 100.0, %v2357_v34  ;;  %7754 = vst [vmem:[#allocation122_spill] sm:$0xff] %v5828_v33 }
 0x1fe   : > { %7748 = vst [vmem:[#allocation116_spill] sm:$0xff] %v5811_v25  ;;  %7749 = vst [vmem:[#allocation117_spill] sm:$0xff] %v5813_v47  ;;  %v2576_v42 = vadd.f32 %v5796_v51, %v2575_v19  ;;  %v2715_v23 = vadd.f32 %v2714_v9, %v2657_v28  ;;  %v5819_v60 = vpop.eup %4012  ;;  %v5823_v45 = vmul.f32 100.0, %v2359_v63  ;;  %v5825_v55 = vmul.f32 100.0, %v2361_v18  ;;  %v5830_v19 = vpop.xlane.xlu1 %3158 }
 0x1ff   : > { %7750 = vst [vmem:[#allocation118_spill] sm:$0xff] %v5819_v60  ;;  %7751 = vst [vmem:[#allocation119_spill] sm:$0xff] %v5821_v29  ;;  %4026 = vpow2.f32 %v2503_v43  ;;  %v2511_v15 = vmul.f32 1.442695, %v5800_v37  ;;  %v2661_v56 = vmul.f32 %v5808_v31, %v5675_v7  ;;  %v5835_v9 = vpop.eup %4014  ;;  %v1930_v34 = vmin.f32 %v5683_v4, %v1929_v3 }
 0x200   : > { %7752 = vst [vmem:[#allocation120_spill] sm:$0xff] %v5823_v45  ;;  %7753 = vst [vmem:[#allocation121_spill] sm:$0xff] %v5825_v55  ;;  %v2577_v11 = vadd.f32 %v5808_v31, %v2576_v42  ;;  %v2716_v28 = vadd.f32 %v2715_v23, %v2659_v46  ;;  %v5838_v63 = vmul.f32 100.0, %v2363_v53  ;;  %v5840_v18 = vmul.f32 100.0, %v2365_v39 }
 0x201   : > { %7755 = vst [vmem:[#allocation123_spill] sm:$0xff] %v5830_v19  ;;  %7756 = vst [vmem:[#allocation124_spill] sm:$0xff] %v5835_v9  ;;  %v5843_v33 = vmul.f32 100.0, %v2367_v58  ;;  %4028 = vpow2.f32 %v2507_v36  ;;  %v2663_v43 = vmul.f32 %v5819_v60, %v5680_v44  ;;  %v5849_v7 = vmul.f32 100.0, %v2369_v27 }
 0x202   : > { %7757 = vst [vmem:[#allocation125_spill] sm:$0xff] %v5838_v63  ;;  %7758 = vst [vmem:[#allocation126_spill] sm:$0xff] %v5840_v18  ;;  %v2578_v42 = vadd.f32 %v5819_v60, %v2577_v11  ;;  %v2717_v19 = vadd.f32 %v2716_v28, %v2661_v56  ;;  %v5847_v51 = vpop.eup %4016  ;;  %v7762_v4 = vsub.f32 %v5342_v41, %v5248_v1  ;;  %v2515_v39 = vmul.f32 1.442695, %v5802_v10  ;;  %v7774_v60 = vld [vmem:[#allocation63_spill] sm:$0xff] }
 0x203   : > { %7759 = vst [vmem:[#allocation127_spill] sm:$0xff] %v5843_v33  ;;  %7760 = vst [vmem:[#allocation128_spill] sm:$0xff] %v5847_v51  ;;  %v7764_v58 = vsub.f32 %v5342_v41, %v5255_v21  ;;  %4030 = vpow2.f32 %v2511_v15  ;;  %v2665_v44 = vmul.f32 %v5835_v9, %v5688_v24  ;;  %v1931_v23 = vrot.slane %v1930_v34, 2  ;;  %v5874_v21 = vpop.xlane.xlu0 %2946 }
 0x204   : > { %7761 = vst [vmem:[#allocation129_spill] sm:$0xff] %v5849_v7  ;;  %v5854_v53 = vmul.f32 100.0, %v7762_v4  ;;  %v2579_v3 = vadd.f32 %v5835_v9, %v2578_v42  ;;  %v2718_v27 = vadd.f32 %v2717_v19, %v2663_v43  ;;  %v5865_v46 = vpop.eup %4018  ;;  %v7767_v1 = vsub.f32 %v5342_v41, %v5260_v49  ;;  %7769 = vst [vmem:[#allocation134_spill] sm:$0xff] %v5874_v21  ;;  %v5876_v42 = vpop.xlane.xlu1 %2955 }
 0x205   : > { %v5861_v36 = vmul.f32 100.0, %v7764_v58  ;;  %7766 = vst [vmem:[#allocation132_spill] sm:$0xff] %v5865_v46  ;;  %v2519_v56 = vmul.f32 1.442695, %v5811_v25  ;;  %7770 = vst [vmem:[#allocation135_spill] sm:$0xff] %v5876_v42  ;;  %v7771_v24 = vsub.f32 %v5342_v41, %v5273_v12  ;;  %v2667_v49 = vmul.f32 %v5847_v51, %v5697_v0  ;;  %v7775_v12 = vld [vmem:[#allocation64_spill] sm:$0xff] }
 0x206   : > { %7763 = vst [vmem:[#allocation130_spill] sm:$0xff] %v5854_v53  ;;  %v5870_v11 = vmul.f32 100.0, %v7767_v1  ;;  %v2580_v28 = vadd.f32 %v5847_v51, %v2579_v3  ;;  %v2523_v15 = vmul.f32 1.442695, %v5813_v47  ;;  %v2719_v43 = vadd.f32 %v2718_v27, %v2665_v44  ;;  %v5886_v4 = vpop.eup %4020  ;;  %v7776_v27 = vld [vmem:[#allocation62_spill] sm:$0xff]  ;;  %v7805_v47 = vld [vmem:[#allocation37_spill] sm:$0xff] }
 0x207   : > { %7765 = vst [vmem:[#allocation131_spill] sm:$0xff] %v5861_v36  ;;  %v5881_v19 = vmul.f32 100.0, %v7771_v24  ;;  %7773 = vst [vmem:[#allocation137_spill] sm:$0xff] %v5886_v4  ;;  %4032 = vpow2.f32 %v2515_v39  ;;  %v2527_v3 = vmul.f32 1.442695, %v5821_v29  ;;  %vm1771_vm3 = vcmp.le.f32.partialorder %v7774_v60, %v5713_v62  ;;  %v7777_v24 = vld [vmem:[#allocation71_spill] sm:$0xff] }
 0x208   : > { %7768 = vst [vmem:[#allocation133_spill] sm:$0xff] %v5870_v11  ;;  %v2531_v58 = vmul.f32 1.442695, %v5823_v45  ;;  %v2581_v1 = vadd.f32 %v5865_v46, %v2580_v28  ;;  %vm1775_vm4 = vcmp.le.f32.partialorder %v7775_v12, %v5713_v62  ;;  %v2535_v41 = vmul.f32 1.442695, %v5825_v55  ;;  %v5903_v28 = vpop.eup %4022  ;;  %v7803_v55 = vld [vmem:[#allocation33_spill] sm:$0xff] }
 0x209   : > { %7772 = vst [vmem:[#allocation136_spill] sm:$0xff] %v5881_v19  ;;  %v2539_v0 = vmul.f32 1.442695, %v5838_v63  ;;  %v2669_v44 = vmul.f32 %v5865_v46, %v5717_v8  ;;  %v2720_v39 = vadd.f32 %v2719_v43, %v2667_v49  ;;  %vm1773_vm5 = vcmp.le.f32.partialorder %v7776_v27, %v5713_v62  ;;  %7778 = vst [vmem:[#allocation63_spill] sm:$0xff] %v5903_v28  ;;  %v7804_v29 = vld [vmem:[#allocation35_spill] sm:$0xff] }
 0x20a   : > { %vm1777_vm6 = vcmp.le.f32.partialorder %v7777_v24, %v5713_v62  ;;  %v1932_v51 = vmin.f32 %v1930_v34, %v1931_v23  ;;  %4034 = vpow2.f32 %v2519_v56  ;;  %v2543_v9 = vmul.f32 1.442695, %v5840_v18  ;;  %v5911_v43 = vpop.eup %4024  ;;  %v5918_v56 = vpop.xlane.xlu0 %3155  ;;  %v7802_v18 = vld [vmem:[#allocation31_spill] sm:$0xff] }
 0x20b   : > { %v2582_v31 = vadd.f32 %v5886_v4, %v2581_v1  ;;  %v2547_v57 = vmul.f32 1.442695, %v5843_v33  ;;  %v2551_v63 = vmul.f32 1.442695, %v5849_v7  ;;  %v2671_v8 = vmul.f32 %v5886_v4, %v5732_v48  ;;  %7779 = vst [vmem:[#allocation64_spill] sm:$0xff] %v5911_v43  ;;  %7780 = vst [vmem:[#allocation62_spill] sm:$0xff] %v5918_v56  ;;  %v5920_v1 = vpop.xlane.xlu1 %3164 }
 0x20c   : > { %v2721_v49 = vadd.f32 %v2720_v39, %v2669_v44  ;;  %4036 = vpow2.f32 %v2523_v15  ;;  %v2555_v46 = vmul.f32 1.442695, %v5854_v53  ;;  %v5915_v34 = vmul.f32 1.442695, %v5861_v36  ;;  %7781 = vst [vmem:[#allocation71_spill] sm:$0xff] %v5920_v1  ;;  %v5930_v39 = vpop.eup %4026  ;;  %v7784_v1 = vld [vmem:[#allocation22_spill] sm:$0xff] }
 0x20d   : > { %v2583_v23 = vadd.f32 %v5903_v28, %v2582_v31  ;;  %v5923_v7 = vmul.f32 1.442695, %v5870_v11  ;;  %v5926_v48 = vmul.f32 1.442695, %v5881_v19  ;;  %v2673_v15 = vmul.f32 %v5903_v28, %v5753_v40  ;;  %7782 = vst [vmem:[#allocation138_spill] sm:$0xff] %v5930_v39  ;;  %v7783_v31 = vld [vmem:[#allocation21_spill] sm:$0xff] }
 0x20e   : > { %v2722_v44 = vadd.f32 %v2721_v49, %v2671_v8  ;;  %v1933_v4 = vrot.slane %v1932_v51, 1  ;;  %vm1779_vm9 = vcmp.le.f32.partialorder %v7783_v31, %v5713_v62  ;;  %vm1781_vm10 = vcmp.le.f32.partialorder %v7784_v1, %v5713_v62  ;;  %v7785_v11 = vld [vmem:[#allocation23_spill] sm:$0xff]  ;;  %v5941_v40 = vpop.eup %4028  ;;  %v7787_v49 = vld [vmem:[#allocation24_spill] sm:$0xff]  ;;  %v5959_v28 = vpop.xlane.xlu0 %2952  ;;  %v7798_v53 = vld [vmem:[#allocation29_spill] sm:$0xff] }
 0x20f   : > { %v2584_v36 = vadd.f32 %v5911_v43, %v2583_v23  ;;  %4038 = vpow2.f32 %v2527_v3  ;;  %v2675_v56 = vmul.f32 %v5911_v43, %v5762_v30  ;;  %vm1783_vm11 = vcmp.le.f32.partialorder %v7785_v11, %v5713_v62  ;;  %7786 = vst [vmem:[#allocation21_spill] sm:$0xff] %v5941_v40  ;;  %v7788_v23 = vld [vmem:[#allocation25_spill] sm:$0xff]  ;;  %7793 = vst [vmem:[#allocation24_spill] sm:$0xff] %v5959_v28 }
 0x210   : > { %v2723_v19 = vadd.f32 %v2722_v44, %v2673_v15  ;;  %4040 = vpow2.f32 %v2531_v58  ;;  %vm1785_vm12 = vcmp.le.f32.partialorder %v7787_v49, %v5713_v62  ;;  %vm1787_vm13 = vcmp.le.f32.partialorder %v7788_v23, %v5713_v62  ;;  %v7789_v15 = vld [vmem:[#allocation26_spill] sm:$0xff]  ;;  %v5952_v44 = vpop.eup %4030  ;;  %v7792_v58 = vld [vmem:[#allocation27_spill] sm:$0xff] }
 0x211   : > { %v2585_v8 = vadd.f32 %v5930_v39, %v2584_v36  ;;  %4042 = vpow2.f32 %v2535_v41  ;;  %v2677_v3 = vmul.f32 %v5930_v39, %v5774_v59  ;;  %vm1789_vm14 = vcmp.le.f32.partialorder %v7789_v15, %v5713_v62  ;;  %7790 = vst [vmem:[#allocation22_spill] sm:$0xff] %v5952_v44  ;;  %v5961_v41 = vpop.xlane.xlu1 %2961  ;;  %v7796_v39 = vld [vmem:[#allocation88_spill] sm:$0xff] }
 0x212   : > { %v2724_v30 = vadd.f32 %v2723_v19, %v2675_v56  ;;  %v5954_v43 = vmin.f32 %v1932_v51, %v1933_v4  ;;  %4044 = vpow2.f32 %v2539_v0  ;;  %vm1791_vm15 = vcmp.le.f32.partialorder %v7792_v58, %v5713_v62  ;;  %7794 = vst [vmem:[#allocation25_spill] sm:$0xff] %v5961_v41  ;;  %v7795_v56 = vld [vmem:[#allocation28_spill] sm:$0xff]  ;;  %v7797_v4 = vld [vmem:[#allocation90_spill] sm:$0xff] }
 0x213   : > { %v2586_v36 = vadd.f32 %v5941_v40, %v2585_v8  ;;  %v2679_v59 = vmul.f32 %v5941_v40, %v5786_v61  ;;  %vm1793_vm0 = vcmp.le.f32.partialorder %v7795_v56, %v5713_v62  ;;  %v1835_v51 = vsel %vm1771_vm3, %v7796_v39, 256.0  ;;  %v7799_v61 = vld [vmem:[#allocation89_spill] sm:$0xff]  ;;  %v7820_v39 = vld [vmem:[#allocation74_spill] sm:$0xff] }
 0x214   : > { %7791 = vst [vmem:[#allocation23_spill] sm:$0xff] %v5954_v43  ;;  %v2725_v19 = vadd.f32 %v2724_v30, %v2677_v3  ;;  %v1839_v0 = vsel %vm1775_vm4, %v7797_v4, 256.0  ;;  %4046 = vpow2.f32 %v2543_v9  ;;  %vm1795_vm1 = vcmp.le.f32.partialorder %v7798_v53, %v5713_v62  ;;  %v7800_v30 = vld [vmem:[#allocation91_spill] sm:$0xff]  ;;  %v5986_v33 = vpop.eup %4032 }
 0x215   : > { %v2587_v8 = vadd.f32 %v5952_v44, %v2586_v36  ;;  %v1837_v3 = vsel %vm1773_vm5, %v7799_v61, 256.0  ;;  %v1841_v40 = vsel %vm1777_vm6, %v7800_v30, 256.0  ;;  %7801 = vst [vmem:[#allocation26_spill] sm:$0xff] %v5986_v33  ;;  %4048 = vpow2.f32 %v2547_v57  ;;  %v7806_v57 = vld [vmem:[#allocation39_spill] sm:$0xff] }
 0x216   : > { %v2681_v9 = vmul.f32 %v5952_v44, %v5800_v37  ;;  %v2726_v36 = vadd.f32 %v2725_v19, %v2679_v59  ;;  %vm1797_vm2 = vcmp.le.f32.partialorder %v7802_v18, %v5713_v62  ;;  %vm1799_vm7 = vcmp.le.f32.partialorder %v7803_v55, %v5713_v62  ;;  %v7809_v44 = vld [vmem:[#allocation41_spill] sm:$0xff]  ;;  %v7826_v4 = vld [vmem:[#allocation55_spill] sm:$0xff] }
 0x217   : > { %4050 = vpow2.f32 %v2551_v63  ;;  %v2588_v45 = vadd.f32 %v5986_v33, %v2587_v8  ;;  %vm1801_vm8 = vcmp.le.f32.partialorder %v7804_v29, %v5713_v62  ;;  %v1935_v37 = vmin.f32 %v1835_v51, %v1839_v0  ;;  %v6001_v59 = vpop.eup %4034  ;;  %v7810_v63 = vld [vmem:[#allocation43_spill] sm:$0xff]  ;;  %v7811_v51 = vld [vmem:[#allocation44_spill] sm:$0xff] }
 0x218   : > { %7807 = vst [vmem:[#allocation27_spill] sm:$0xff] %v6001_v59  ;;  %4052 = vpow2.f32 %v2555_v46  ;;  %v6003_v19 = vadd.f32 %v2726_v36, %v2681_v9  ;;  %vm1807_vm5 = vcmp.le.f32.partialorder %v7809_v44, %v5713_v62  ;;  %vm1809_vm6 = vcmp.le.f32.partialorder %v7810_v63, %v5713_v62  ;;  %v7812_v46 = vld [vmem:[#allocation46_spill] sm:$0xff]  ;;  %v6022_v36 = vpop.xlane.xlu0 %3161 }
 0x219   : > { %v1843_v8 = vsel %vm1779_vm9, %v5330_v14, 256.0  ;;  %v1936_v25 = vmin.f32 %v1837_v3, %v1841_v40  ;;  %v2589_v33 = vadd.f32 %v6001_v59, %v2588_v45  ;;  %vm1811_vm4 = vcmp.le.f32.partialorder %v7811_v51, %v5713_v62  ;;  %7813 = vst [vmem:[#allocation29_spill] sm:$0xff] %v6022_v36  ;;  %v6026_v10 = vpop.eup %4036  ;;  %v7816_v45 = vld [vmem:[#allocation47_spill] sm:$0xff]  ;;  %v7817_v40 = vld [vmem:[#allocation70_spill] sm:$0xff] }
 0x21a   : > { %7808 = vst [vmem:[#allocation28_spill] sm:$0xff] %v6003_v19  ;;  %vm1813_vm3 = vcmp.le.f32.partialorder %v7812_v46, %v5713_v62  ;;  %v1845_v0 = vsel %vm1781_vm10, %v5332_v54, 256.0  ;;  %v1937_v9 = vmin.f32 %v1935_v37, %v1843_v8  ;;  %v6024_v19 = vpop.xlane.xlu1 %3170  ;;  %7815 = vst [vmem:[#allocation33_spill] sm:$0xff] %v6026_v10  ;;  %4054 = vpow2.f32 %v5915_v34  ;;  %v7818_v8 = vld [vmem:[#allocation73_spill] sm:$0xff] }
 0x21b   : > { %7814 = vst [vmem:[#allocation31_spill] sm:$0xff] %v6024_v19  ;;  %vm1815_vm9 = vcmp.le.f32.partialorder %v7816_v45, %v5713_v62  ;;  %v1847_v3 = vsel %vm1783_vm11, %v7817_v40, 256.0  ;;  %v1938_v59 = vmin.f32 %v1936_v25, %v1845_v0  ;;  %4056 = vpow2.f32 %v5923_v7  ;;  %v7819_v34 = vld [vmem:[#allocation49_spill] sm:$0xff] }
 0x21c   : > { %v2590_v37 = vadd.f32 %v6026_v10, %v2589_v33  ;;  %v1849_v19 = vsel %vm1785_vm12, %v7818_v8, 256.0  ;;  %v1939_v36 = vmin.f32 %v1937_v9, %v1847_v3  ;;  %4058 = vpow2.f32 %v5926_v48  ;;  %v6048_v7 = vpop.eup %4038  ;;  %v7822_v33 = vld [vmem:[#allocation51_spill] sm:$0xff]  ;;  %v7823_v10 = vld [vmem:[#allocation53_spill] sm:$0xff]  ;;  %v6077_v41 = vpop.xlane.xlu0 %2958 }
 0x21d   : > { %v1851_v25 = vsel %vm1787_vm13, %v7820_v39, 256.0  ;;  %v1940_v0 = vmin.f32 %v1938_v59, %v1849_v19  ;;  %7821 = vst [vmem:[#allocation35_spill] sm:$0xff] %v6048_v7  ;;  %vm1819_vm11 = vcmp.le.f32.partialorder %v7822_v33, %v5713_v62  ;;  %vm1821_vm12 = vcmp.le.f32.partialorder %v7823_v10, %v5713_v62  ;;  %v7824_v9 = vld [vmem:[#allocation75_spill] sm:$0xff]  ;;  %v6058_v61 = vpop.eup %4040  ;;  %v7827_v59 = vld [vmem:[#allocation56_spill] sm:$0xff]  ;;  %7831 = vst [vmem:[#allocation41_spill] sm:$0xff] %v6077_v41 }
 0x21e   : > { %v1853_v48 = vsel %vm1789_vm14, %v7824_v9, 256.0  ;;  %v1941_v3 = vmin.f32 %v1939_v36, %v1851_v25  ;;  %7825 = vst [vmem:[#allocation37_spill] sm:$0xff] %v6058_v61  ;;  %vm1823_vm13 = vcmp.le.f32.partialorder %v7826_v4, %v5713_v62  ;;  %v1855_v19 = vsel %vm1791_vm15, %v5367_v17, 256.0  ;;  %v6068_v14 = vpop.eup %4042  ;;  %v7829_v36 = vld [vmem:[#allocation57_spill] sm:$0xff]  ;;  %v6079_v39 = vpop.xlane.xlu1 %2967  ;;  %v7837_v41 = vld [vmem:[#allocation80_spill] sm:$0xff] }
 0x21f   : > { %v1942_v30 = vmin.f32 %v1940_v0, %v1853_v48  ;;  %7828 = vst [vmem:[#allocation39_spill] sm:$0xff] %v6068_v14  ;;  %v2591_v54 = vadd.f32 %v6048_v7, %v2590_v37  ;;  %vm1827_vm14 = vcmp.le.f32.partialorder %v7829_v36, %v5713_v62  ;;  %v7830_v25 = vld [vmem:[#allocation77_spill] sm:$0xff]  ;;  %7832 = vst [vmem:[#allocation43_spill] sm:$0xff] %v6079_v39  ;;  %v6081_v9 = vpop.eup %4044  ;;  %v7833_v0 = vld [vmem:[#allocation58_spill] sm:$0xff]  ;;  %v1859_v48 = vsel %vm1795_vm1, %v5371_v52, 256.0 }
 0x220   : > { %v1857_v40 = vsel %vm1793_vm0, %v7830_v25, 256.0  ;;  %v1943_v8 = vmin.f32 %v1941_v3, %v1855_v19  ;;  %vm1829_vm15 = vcmp.le.f32.partialorder %v7833_v0, %v5713_v62  ;;  %v7834_v37 = vld [vmem:[#allocation59_spill] sm:$0xff]  ;;  %v7835_v3 = vld [vmem:[#allocation60_spill] sm:$0xff]  ;;  %v1863_v42 = vsel %vm1799_vm7, %v7837_v41, 256.0  ;;  %v7838_v25 = vld [vmem:[#allocation81_spill] sm:$0xff] }
 0x221   : > { %vm1831_vm10 = vcmp.le.f32.partialorder %v7834_v37, %v5713_v62  ;;  %v1944_v7 = vmin.f32 %v1942_v30, %v1857_v40  ;;  %vm1833_vm0 = vcmp.le.f32.partialorder %v7835_v3, %v5713_v62  ;;  %v7836_v19 = vld [vmem:[#allocation79_spill] sm:$0xff]  ;;  %v6101_v28 = vpop.eup %4046  ;;  %v1865_v30 = vsel %vm1801_vm8, %v7838_v25, 256.0  ;;  %v7839_v40 = vld [vmem:[#allocation82_spill] sm:$0xff] }
 0x222   : > { %v1861_v39 = vsel %vm1797_vm2, %v7836_v19, 256.0  ;;  %v1945_v17 = vmin.f32 %v1943_v8, %v1859_v48  ;;  %vm7840_vm1 = vcmp.le.f32.partialorder %v7805_v47, %v5713_v62  ;;  %v7841_v52 = vld [vmem:[#allocation83_spill] sm:$0xff]  ;;  %vm7842_vm2 = vcmp.le.f32.partialorder %v7806_v57, %v5713_v62  ;;  %v6115_v35 = vpop.eup %4048  ;;  %v7843_v48 = vld [vmem:[#allocation84_spill] sm:$0xff] }
 0x223   : > { %v1867_v21 = vsel %vm7840_vm1, %v7839_v40, 256.0  ;;  %v1869_v6 = vsel %vm7842_vm2, %v7841_v52, 256.0  ;;  %v1946_v19 = vmin.f32 %v1944_v7, %v1861_v39  ;;  %v2592_v8 = vadd.f32 %v6058_v61, %v2591_v54 }
 0x224   : > { %v1871_v41 = vsel %vm1807_vm5, %v7843_v48, 256.0  ;;  %v1873_v40 = vsel %vm1809_vm6, %v7844_v26, 256.0  ;;  %v1947_v43 = vmin.f32 %v1945_v17, %v1863_v42  ;;  %v6126_v25 = vpop.eup %4050  ;;  %v1875_v39 = vsel %vm1811_vm4, %v7846_v32, 256.0  ;;  %v7849_v42 = vld [vmem:[#allocation94_spill] sm:$0xff]  ;;  %v7850_v32 = vld [vmem:[#allocation95_spill] sm:$0xff] }
 0x225   : > { %7845 = vst [vmem:[#allocation44_spill] sm:$0xff] %v6126_v25  ;;  %v1877_v54 = vsel %vm1813_vm3, %v5406_v2, 256.0  ;;  %v1879_v7 = vsel %vm1815_vm9, %v5425_v22, 256.0  ;;  %v1948_v52 = vmin.f32 %v1946_v19, %v1865_v30  ;;  %v6140_v48 = vpop.eup %4052  ;;  %vm7848_vm7 = vcmp.le.f32.partialorder %v7819_v34, %v5713_v62  ;;  %v6154_v22 = vpop.xlane.xlu0 %3167  ;;  %v7853_v30 = vld [vmem:[#allocation96_spill] sm:$0xff] }
 0x226   : > { %7847 = vst [vmem:[#allocation46_spill] sm:$0xff] %v6140_v48  ;;  %v1881_v17 = vsel %vm7848_vm7, %v5427_v20, 256.0  ;;  %v1883_v26 = vsel %vm1819_vm11, %v7849_v42, 256.0  ;;  %v1885_v2 = vsel %vm1821_vm12, %v7850_v32, 256.0  ;;  %v1949_v61 = vmin.f32 %v1947_v43, %v1867_v21  ;;  %7851 = vst [vmem:[#allocation47_spill] sm:$0xff] %v6154_v22  ;;  %v6156_v19 = vpop.xlane.xlu1 %3176 }
 0x227   : > { %7852 = vst [vmem:[#allocation49_spill] sm:$0xff] %v6156_v19  ;;  %v1887_v20 = vsel %vm1823_vm13, %v7853_v30, 256.0  ;;  %vm7855_vm8 = vcmp.le.f32.partialorder %v7827_v59, %v5713_v62  ;;  %v1891_v32 = vsel %vm1827_vm14, %v5451_v50, 256.0  ;;  %v1950_v21 = vmin.f32 %v1948_v52, %v1869_v6  ;;  %v6170_v43 = vpop.eup %4054  ;;  %v7857_v50 = vld [vmem:[#allocation103_spill] sm:$0xff] }
 0x228   : > { %v1889_v42 = vsel %vm7855_vm8, %v7854_v38, 256.0  ;;  %7856 = vst [vmem:[#allocation51_spill] sm:$0xff] %v6170_v43  ;;  %v2593_v19 = vadd.f32 %v6068_v14, %v2592_v8  ;;  %v1893_v22 = vsel %vm1829_vm15, %v5466_v16, 256.0  ;;  %v6181_v30 = vsel %vm1831_vm10, %v5468_v5, 256.0  ;;  %v6183_v13 = vpop.eup %4056 }
 0x229   : > { %v1951_v38 = vmin.f32 %v1949_v61, %v1871_v41  ;;  %v1897_v52 = vsel %vm1833_vm0, %v7857_v50, 256.0  ;;  %v1952_v6 = vmin.f32 %v1950_v21, %v1873_v40  ;;  %v2316_v8 = vsub.f32 %v5713_v62, %v7774_v60  ;;  %v6193_v16 = vpop.eup %4058 }
 0x22a   : > { %v2318_v14 = vsub.f32 %v5713_v62, %v7776_v27  ;;  %v2320_v41 = vsub.f32 %v5713_v62, %v7775_v12  ;;  %v2322_v61 = vsub.f32 %v5713_v62, %v7777_v24  ;;  %v2324_v5 = vsub.f32 %v5713_v62, %v7783_v31  ;;  %v6212_v31 = vpop.xlane.xlu0 %2964 }
 0x22b   : > { %v1953_v43 = vmin.f32 %v1951_v38, %v1875_v39  ;;  %v1954_v50 = vmin.f32 %v1952_v6, %v1877_v54  ;;  %v2326_v40 = vsub.f32 %v5713_v62, %v7784_v1  ;;  %v2328_v60 = vsub.f32 %v5713_v62, %v7785_v11  ;;  %v6214_v54 = vpop.xlane.xlu1 %2973 }
 0x22c   : > { %v2330_v27 = vsub.f32 %v5713_v62, %v7787_v49  ;;  %v2594_v38 = vadd.f32 %v6081_v9, %v2593_v19  ;;  %v2332_v12 = vsub.f32 %v5713_v62, %v7788_v23  ;;  %v2334_v24 = vsub.f32 %v5713_v62, %v7789_v15 }
 0x22d   : > { %v1955_v39 = vmin.f32 %v1953_v43, %v1879_v7  ;;  %v1956_v1 = vmin.f32 %v1954_v50, %v1881_v17  ;;  %v2336_v11 = vsub.f32 %v5713_v62, %v7792_v58  ;;  %v2346_v43 = vsub.f32 %v5713_v62, %v7804_v29 }
 0x22e   : > { %v6228_v17 = vmul.f32 100.0, %v2316_v8  ;;  %v6230_v58 = vmul.f32 100.0, %v2318_v14  ;;  %v6232_v6 = vmul.f32 100.0, %v2320_v41  ;;  %v2595_v49 = vadd.f32 %v6101_v28, %v2594_v38 }
 0x22f   : > { %v1957_v19 = vmin.f32 %v1955_v39, %v1883_v26  ;;  %v1958_v50 = vmin.f32 %v1956_v1, %v1885_v2  ;;  %v2348_v26 = vsub.f32 %v5713_v62, %v7805_v47  ;;  %v6237_v39 = vmul.f32 100.0, %v2322_v61  ;;  %v6251_v61 = vpop.xlane.xlu0 %3173 }
 0x230   : > { %v2350_v21 = vsub.f32 %v5713_v62, %v7806_v57  ;;  %v2352_v2 = vsub.f32 %v5713_v62, %v7809_v44  ;;  %v2354_v14 = vsub.f32 %v5713_v62, %v7810_v63  ;;  %v2356_v41 = vsub.f32 %v5713_v62, %v7811_v51  ;;  %7858 = vst [vmem:[#allocation53_spill] sm:$0xff] %v6251_v61 }
 0x231   : > { %v1959_v7 = vmin.f32 %v1957_v19, %v1887_v20  ;;  %v1960_v23 = vmin.f32 %v1958_v50, %v1889_v42  ;;  %v2358_v20 = vsub.f32 %v5713_v62, %v7812_v46  ;;  %v6249_v47 = vmul.f32 100.0, %v2324_v5  ;;  %v6253_v42 = vpop.xlane.xlu1 %3182  ;;  %v7871_v46 = vld [vmem:[#allocation30_spill] sm:$0xff] }
 0x232   : > { %7859 = vst [vmem:[#allocation55_spill] sm:$0xff] %v6253_v42  ;;  %v2445_v38 = vmul.f32 1.442695, %v6228_v17  ;;  %v2449_v44 = vmul.f32 1.442695, %v6230_v58  ;;  %v6260_v1 = vmul.f32 100.0, %v2326_v40  ;;  %v2360_v19 = vsub.f32 %v5713_v62, %v7816_v45 }
 0x233   : > { %v1961_v8 = vmin.f32 %v1959_v7, %v1891_v32  ;;  %v1962_v57 = vmin.f32 %v1960_v23, %v1893_v22  ;;  %v2453_v63 = vmul.f32 1.442695, %v6232_v6  ;;  %v2596_v32 = vadd.f32 %v6115_v35, %v2595_v49  ;;  %v7866_v23 = vld [vmem:[#allocation51_spill] sm:$0xff] }
 0x234   : > { %v2457_v5 = vmul.f32 1.442695, %v6237_v39  ;;  %4060 = vpow2.f32 %v2445_v38  ;;  %v6269_v50 = vmul.f32 100.0, %v2328_v60  ;;  %v6280_v60 = vpop.xlane.xlu0 %2970  ;;  %v7862_v15 = vsub.f32 %v5713_v62, %v7802_v18 }
 0x235   : > { %v1963_v51 = vmin.f32 %v1961_v8, %v6181_v30  ;;  %v1964_v7 = vmin.f32 %v1962_v57, %v1897_v52  ;;  %4062 = vpow2.f32 %v2449_v44  ;;  %v2461_v30 = vmul.f32 1.442695, %v6249_v47  ;;  %v6282_v38 = vpop.xlane.xlu1 %2979 }
 0x236   : > { %4064 = vpow2.f32 %v2453_v63  ;;  %v2597_v45 = vadd.f32 %v6126_v25, %v2596_v32  ;;  %v6277_v8 = vmul.f32 100.0, %v2330_v27  ;;  %v2465_v57 = vmul.f32 1.442695, %v6260_v1 }
 0x237   : > { %v1965_v40 = vmin.f32 %v1963_v51, %v1964_v7  ;;  %4066 = vpow2.f32 %v2457_v5  ;;  %v6292_v32 = vmul.f32 100.0, %v2332_v12  ;;  %v2469_v5 = vmul.f32 1.442695, %v6269_v50 }
 0x238   : > { %4068 = vpow2.f32 %v2461_v30  ;;  %v6300_v51 = vmul.f32 100.0, %v2334_v24  ;;  %v6302_v7 = vmul.f32 100.0, %v2336_v11  ;;  %v2598_v63 = vadd.f32 %v6140_v48, %v2597_v45 }
 0x239   : > { %v1966_v44 = vrot.slane %v1965_v40, 4  ;;  %v7860_v12 = vsub.f32 %v5713_v62, %v7795_v56  ;;  %4070 = vpow2.f32 %v2465_v57  ;;  %v2473_v30 = vmul.f32 1.442695, %v6277_v8  ;;  %v6336_v18 = vpop.xlane.xlu1 %3188 }
 0x23a   : > { %v6319_v24 = vmul.f32 100.0, %v7862_v15  ;;  %v7863_v11 = vsub.f32 %v5713_v62, %v7803_v55  ;;  %v6329_v45 = vmul.f32 100.0, %v2346_v43  ;;  %v6331_v57 = vmul.f32 100.0, %v2348_v26  ;;  %7865 = vst [vmem:[#allocation57_spill] sm:$0xff] %v6336_v18 }
 0x23b   : > { %v1967_v52 = vmin.f32 %v1965_v40, %v1966_v44  ;;  %v6308_v27 = vmul.f32 100.0, %v7860_v12  ;;  %v7861_v44 = vsub.f32 %v5713_v62, %v7798_v53  ;;  %4072 = vpow2.f32 %v2469_v5  ;;  %v6334_v12 = vpop.xlane.xlu0 %3179 }
 0x23c   : > { %v6324_v56 = vmul.f32 100.0, %v7863_v11  ;;  %v2477_v53 = vmul.f32 1.442695, %v6292_v32  ;;  %7864 = vst [vmem:[#allocation56_spill] sm:$0xff] %v6334_v12  ;;  %v6338_v15 = vmul.f32 100.0, %v2350_v21  ;;  %v6340_v55 = vmul.f32 100.0, %v2352_v2 }
 0x23d   : > { %v1968_v40 = vrot.slane %v1967_v52, 2  ;;  %v6314_v49 = vmul.f32 100.0, %v7861_v44  ;;  %v6342_v11 = vmul.f32 100.0, %v2354_v14  ;;  %v2599_v29 = vadd.f32 %v7866_v23, %v2598_v63  ;;  %v450_v2 = vld [vmem:[%s7355_s2 + $0x8] sm:$0xff] }
 0x23e   : > { %v6345_v43 = vmul.f32 100.0, %v2356_v41  ;;  %4074 = vpow2.f32 %v2473_v30  ;;  %v2481_v26 = vmul.f32 1.442695, %v6300_v51  ;;  %v6351_v22 = vmul.f32 100.0, %v2358_v20  ;;  %v7868_v41 = vld [vmem:[#allocation67_spill] sm:$0xff]  ;;  %v7869_v30 = vld [vmem:[#allocation52_spill] sm:$0xff]  ;;  %2250 = vmatprep.mubr.f32.mxu1 %v450_v2 }
 0x23f   : > { %v1969_v44 = vmin.f32 %v1967_v52, %v1968_v40  ;;  %v6353_v52 = vmul.f32 100.0, %v2360_v19  ;;  %v2485_v21 = vmul.f32 1.442695, %v6302_v7  ;;  %4076 = vpow2.f32 %v2477_v53  ;;  %v7870_v40 = vld [vmem:[#allocation54_spill] sm:$0xff]  ;;  %v7875_v2 = vld [vmem:[#allocation61_spill] sm:$0xff] }
 0x240   : > { %v3061_v63 = vmul.f32 %v7868_v41, %v7868_v41  ;;  %v3124_v18 = vadd.f32 %v7870_v40, %v7869_v30  ;;  %v7872_v20 = vld [vmem:[#allocation38_spill] sm:$0xff]  ;;  %v2489_v61 = vmul.f32 1.442695, %v6308_v27  ;;  %4078 = vpow2.f32 %v2481_v26 }
 0x241   : > { %v1970_v5 = vrot.slane %v1969_v44, 1  ;;  %v6359_v14 = vpop.eup %4060  ;;  %v3017_v42 = vadd.f32 %v7872_v20, %v7871_v46  ;;  %v6381_v46 = vpop.xlane.xlu0 %2976  ;;  %v2493_v26 = vmul.f32 1.442695, %v6314_v49  ;;  %4080 = vpow2.f32 %v2485_v21  ;;  %v7880_v21 = vld [vmem:[#allocation32_spill] sm:$0xff] }
 0x242   : > { %7867 = vst [vmem:[#allocation58_spill] sm:$0xff] %v6359_v14  ;;  %v6367_v19 = vpop.eup %4062  ;;  %v2648_v23 = vmul.f32 %v6359_v14, %v6228_v17  ;;  %3125 = vadd.xlane.f32.xlu0 %v3124_v18  ;;  %v3127_v40 = vadd.f32 %v3061_v63, %v7875_v2  ;;  %v7876_v17 = vsub.f32 %v5713_v62, %v7819_v34  ;;  %4082 = vpow2.f32 %v2489_v61 }
 0x243   : > { %7873 = vst [vmem:[#allocation59_spill] sm:$0xff] %v6367_v19  ;;  %v6369_v12 = vmin.f32 %v1969_v44, %v1970_v5  ;;  %v6374_v53 = vpop.eup %4064  ;;  %v2608_v41 = vadd.f32 %v6367_v19, %v6359_v14  ;;  %v2650_v30 = vmul.f32 %v6367_v19, %v6230_v58  ;;  %v6383_v44 = vpop.xlane.xlu1 %2985  ;;  %v7877_v14 = vld [vmem:[#allocation102_spill] sm:$0xff]  ;;  %v7878_v58 = vld [vmem:[#allocation81_spill] sm:$0xff]  ;;  %v7588_v19 = vmov 1.0  }
 0x244   : > { %7874 = vst [vmem:[#allocation60_spill] sm:$0xff] %v6374_v53  ;;  %v6385_v5 = vpop.eup %4066  ;;  %v6390_v20 = vmul.f32 100.0, %v7876_v17  ;;  %v3018_v48 = vadd.f32 %v3017_v42, %v7877_v14  ;;  %v2652_v63 = vmul.f32 %v6374_v53, %v6232_v6  ;;  %3128 = vadd.xlane.f32.xlu1 %v3127_v40  ;;  %v7879_v17 = vsub.f32 %v5713_v62, %v7822_v33 }
 0x245   : > { %vm2025_vm3 = vcmp.eq.f32.partialorder %v7878_v58, %v6369_v12  ;;  %v2609_v18 = vadd.f32 %v6374_v53, %v2608_v41  ;;  %v2748_v2 = vadd.f32 %v2650_v30, %v2648_v23  ;;  %v6400_v34 = vpop.eup %4068  ;;  %v2497_v14 = vmul.f32 1.442695, %v6319_v24  ;;  %v7881_v41 = vld [vmem:[#allocation23_spill] sm:$0xff] }
 0x246   : > { %3837 = vmatprep.subr.msk.mxu1 %vm2025_vm3, %v7588_v19  ;;  %v6405_v42 = vmul.f32 100.0, %v7879_v17  ;;  %v3019_v25 = vadd.f32 %v3018_v48, %v7880_v21  ;;  %vm2024_vm4 = vcmp.eq.f32.partialorder %v7878_v58, %v7881_v41  ;;  %v2654_v23 = vmul.f32 %v6385_v5, %v6237_v39  ;;  %v6415_v40 = vpop.eup %4070  ;;  %v7882_v48 = vld [vmem:[#allocation48_spill] sm:$0xff] }
 0x247   : > { %v2610_v6 = vadd.f32 %v6385_v5, %v2609_v18  ;;  %v2749_v30 = vadd.f32 %v2748_v2, %v2652_v63  ;;  %3838 = vmatpush1.msk.msra.mxu1 %vm2024_vm4, %v7588_v19  ;;  %v6418_v33 = vadd.f32 %v6183_v13, %v2599_v29  ;;  %v2501_v17 = vmul.f32 1.442695, %v6324_v56  ;;  %v7883_v58 = vld [vmem:[#allocation80_spill] sm:$0xff]  ;;  %v6428_v2 = vpop.xlane.xlu0 %3185  ;;  %v6430_v29 = vpop.xlane.xlu1 %3194 }
 0x248   : > { %v3020_v21 = vadd.f32 %v3019_v25, %v7882_v48  ;;  %vm2023_vm5 = vcmp.eq.f32.partialorder %v7883_v58, %v6369_v12  ;;  %4084 = vpow2.f32 %v2493_v26  ;;  %v2656_v39 = vmul.f32 %v6400_v34, %v6249_v47  ;;  %v7884_v63 = vld [vmem:[#allocation72_spill] sm:$0xff]  ;;  %7885 = vst [vmem:[#allocation67_spill] sm:$0xff] %v6428_v2  ;;  %7886 = vst [vmem:[#allocation52_spill] sm:$0xff] %v6430_v29  ;;  %v6433_v53 = vpop.eup %4072 }
 0x249   : > { %v2611_v61 = vadd.f32 %v6400_v34, %v2610_v6  ;;  %v2750_v18 = vadd.f32 %v2749_v30, %v2654_v23  ;;  %3212 = vadd.xlane.f32.xlu1 %v7884_v63  ;;  %3839 = vmatprep.subr.msk.mxu1 %vm2023_vm5, %v7588_v19  ;;  %7887 = vst [vmem:[#allocation54_spill] sm:$0xff] %v6433_v53  ;;  %v2505_v6 = vmul.f32 1.442695, %v6329_v45  ;;  %v7889_v48 = vld [vmem:[#allocation40_spill] sm:$0xff]  ;;  %4086 = vpow2.f32 %v2497_v14 }
 0x24a   : > { %v7888_v25 = vsub.f32 %v5713_v62, %v7823_v10  ;;  %v3021_v47 = vadd.f32 %v3020_v21, %v7889_v48  ;;  %vm2022_vm6 = vcmp.eq.f32.partialorder %v7883_v58, %v7881_v41  ;;  %v2658_v30 = vmul.f32 %v6415_v40, %v6260_v1  ;;  %v7891_v21 = vld [vmem:[#allocation79_spill] sm:$0xff]  ;;  %v7894_v48 = vld [vmem:[#allocation50_spill] sm:$0xff] }
 0x24b   : > { %v2612_v23 = vadd.f32 %v6415_v40, %v2611_v61  ;;  %v2751_v63 = vadd.f32 %v2750_v18, %v2656_v39  ;;  %3840 = vmatpush1.msk.msra.mxu1 %vm2022_vm6, %v7588_v19  ;;  %v6448_v29 = vpop.eup %4074  ;;  %4088 = vpow2.f32 %v2501_v17  ;;  %v2509_v10 = vmul.f32 1.442695, %v6331_v57 }
 0x24c   : > { %v6438_v26 = vmul.f32 100.0, %v7888_v25  ;;  %v7890_v25 = vld [vmem:[#allocation111_spill] sm:$0xff]  ;;  %vm2021_vm9 = vcmp.eq.f32.partialorder %v7891_v21, %v6369_v12  ;;  %v2660_v58 = vmul.f32 %v6433_v53, %v6269_v50  ;;  %vm2020_vm10 = vcmp.eq.f32.partialorder %v7891_v21, %v7881_v41  ;;  %v6460_v1 = vpop.eup %4076  ;;  %v7895_v50 = vld [vmem:[#allocation78_spill] sm:$0xff] }
 0x24d   : > { %v3022_v2 = vadd.f32 %v3021_v47, %v7890_v25  ;;  %v2613_v14 = vadd.f32 %v6433_v53, %v2612_v23  ;;  %v2752_v61 = vadd.f32 %v2751_v63, %v2658_v30  ;;  %3841 = vmatprep.subr.msk.mxu1 %vm2021_vm9, %v7588_v19  ;;  %7892 = vst [vmem:[#allocation30_spill] sm:$0xff] %v6460_v1  ;;  %v2513_v18 = vmul.f32 1.442695, %v6338_v15  ;;  %v6475_v25 = vpop.xlane.xlu0 %2982  ;;  %v6480_v21 = vpop.eup %4078 }
 0x24e   : > { %v7893_v17 = vsub.f32 %v5713_v62, %v7826_v4  ;;  %3842 = vmatpush1.msk.msra.mxu1 %vm2020_vm10, %v7588_v19  ;;  %vm2019_vm11 = vcmp.eq.f32.partialorder %v7895_v50, %v6369_v12  ;;  %4090 = vpow2.f32 %v2505_v6  ;;  %v2662_v30 = vmul.f32 %v6448_v29, %v6277_v8  ;;  %v6477_v4 = vpop.xlane.xlu1 %2991  ;;  %7896 = vst [vmem:[#allocation38_spill] sm:$0xff] %v6480_v21  ;;  %v7899_v8 = vld [vmem:[#allocation134_spill] sm:$0xff] }
 0x24f   : > { %v3023_v47 = vadd.f32 %v3022_v2, %v7894_v48  ;;  %v2614_v23 = vadd.f32 %v6448_v29, %v2613_v14  ;;  %v2753_v63 = vadd.f32 %v2752_v61, %v2660_v58  ;;  %3843 = vmatprep.subr.msk.mxu1 %vm2019_vm11, %v7588_v19  ;;  %v7897_v2 = vsub.f32 %v5713_v62, %v7827_v59 }
 0x250   : > { %v6465_v39 = vmul.f32 100.0, %v7893_v17  ;;  %v7898_v6 = vsub.f32 %v5713_v62, %v7829_v36  ;;  %vm2018_vm12 = vcmp.eq.f32.partialorder %v7895_v50, %v7881_v41  ;;  %4092 = vpow2.f32 %v2509_v10  ;;  %v7904_v10 = vld [vmem:[#allocation77_spill] sm:$0xff] }
 0x251   : > { %v6485_v17 = vmul.f32 100.0, %v7897_v2  ;;  %v3024_v58 = vadd.f32 %v3023_v47, %v7899_v8  ;;  %v2615_v61 = vadd.f32 %v6460_v1, %v2614_v23  ;;  %v2664_v48 = vmul.f32 %v6460_v1, %v6292_v32  ;;  %v6499_v2 = vpop.eup %4080  ;;  %v7903_v8 = vld [vmem:[#allocation112_spill] sm:$0xff] }
 0x252   : > { %v6490_v14 = vmul.f32 100.0, %v7898_v6  ;;  %v2754_v19 = vadd.f32 %v2753_v63, %v2662_v30  ;;  %v7900_v59 = vmov 1.0   ;;  %7901 = vst [vmem:[#allocation61_spill] sm:$0xff] %v6499_v2  ;;  %v7902_v36 = vsub.f32 %v5713_v62, %v7833_v0  ;;  %v6514_v63 = vpop.eup %4082 }
 0x253   : > { %3844 = vmatpush1.msk.msra.mxu1 %vm2018_vm12, %v7900_v59  ;;  %v2517_v47 = vmul.f32 1.442695, %v6340_v55  ;;  %v3025_v50 = vadd.f32 %v3024_v58, %v7903_v8  ;;  %vm2017_vm13 = vcmp.eq.f32.partialorder %v7904_v10, %v6369_v12  ;;  %4094 = vpow2.f32 %v2513_v18  ;;  %7905 = vst [vmem:[#allocation102_spill] sm:$0xff] %v6514_v63 }
 0x254   : > { %v6504_v6 = vmul.f32 100.0, %v7902_v36  ;;  %v2616_v32 = vadd.f32 %v6480_v21, %v2615_v61  ;;  %v2666_v23 = vmul.f32 %v6480_v21, %v6300_v51  ;;  %v2755_v30 = vadd.f32 %v2754_v19, %v2664_v48  ;;  %3845 = vmatprep.subr.msk.mxu1 %vm2017_vm13, %v7900_v59  ;;  %v7906_v36 = vld [vmem:[#allocation24_spill] sm:$0xff]  ;;  %v6527_v61 = vpop.xlane.xlu0 %3191  ;;  %v6529_v48 = vpop.xlane.xlu1 %3200 }
 0x255   : > { %v6518_v0 = vadd.f32 %v6193_v16, %v6418_v33  ;;  %v2521_v58 = vmul.f32 1.442695, %v6342_v11  ;;  %v3026_v8 = vadd.f32 %v3025_v50, %v7906_v36  ;;  %vm2016_vm14 = vcmp.eq.f32.partialorder %v7904_v10, %v7881_v41  ;;  %7907 = vst [vmem:[#allocation81_spill] sm:$0xff] %v6527_v61  ;;  %7908 = vst [vmem:[#allocation32_spill] sm:$0xff] %v6529_v48  ;;  %v7909_v33 = vld [vmem:[#allocation76_spill] sm:$0xff]  ;;  %v6534_v1 = vpop.eup %4084  ;;  %v7911_v10 = vld [vmem:[#allocation135_spill] sm:$0xff] }
 0x256   : > { %v2617_v18 = vadd.f32 %v6499_v2, %v2616_v32  ;;  %v2668_v51 = vmul.f32 %v6499_v2, %v6302_v7  ;;  %v2756_v19 = vadd.f32 %v2755_v30, %v2666_v23  ;;  %3846 = vmatpush1.msk.msra.mxu1 %vm2016_vm14, %v7900_v59  ;;  %vm2015_vm15 = vcmp.eq.f32.partialorder %v7909_v33, %v6369_v12  ;;  %v7912_v36 = vld [vmem:[#allocation75_spill] sm:$0xff] }
 0x257   : > { %7910 = vst [vmem:[#allocation23_spill] sm:$0xff] %v6534_v1  ;;  %4096 = vpow2.f32 %v2517_v47  ;;  %v2525_v50 = vmul.f32 1.442695, %v6345_v43  ;;  %v3027_v32 = vadd.f32 %v3026_v8, %v7911_v10  ;;  %3847 = vmatprep.subr.msk.mxu1 %vm2015_vm15, %v7900_v59  ;;  %vm2014_vm0 = vcmp.eq.f32.partialorder %v7909_v33, %v7881_v41  ;;  %v6547_v47 = vpop.eup %4086  ;;  %v7914_v10 = vld [vmem:[#allocation41_spill] sm:$0xff] }
 0x258   : > { %v2618_v7 = vadd.f32 %v6514_v63, %v2617_v18  ;;  %v2670_v23 = vmul.f32 %v6514_v63, %v6308_v27  ;;  %v2757_v30 = vadd.f32 %v2756_v19, %v2668_v51  ;;  %3848 = vmatpush1.msk.msra.mxu1 %vm2014_vm0, %v7900_v59  ;;  %vm2013_vm1 = vcmp.eq.f32.partialorder %v7912_v36, %v6369_v12  ;;  %v6554_v18 = vpop.eup %4088 }
 0x259   : > { %7913 = vst [vmem:[#allocation48_spill] sm:$0xff] %v6547_v47  ;;  %4098 = vpow2.f32 %v2521_v58  ;;  %v2529_v8 = vmul.f32 1.442695, %v6351_v22  ;;  %v3028_v48 = vadd.f32 %v3027_v32, %v7914_v10  ;;  %3849 = vmatprep.subr.msk.mxu1 %vm2013_vm1, %v7900_v59  ;;  %vm2012_vm2 = vcmp.eq.f32.partialorder %v7912_v36, %v7881_v41  ;;  %7915 = vst [vmem:[#allocation80_spill] sm:$0xff] %v6554_v18  ;;  %v7916_v58 = vld [vmem:[#allocation74_spill] sm:$0xff]  ;;  %v7917_v32 = vld [vmem:[#allocation25_spill] sm:$0xff]  ;;  %v6572_v36 = vpop.xlane.xlu1 %3203 }
 0x25a   : > { %v2619_v27 = vadd.f32 %v6534_v1, %v2618_v7  ;;  %v2672_v51 = vmul.f32 %v6534_v1, %v6314_v49  ;;  %v2758_v19 = vadd.f32 %v2757_v30, %v2670_v23  ;;  %3850 = vmatpush1.msk.msra.mxu1 %vm2012_vm2, %v7900_v59  ;;  %vm2011_vm7 = vcmp.eq.f32.partialorder %v7916_v58, %v6369_v12  ;;  %v6570_v30 = vpop.xlane.xlu0 %2988 }
 0x25b   : > { %4100 = vpow2.f32 %v2525_v50  ;;  %v2533_v33 = vmul.f32 1.442695, %v6353_v52  ;;  %v3029_v10 = vadd.f32 %v3028_v48, %v7917_v32  ;;  %3851 = vmatprep.subr.msk.mxu1 %vm2011_vm7, %v7900_v59  ;;  %vm2010_vm8 = vcmp.eq.f32.partialorder %v7916_v58, %v7881_v41  ;;  %7918 = vst [vmem:[#allocation72_spill] sm:$0xff] %v6572_v36  ;;  %v7919_v50 = vld [vmem:[#allocation73_spill] sm:$0xff]  ;;  %v6577_v48 = vpop.eup %4090  ;;  %v7921_v32 = vld [vmem:[#allocation70_spill] sm:$0xff] }
 0x25c   : > { %v2620_v7 = vadd.f32 %v6547_v47, %v2619_v27  ;;  %v2674_v49 = vmul.f32 %v6547_v47, %v6319_v24  ;;  %v2759_v23 = vadd.f32 %v2758_v19, %v2672_v51  ;;  %3852 = vmatpush1.msk.msra.mxu1 %vm2010_vm8, %v7900_v59  ;;  %vm2009_vm3 = vcmp.eq.f32.partialorder %v7919_v50, %v6369_v12 }
 0x25d   : > { %7920 = vst [vmem:[#allocation40_spill] sm:$0xff] %v6577_v48  ;;  %4102 = vpow2.f32 %v2529_v8  ;;  %v2537_v58 = vmul.f32 1.442695, %v6390_v20  ;;  %v3030_v27 = vadd.f32 %v3029_v10, %v6212_v31  ;;  %3853 = vmatprep.subr.msk.mxu1 %vm2009_vm3, %v7900_v59  ;;  %vm2008_vm4 = vcmp.eq.f32.partialorder %v7919_v50, %v7881_v41  ;;  %v6590_v8 = vpop.eup %4092  ;;  %v7923_v10 = vld [vmem:[#allocation43_spill] sm:$0xff] }
 0x25e   : > { %v2621_v24 = vadd.f32 %v6554_v18, %v2620_v7  ;;  %v2676_v51 = vmul.f32 %v6554_v18, %v6324_v56  ;;  %v2760_v19 = vadd.f32 %v2759_v23, %v2674_v49  ;;  %3854 = vmatpush1.msk.msra.mxu1 %vm2008_vm4, %v7900_v59  ;;  %vm2007_vm5 = vcmp.eq.f32.partialorder %v7921_v32, %v6369_v12  ;;  %v7924_v23 = vld [vmem:[#allocation69_spill] sm:$0xff] }
 0x25f   : > { %7922 = vst [vmem:[#allocation111_spill] sm:$0xff] %v6590_v8  ;;  %4104 = vpow2.f32 %v2533_v33  ;;  %v2541_v31 = vmul.f32 1.442695, %v6405_v42  ;;  %v3031_v36 = vadd.f32 %v3030_v27, %v7923_v10  ;;  %3855 = vmatprep.subr.msk.mxu1 %vm2007_vm5, %v7900_v59  ;;  %vm2006_vm6 = vcmp.eq.f32.partialorder %v7921_v32, %v7881_v41  ;;  %v6615_v32 = vpop.xlane.xlu1 %2997 }
 0x260   : > { %v2622_v56 = vadd.f32 %v6577_v48, %v2621_v24  ;;  %v2678_v7 = vmul.f32 %v6577_v48, %v6329_v45  ;;  %v2761_v49 = vadd.f32 %v2760_v19, %v2676_v51  ;;  %3856 = vmatpush1.msk.msra.mxu1 %vm2006_vm6, %v7900_v59  ;;  %vm2005_vm9 = vcmp.eq.f32.partialorder %v7924_v23, %v6369_v12  ;;  %v6603_v33 = vpop.eup %4094  ;;  %v6613_v19 = vpop.xlane.xlu0 %3197 }
 0x261   : > { %7925 = vst [vmem:[#allocation79_spill] sm:$0xff] %v6603_v33  ;;  %4106 = vpow2.f32 %v2537_v58  ;;  %v2545_v50 = vmul.f32 1.442695, %v6438_v26  ;;  %v3032_v27 = vadd.f32 %v3031_v36, %v6280_v60  ;;  %3857 = vmatprep.subr.msk.mxu1 %vm2005_vm9, %v7900_v59  ;;  %vm2004_vm10 = vcmp.eq.f32.partialorder %v7924_v23, %v7881_v41  ;;  %7926 = vst [vmem:[#allocation50_spill] sm:$0xff] %v6613_v19  ;;  %v7927_v58 = vld [vmem:[#allocation68_spill] sm:$0xff] }
 0x262   : > { %v2623_v45 = vadd.f32 %v6590_v8, %v2622_v56  ;;  %v2680_v24 = vmul.f32 %v6590_v8, %v6331_v57  ;;  %v2762_v51 = vadd.f32 %v2761_v49, %v2678_v7  ;;  %3858 = vmatpush1.msk.msra.mxu1 %vm2004_vm10, %v7900_v59  ;;  %vm2003_vm11 = vcmp.eq.f32.partialorder %v7927_v58, %v6369_v12  ;;  %v7942_v19 = vld [vmem:[#allocation116_spill] sm:$0xff]  ;;  %v7946_v8 = vld [vmem:[#allocation119_spill] sm:$0xff] }
 0x263   : > { %4108 = vpow2.f32 %v2541_v31  ;;  %v2549_v60 = vmul.f32 1.442695, %v6465_v39  ;;  %v3033_v36 = vadd.f32 %v3032_v27, %v6214_v54  ;;  %3859 = vmatprep.subr.msk.mxu1 %vm2003_vm11, %v7900_v59  ;;  %vm2002_vm12 = vcmp.eq.f32.partialorder %v7927_v58, %v7881_v41  ;;  %v7929_v31 = vld [vmem:[#allocation91_spill] sm:$0xff] }
 0x264   : > { %v6625_v57 = vpop.eup %4096  ;;  %v2624_v10 = vadd.f32 %v6603_v33, %v2623_v45  ;;  %v2682_v56 = vmul.f32 %v6603_v33, %v6338_v15  ;;  %v2763_v7 = vadd.f32 %v2762_v51, %v2680_v24  ;;  %3860 = vmatpush1.msk.msra.mxu1 %vm2002_vm12, %v7900_v59  ;;  %vm2001_vm13 = vcmp.eq.f32.partialorder %v7929_v31, %v6369_v12  ;;  %v7947_v33 = vld [vmem:[#allocation35_spill] sm:$0xff] }
 0x265   : > { %7928 = vst [vmem:[#allocation78_spill] sm:$0xff] %v6625_v57  ;;  %v7930_v54 = vsub.f32 %v5713_v62, %v7834_v37  ;;  %v2553_v23 = vmul.f32 1.442695, %v6485_v17  ;;  %v3034_v27 = vadd.f32 %v3033_v36, %v6381_v46  ;;  %3861 = vmatprep.subr.msk.mxu1 %vm2001_vm13, %v7900_v59  ;;  %vm2000_vm14 = vcmp.eq.f32.partialorder %v7929_v31, %v7881_v41  ;;  %v7932_v37 = vld [vmem:[#allocation90_spill] sm:$0xff] }
 0x266   : > { %v6643_v15 = vpop.eup %4098  ;;  %4110 = vpow2.f32 %v2545_v50  ;;  %v2625_v45 = vadd.f32 %v6625_v57, %v2624_v10  ;;  %v6646_v24 = vadd.f32 %v2763_v7, %v2682_v56  ;;  %3862 = vmatpush1.msk.msra.mxu1 %vm2000_vm14, %v7900_v59  ;;  %vm1999_vm15 = vcmp.eq.f32.partialorder %v7932_v37, %v6369_v12  ;;  %v7933_v50 = vld [vmem:[#allocation100_spill] sm:$0xff]  ;;  %v2995_v56 = vpop.xlane.xlu0 %2994 }
 0x267   : > { %v6636_v49 = vmul.f32 100.0, %v7930_v54  ;;  %7931 = vst [vmem:[#allocation134_spill] sm:$0xff] %v6643_v15  ;;  %v2602_v51 = vrot.slane %v6518_v0, 4  ;;  %v3035_v46 = vadd.f32 %v3034_v27, %v6282_v38  ;;  %3863 = vmatprep.subr.msk.mxu1 %vm1999_vm15, %v7900_v59  ;;  %vm1998_vm0 = vcmp.eq.f32.partialorder %v7932_v37, %v7881_v41  ;;  %v6662_v7 = vpop.xlane.xlu1 %3206  ;;  %v7935_v38 = vld [vmem:[#allocation89_spill] sm:$0xff] }
 0x268   : > { %vm2052_vm1 = vcmp.eq.f32.partialorder %v7933_v50, %v7881_v41  ;;  %v6658_v58 = vpop.eup %4100  ;;  %4112 = vpow2.f32 %v2549_v60  ;;  %v2557_v36 = vmul.f32 1.442695, %v6490_v14  ;;  %v2626_v10 = vadd.f32 %v6643_v15, %v2625_v45  ;;  %7934 = vst [vmem:[#allocation112_spill] sm:$0xff] %v6662_v7  ;;  %3864 = vmatpush1.msk.msra.mxu1 %vm1998_vm0, %v7900_v59 }
 0x269   : > { %vm1997_vm2 = vcmp.eq.f32.partialorder %v7935_v38, %v6369_v12  ;;  %v7936_v31 = vsub.f32 %v5713_v62, %v7835_v3  ;;  %v3036_v27 = vadd.f32 %v3035_v46, %v6475_v25  ;;  %vm1996_vm7 = vcmp.eq.f32.partialorder %v7935_v38, %v7881_v41  ;;  %v7937_v62 = vld [vmem:[#allocation88_spill] sm:$0xff] }
 0x26a   : > { %3865 = vmatprep.subr.msk.mxu1 %vm1997_vm2, %v7900_v59  ;;  %v6676_v60 = vpop.eup %4102  ;;  %4114 = vpow2.f32 %v2553_v23  ;;  %v2561_v45 = vmul.f32 1.442695, %v6504_v6  ;;  %v2627_v37 = vadd.f32 %v6658_v58, %v2626_v10  ;;  %vm1995_vm8 = vcmp.eq.f32.partialorder %v7937_v62, %v6369_v12  ;;  %v3001_v38 = vpop.xlane.xlu0 %3000 }
 0x26b   : > { %v6670_v54 = vmul.f32 100.0, %v7936_v31  ;;  %3866 = vmatpush1.msk.msra.mxu1 %vm1996_vm7, %v7900_v59  ;;  %v2603_v3 = vadd.f32 %v2602_v51, %v6518_v0  ;;  %v3037_v25 = vadd.f32 %v3036_v27, %v6383_v44  ;;  %vm1994_vm3 = vcmp.eq.f32.partialorder %v7937_v62, %v7881_v41  ;;  %v7938_v31 = vld [vmem:[#allocation103_spill] sm:$0xff]  ;;  %v3004_v27 = vpop.xlane.xlu1 %3003  ;;  %v7940_v62 = vld [vmem:[#allocation114_spill] sm:$0xff] }
 0x26c   : > { %3867 = vmatprep.subr.msk.mxu1 %vm1995_vm8, %v7900_v59  ;;  %v6688_v46 = vpop.eup %4104  ;;  %4116 = vpow2.f32 %v2557_v36  ;;  %v2565_v23 = vmul.f32 1.442695, %v6636_v49  ;;  %v2628_v10 = vadd.f32 %v6676_v60, %v2627_v37  ;;  %vm2057_vm4 = vcmp.eq.f32.partialorder %v7938_v31, %v6369_v12  ;;  %v7939_v37 = vld [vmem:[#allocation101_spill] sm:$0xff] }
 0x26d   : > { %3868 = vmatpush1.msk.msra.mxu1 %vm1994_vm3, %v7900_v59  ;;  %v3038_v44 = vadd.f32 %v3037_v25, %v6570_v30  ;;  %vm2056_vm5 = vcmp.eq.f32.partialorder %v7938_v31, %v7881_v41  ;;  %4118 = vpow2.f32 %v2561_v45  ;;  %v2569_v51 = vmul.f32 1.442695, %v6670_v54  ;;  %v7941_v30 = vld [vmem:[#allocation26_spill] sm:$0xff] }
 0x26e   : > { %3869 = vmatprep.subr.msk.mxu1 %vm2057_vm4, %v7900_v59  ;;  %v6699_v0 = vpop.eup %4106  ;;  %v2629_v36 = vadd.f32 %v6688_v46, %v2628_v10  ;;  %vm2055_vm6 = vcmp.eq.f32.partialorder %v7939_v37, %v6369_v12  ;;  %v2683_v25 = vmul.f32 %v7941_v30, %v7940_v62  ;;  %vm2054_vm9 = vcmp.eq.f32.partialorder %v7939_v37, %v7881_v41  ;;  %v7943_v62 = vld [vmem:[#allocation27_spill] sm:$0xff]  ;;  %v6732_v47 = vpop.xlane.xlu0 %3209 }
 0x26f   : > { %3870 = vmatpush2.msk.msra.mxu1 %vm2056_vm5, %v7900_v59  ;;  %v3039_v7 = vadd.f32 %v3038_v44, %v6477_v4  ;;  %v2604_v31 = vrot.slane %v2603_v3, 2  ;;  %4120 = vpow2.f32 %v2565_v23  ;;  %vm2053_vm10 = vcmp.eq.f32.partialorder %v7933_v50, %v6369_v12  ;;  %v7944_v4 = vld [vmem:[#allocation117_spill] sm:$0xff]  ;;  %v7948_v23 = vld [vmem:[#allocation120_spill] sm:$0xff]  ;;  %7950 = vst [vmem:[#allocation77_spill] sm:$0xff] %v6732_v47  ;;  %v7955_v47 = vld [vmem:[#allocation126_spill] sm:$0xff]  ;;  %v3010_v2 = vpop.xlane.xlu1 %3009 }
 0x270   : > { %3871 = vmatprep.subr.msk.mxu1 %vm2055_vm6, %v7900_v59  ;;  %v6712_v45 = vpop.eup %4108  ;;  %v2630_v10 = vadd.f32 %v6699_v0, %v2629_v36  ;;  %v2685_v61 = vmul.f32 %v7943_v62, %v7942_v19  ;;  %v7945_v44 = vld [vmem:[#allocation33_spill] sm:$0xff]  ;;  %v6724_v37 = vmul.f32 %v7947_v33, %v7946_v8  ;;  %4122 = vpow2.f32 %v2569_v51  ;;  %v7951_v8 = vld [vmem:[#allocation99_spill] sm:$0xff] }
 0x271   : > { %3872 = vmatpush2.msk.msra.mxu1 %vm2054_vm9, %v7900_v59  ;;  %v2687_v30 = vmul.f32 %v7945_v44, %v7944_v4  ;;  %v3040_v18 = vadd.f32 %v3039_v7, %v2995_v56  ;;  %v7949_v36 = vld [vmem:[#allocation37_spill] sm:$0xff]  ;;  %vm2051_vm11 = vcmp.eq.f32.partialorder %v7951_v8, %v6369_v12  ;;  %v7953_v7 = vld [vmem:[#allocation39_spill] sm:$0xff]  ;;  %vm2050_vm12 = vcmp.eq.f32.partialorder %v7951_v8, %v7881_v41 }
 0x272   : > { %3873 = vmatprep.subr.msk.mxu1 %vm2053_vm10, %v7900_v59  ;;  %v6729_v48 = vmul.f32 %v7949_v36, %v7948_v23  ;;  %v2631_v1 = vadd.f32 %v6712_v45, %v2630_v10  ;;  %v7952_v56 = vld [vmem:[#allocation121_spill] sm:$0xff]  ;;  %v6754_v50 = vadd.f32 %v2604_v31, %v2603_v3  ;;  %v6758_v62 = vmul.f32 %v6101_v28, %v7955_v47  ;;  %v7959_v47 = vld [vmem:[#allocation44_spill] sm:$0xff] }
 0x273   : > { %3874 = vmatpush2.msk.msra.mxu1 %vm2052_vm1, %v7900_v59  ;;  %v6740_v19 = vpop.eup %4110  ;;  %v6744_v4 = vmul.f32 %v7953_v7, %v7952_v56  ;;  %v7954_v23 = vld [vmem:[#allocation125_spill] sm:$0xff]  ;;  %v3041_v10 = vadd.f32 %v3040_v18, %v6615_v32  ;;  %v7957_v32 = vld [vmem:[#allocation127_spill] sm:$0xff]  ;;  %v2684_v3 = vmul.f32 %v6625_v57, %v6340_v55  ;;  %v2686_v53 = vmul.f32 %v6643_v15, %v6342_v11  ;;  %v3007_v15 = vpop.xlane.xlu0 %3006 }
 0x274   : > { %v6748_v51 = vmul.f32 %v6081_v9, %v7954_v23  ;;  %3875 = vmatprep.subr.msk.mxu1 %vm2051_vm11, %v7900_v59  ;;  %v2632_v56 = vadd.f32 %v6740_v19, %v2631_v1  ;;  %v7956_v23 = vld [vmem:[#allocation98_spill] sm:$0xff]  ;;  %v6768_v63 = vmul.f32 %v6115_v35, %v7957_v32  ;;  %v7958_v1 = vld [vmem:[#allocation129_spill] sm:$0xff]  ;;  %v7960_v32 = vld [vmem:[#allocation96_spill] sm:$0xff]  ;;  %v2688_v57 = vmul.f32 %v6658_v58, %v6345_v43 }
 0x275   : > { %3876 = vmatpush2.msk.msra.mxu1 %vm2050_vm12, %v7900_v59  ;;  %vm2049_vm13 = vcmp.eq.f32.partialorder %v7956_v23, %v6369_v12  ;;  %v6764_v18 = vpop.eup %4112  ;;  %v3042_v31 = vadd.f32 %v3041_v10, %v3001_v38  ;;  %vm2048_vm14 = vcmp.eq.f32.partialorder %v7956_v23, %v7881_v41  ;;  %v6777_v8 = vmul.f32 %v7959_v47, %v7958_v1  ;;  %v7961_v10 = vld [vmem:[#allocation28_spill] sm:$0xff] }
 0x276   : > { %3877 = vmatprep.subr.msk.mxu1 %vm2049_vm13, %v7900_v59  ;;  %v2633_v21 = vadd.f32 %v6764_v18, %v2632_v56  ;;  %vm2047_vm15 = vcmp.eq.f32.partialorder %v7960_v32, %v6369_v12  ;;  %vm2046_vm0 = vcmp.eq.f32.partialorder %v7960_v32, %v7881_v41  ;;  %v2728_v23 = vadd.f32 %v7961_v10, %v2683_v25  ;;  %v3013_v10 = vpop.xlane.xlu1 %3012 }
 0x277   : > { %3878 = vmatpush2.msk.msra.mxu1 %vm2048_vm14, %v7900_v59  ;;  %v6785_v55 = vpop.eup %4114  ;;  %v3043_v38 = vadd.f32 %v3042_v31, %v3004_v27  ;;  %v2765_v56 = vadd.f32 %v6646_v24, %v2684_v3  ;;  %v7962_v27 = vld [vmem:[#allocation95_spill] sm:$0xff]  ;;  %v2690_v43 = vmul.f32 %v6676_v60, %v6351_v22  ;;  %v2692_v3 = vmul.f32 %v6688_v46, %v6353_v52 }
 0x278   : > { %3879 = vmatprep.subr.msk.mxu1 %vm2047_vm15, %v7900_v59  ;;  %v2634_v11 = vadd.f32 %v6785_v55, %v2633_v21  ;;  %vm2045_vm1 = vcmp.eq.f32.partialorder %v7962_v27, %v6369_v12  ;;  %vm2044_vm2 = vcmp.eq.f32.partialorder %v7962_v27, %v7881_v41  ;;  %v2729_v24 = vadd.f32 %v2728_v23, %v2685_v61  ;;  %v7964_v23 = vld [vmem:[#allocation93_spill] sm:$0xff] }
 0x279   : > { %3880 = vmatpush2.msk.msra.mxu1 %vm2046_vm0, %v7900_v59  ;;  %v6799_v31 = vpop.eup %4116  ;;  %v3044_v32 = vadd.f32 %v3043_v38, %v3007_v15  ;;  %v2766_v25 = vadd.f32 %v2765_v56, %v2686_v53  ;;  %v7963_v15 = vld [vmem:[#allocation94_spill] sm:$0xff]  ;;  %v2694_v52 = vmul.f32 %v6699_v0, %v6390_v20  ;;  %vm2041_vm3 = vcmp.eq.f32.partialorder %v7964_v23, %v6369_v12 }
 0x27a   : > { %3881 = vmatprep.subr.msk.mxu1 %vm2045_vm1, %v7900_v59  ;;  %v2635_v21 = vadd.f32 %v6799_v31, %v2634_v11  ;;  %vm2043_vm7 = vcmp.eq.f32.partialorder %v7963_v15, %v6369_v12  ;;  %v6812_v38 = vpop.eup %4118  ;;  %vm2042_vm8 = vcmp.eq.f32.partialorder %v7963_v15, %v7881_v41  ;;  %v2730_v53 = vadd.f32 %v2729_v24, %v2687_v30  ;;  %v7966_v24 = vld [vmem:[#allocation87_spill] sm:$0xff] }
 0x27b   : > { %3882 = vmatpush2.msk.msra.mxu1 %vm2044_vm2, %v7900_v59  ;;  %v3045_v1 = vadd.f32 %v3044_v32, %v3010_v2  ;;  %v2767_v61 = vadd.f32 %v2766_v25, %v2688_v57  ;;  %vm2040_vm4 = vcmp.eq.f32.partialorder %v7964_v23, %v7881_v41  ;;  %v7965_v57 = vld [vmem:[#allocation92_spill] sm:$0xff]  ;;  %v3926_v27 = vtrunc.f32 %v7881_v41  ;;  %v7967_v23 = vld [vmem:[#allocation86_spill] sm:$0xff] }
 0x27c   : > { %3883 = vmatprep.subr.msk.mxu1 %vm2043_vm7, %v7900_v59  ;;  %v2636_v22 = vadd.f32 %v6812_v38, %v2635_v21  ;;  %v6825_v2 = vpop.eup %4120  ;;  %vm2039_vm5 = vcmp.eq.f32.partialorder %v7965_v57, %v6369_v12  ;;  %v2731_v30 = vadd.f32 %v2730_v53, %v6724_v37  ;;  %vm2038_vm6 = vcmp.eq.f32.partialorder %v7965_v57, %v7881_v41 }
 0x27d   : > { %3884 = vmatpush2.msk.msra.mxu1 %vm2042_vm8, %v7900_v59  ;;  %v6827_v56 = vadd.f32 %v3045_v1, %v3013_v10  ;;  %v2768_v20 = vadd.f32 %v2767_v61, %v2690_v43  ;;  %v3928_v1 = vtrunc.f32 %v6369_v12  ;;  %v6839_v32 = vpop.eup %4122  ;;  %vm2037_vm9 = vcmp.eq.f32.partialorder %v7966_v24, %v6369_v12 }
 0x27e   : > { %3885 = vmatprep.subr.msk.mxu1 %vm2041_vm3, %v7900_v59  ;;  %v2637_v11 = vadd.f32 %v6825_v2, %v2636_v22  ;;  %v2732_v37 = vadd.f32 %v2731_v30, %v6729_v48  ;;  %v3927_v43 = vcvt.f32.s32 %v3926_v27  ;;  %v4212_v15 = vmov 1966171168  }
 0x27f   : > { %3886 = vmatpush2.msk.msra.mxu1 %vm2040_vm4, %v7900_v59  ;;  %v2769_v25 = vadd.f32 %v2768_v20, %v2692_v3  ;;  %v3929_v10 = vcvt.f32.s32 %v3928_v1  ;;  %v1976_v53 = vunpack.c.l.s4 %v4212_v15  ;;  %v2696_v61 = vmul.f32 %v6712_v45, %v6405_v42  ;;  %v7969_v1 = vld [vmem:[#allocation85_spill] sm:$0xff] }
 0x280   : > { %3887 = vmatprep.subr.msk.mxu1 %vm2039_vm5, %v7900_v59  ;;  %v2638_v21 = vadd.f32 %v6839_v32, %v2637_v11  ;;  %vm2036_vm10 = vcmp.eq.f32.partialorder %v7966_v24, %v7881_v41  ;;  %v2733_v22 = vadd.f32 %v2732_v37, %v6744_v4  ;;  %vm2035_vm11 = vcmp.eq.f32.partialorder %v7967_v23, %v6369_v12 }
 0x281   : > { %3888 = vmatpush2.msk.msra.mxu1 %vm2038_vm6, %v7900_v59  ;;  %v2770_v48 = vadd.f32 %v2769_v25, %v2694_v52  ;;  %v1974_v57 = vcombine.low %v3927_v43, %v3929_v10  ;;  %v1977_v30 = vunpack.c.0.s8 %v1976_v53  ;;  %v2698_v42 = vmul.f32 %v6740_v19, %v6438_v26  ;;  %v7970_v26 = vld [vmem:[#allocation66_spill] sm:$0xff]  ;;  %v7971_v43 = vld [vmem:[#allocation84_spill] sm:$0xff] }
 0x282   : > { %3889 = vmatprep.subr.msk.mxu1 %vm2037_vm9, %v7900_v59  ;;  %v2639_v3 = vrot.slane %v2638_v21, 4  ;;  %vm2034_vm12 = vcmp.eq.f32.partialorder %v7967_v23, %v7881_v41  ;;  %v2734_v4 = vadd.f32 %v2733_v22, %v6748_v51  ;;  %v7968_v20 = vrot.slane %v6754_v50, 1 }
 0x283   : > { %3890 = vmatpush2.msk.msra.mxu1 %vm2036_vm10, %v7900_v59  ;;  %v2771_v52 = vadd.f32 %v2770_v48, %v2696_v61  ;;  %vm2033_vm13 = vcmp.eq.f32.partialorder %v7969_v1, %v6369_v12  ;;  %v1980_v24 = vsub.s32 %v1977_v30, %v7970_v26  ;;  %v2700_v51 = vmul.f32 %v6764_v18, %v6465_v39  ;;  %v7976_v61 = vld [vmem:[#allocation46_spill] sm:$0xff] }
 0x284   : > { %3891 = vmatprep.subr.msk.mxu1 %vm2035_vm11, %v7900_v59  ;;  %v6866_v11 = vadd.f32 %v7968_v20, %v6754_v50  ;;  %v2640_v27 = vadd.f32 %v2639_v3, %v2638_v21  ;;  %vm2032_vm14 = vcmp.eq.f32.partialorder %v7969_v1, %v7881_v41  ;;  %v2735_v50 = vadd.f32 %v2734_v4, %v6758_v62  ;;  %v7977_v3 = vld [vmem:[#allocation83_spill] sm:$0xff] }
 0x285   : > { %3892 = vmatpush2.msk.msra.mxu1 %vm2034_vm12, %v7900_v59  ;;  %v2772_v37 = vadd.f32 %v2771_v52, %v2698_v42  ;;  %v2702_v21 = vmul.f32 %v6785_v55, %v6485_v17  ;;  %vm2031_vm15 = vcmp.eq.f32.partialorder %v7971_v43, %v6369_v12  ;;  %v1981_v10 = vrot.slane %v1974_v57, %v1980_v24  ;;  %v7975_v17 = vld [vmem:[#allocation130_spill] sm:$0xff]  ;;  %v7978_v42 = vld [vmem:[#allocation131_spill] sm:$0xff] }
 0x286   : > { %3893 = vmatprep.subr.msk.mxu1 %vm2033_vm13, %v7900_v59  ;;  %v2641_v25 = vrot.slane %v2640_v27, 2  ;;  %vm2030_vm0 = vcmp.eq.f32.partialorder %v7971_v43, %v7881_v41  ;;  %v2736_v39 = vadd.f32 %v2735_v50, %v6768_v63  ;;  %v7972_v62 = vlaneseq  ;;  %v7979_v4 = vld [vmem:[#allocation51_spill] sm:$0xff] }
 0x287   : > { %3894 = vmatpush2.msk.msra.mxu1 %vm2032_vm14, %v7900_v59  ;;  %v2773_v15 = vadd.f32 %v2772_v37, %v2700_v51  ;;  %v2703_v22 = vmul.f32 %v7976_v61, %v7975_v17  ;;  %vm2029_vm2 = vcmp.eq.f32.partialorder %v7977_v3, %v6369_v12  ;;  %v1988_v23 = vrot.slane %v1981_v10, %v1980_v24  ;;  %v7981_v51 = vld [vmem:[#allocation133_spill] sm:$0xff] }
 0x288   : > { %3895 = vmatprep.subr.msk.mxu1 %vm2031_vm15, %v7900_v59  ;;  %vm6892_vm1 = vcmp.lt.s32.totalorder %v7972_v62, 256  ;;  %v2642_v48 = vadd.f32 %v2641_v25, %v2640_v27  ;;  %v2704_v63 = vmul.f32 %v6799_v31, %v6490_v14  ;;  %vm2028_vm7 = vcmp.eq.f32.partialorder %v7977_v3, %v7881_v41  ;;  %v7980_v27 = vld [vmem:[#allocation82_spill] sm:$0xff]  ;;  %v449_v14 = vld [vmem:[%s7355_s2] sm:$0xff] }
 0x289   : > { %3896 = vmatpush2.msk.msra.mxu1 %vm2030_vm0, %v7900_v59  ;;  %v2737_v57 = vadd.f32 %v2736_v39, %v6777_v8  ;;  %v2774_v30 = vadd.f32 %v2773_v15, %v2702_v21  ;;  %4124 = vrcp.f32 %v6866_v11  ;;  %v2705_v52 = vmul.f32 %v7979_v4, %v7978_v42  ;;  %1993 = vst.msk [vmem:[%s303_s21] sm:$0x3] %vm6892_vm1, %v1988_v23  ;;  %v7982_v21 = vld [vmem:[#allocation136_spill] sm:$0xff]  ;;  %v454_v10 = vld [vmem:[%s7355_s2 + $0x28] sm:$0xff] }
 0x28a   : > { %3897 = vmatprep.subr.msk.mxu1 %vm2029_vm2, %v7900_v59  ;;  %v2643_v20 = vrot.slane %v2642_v48, 1  ;;  %vm2027_vm8 = vcmp.eq.f32.partialorder %v7980_v27, %v6369_v12  ;;  %v2706_v8 = vmul.f32 %v6812_v38, %v6504_v6  ;;  %vm2026_vm3 = vcmp.eq.f32.partialorder %v7980_v27, %v7881_v41  ;;  %v452_v12 = vld [vmem:[%s7355_s2 + $0x18] sm:$0xff]  ;;  %v451_v41 = vld [vmem:[%s7355_s2 + $0x10] sm:$0xff]  ;;  %v453_v17 = vld [vmem:[%s7355_s2 + $0x20] sm:$0xff] }
 0x28b   : > { %3898 = vmatpush2.msk.msra.mxu1 %vm2028_vm7, %v7900_v59  ;;  %v2738_v1 = vadd.f32 %v2737_v57, %v2703_v22  ;;  %v2775_v26 = vadd.f32 %v2774_v30, %v2704_v63  ;;  %v2707_v50 = vmul.f32 %v6183_v13, %v7981_v51  ;;  %v2708_v6 = vmul.f32 %v6825_v2, %v6636_v49  ;;  %v456_v22 = vld [vmem:[%s7355_s2 + $0x38] sm:$0xff]  ;;  %v455_v63 = vld [vmem:[%s7355_s2 + $0x30] sm:$0xff]  ;;  %v458_v30 = vld [vmem:[%s7355_s2 + $0x48] sm:$0xff] }
 0x28c   : > { %3899 = vmatprep.subr.msk.mxu1 %vm2027_vm8, %v7900_v59  ;;  %v2644_v24 = vadd.f32 %v2643_v20, %v2642_v48  ;;  %v2709_v43 = vmul.f32 %v6193_v16, %v7982_v21  ;;  %v7983_v20 = vld [vmem:[#allocation104_spill] sm:$0xff]  ;;  %v7984_v27 = vld [vmem:[#allocation65_spill] sm:$0xff]  ;;  %vm3433_vm6 = vcmask 7168  }
 0x28d   : > { %3900 = vmatpush2.msk.msra.mxu1 %vm2026_vm3, %v7900_v59  ;;  %v2739_v37 = vadd.f32 %v2738_v1, %v2705_v52  ;;  %v2776_v25 = vadd.f32 %v2775_v26, %v2706_v8  ;;  %v2710_v59 = vmul.f32 %v6839_v32, %v6670_v54  ;;  %v7985_v8 = vld [vmem:[#allocation108_spill] sm:$0xff] }
 0x28e   : > { %2251 = vmatmul.mubr.f32.vlgmr.msra.gmra.mxu1 %v449_v14  ;;  %4126 = vrcp.f32 %v2644_v24  ;;  %v457_v1 = vld [vmem:[%s7355_s2 + $0x40] sm:$0xff] }
 0x28f   : > { %2256 = vmatprep.mubr.f32.mxu1 %v452_v12  ;;  %v2740_v49 = vadd.f32 %v2739_v37, %v2707_v50  ;;  %v2777_v39 = vadd.f32 %v2776_v25, %v2708_v6  ;;  %4128 = vlog2.f32 %v6866_v11  ;;  %v7987_v50 = vld [vmem:[#allocation110_spill] sm:$0xff]  ;;  %v7988_v37 = vld [vmem:[#allocation109_spill] sm:$0xff] }
 0x290   : > { %4130 = vlog2.f32 %v2644_v24  ;;  %v7986_v24 = vld [vmem:[#allocation105_spill] sm:$0xff] }
 0x291   : > { %v2741_v15 = vadd.f32 %v2740_v49, %v2709_v43  ;;  %v2778_v53 = vadd.f32 %v2777_v39, %v2710_v59  ;;  %v460_v43 = vld [vmem:[%s7355_s2 + $0x58] sm:$0xff]  ;;  %v7991_v49 = vld [vmem:[#allocation58_spill] sm:$0xff] }
 0x292   : > { %2257 = vmatmul.mubr.f32.gmra.mxu1 %v451_v41  ;;  %v7989_v41 = vld [vmem:[#allocation115_spill] sm:$0xff] }
 0x293   : > { %2262 = vmatprep.mubr.f32.mxu1 %v454_v10  ;;  %v2742_v48 = vrot.slane %v2741_v15, 4  ;;  %v2779_v54 = vrot.slane %v2778_v53, 4  ;;  %v7990_v59 = vld [vmem:[#allocation59_spill] sm:$0xff] }
 0x295   : > { %v2743_v3 = vadd.f32 %v2742_v48, %v2741_v15  ;;  %v2780_v23 = vadd.f32 %v2779_v54, %v2778_v53  ;;  %v7992_v15 = vld [vmem:[#allocation113_spill] sm:$0xff]  ;;  %v7994_v48 = vld [vmem:[#allocation118_spill] sm:$0xff] }
 0x296   : > { %2263 = vmatmul.mubr.f32.gmra.mxu1 %v453_v17  ;;  %v6954_v57 = vpop.eup %4124  ;;  %v7993_v17 = vld [vmem:[#allocation124_spill] sm:$0xff] }
 0x297   : > { %2268 = vmatprep.mubr.f32.mxu1 %v456_v22  ;;  %v2744_v42 = vrot.slane %v2743_v3, 2  ;;  %v2781_v52 = vrot.slane %v2780_v23, 2  ;;  %v2795_v11 = vmul.f32 %v6954_v57, %v7983_v20  ;;  %v2793_v14 = vmul.f32 %v6954_v57, %v7984_v27 }
 0x298   : > { %v2799_v12 = vmul.f32 %v6954_v57, %v7985_v8  ;;  %v2797_v51 = vmul.f32 %v6954_v57, %v7986_v24  ;;  %v2803_v6 = vmul.f32 %v6954_v57, %v7987_v50  ;;  %v2801_v25 = vmul.f32 %v6954_v57, %v7988_v37  ;;  %v7996_v37 = vld [vmem:[#allocation60_spill] sm:$0xff] }
 0x299   : > { %v2807_v21 = vmul.f32 %v6954_v57, %v7989_v41  ;;  %v2805_v53 = vmul.f32 %v6954_v57, %v7992_v15  ;;  %v6989_v22 = vmul.f32 %v6954_v57, %v7993_v17  ;;  %v6993_v54 = vmul.f32 %v6954_v57, %v7994_v48 }
 0x29a   : > { %2269 = vmatmul.mubr.f32.gmra.mxu1 %v455_v63  ;;  %v7995_v63 = vld [vmem:[#allocation132_spill] sm:$0xff]  ;;  %v2745_v20 = vadd.f32 %v2744_v42, %v2743_v3  ;;  %v2782_v27 = vadd.f32 %v2781_v52, %v2780_v23  ;;  %v462_v3 = vld [vmem:[%s7355_s2 + $0x68] sm:$0xff]  ;;  %v2833_v23 = vmul.f32 %v6954_v57, %v7945_v44  ;;  %v2839_v42 = vmul.f32 %v6954_v57, %v7953_v7 }
 0x29b   : > { %2274 = vmatprep.mubr.f32.mxu1 %v458_v30  ;;  %v6968_v26 = vpop.eup %4126  ;;  %v6997_v30 = vmul.f32 %v6954_v57, %v7995_v63  ;;  %v2841_v7 = vmul.f32 %v6954_v57, %v6081_v9  ;;  %v2847_v9 = vmul.f32 %v6954_v57, %v7959_v47 }
 0x29c   : > { %v2796_v10 = vmul.f32 %v6968_v26, %v7990_v59  ;;  %v2794_v39 = vmul.f32 %v6968_v26, %v7991_v49  ;;  %v2800_v50 = vmul.f32 %v6968_v26, %v6385_v5  ;;  %v2798_v41 = vmul.f32 %v6968_v26, %v7996_v37  ;;  %v7997_v59 = vld [vmem:[#allocation128_spill] sm:$0xff] }
 0x29d   : > { %v7008_v49 = vmul.f32 %v6954_v57, %v7997_v59  ;;  %v2835_v5 = vmul.f32 %v6954_v57, %v7947_v33  ;;  %v2804_v52 = vmul.f32 %v6968_v26, %v6415_v40  ;;  %v2802_v44 = vmul.f32 %v6968_v26, %v6400_v34  ;;  %v464_v34 = vld [vmem:[%s7355_s2 + $0x78] sm:$0xff]  ;;  %v7999_v59 = vld [vmem:[#allocation38_spill] sm:$0xff] }
 0x29e   : > { %2275 = vmatmul.mubr.f32.gmra.mxu1 %v457_v1  ;;  %v3340_v8 = vadd.f32 %v2796_v10, %v2795_v11  ;;  %v3337_v24 = vadd.f32 %v2794_v39, %v2793_v14  ;;  %v459_v1 = vld [vmem:[%s7355_s2 + $0x50] sm:$0xff]  ;;  %v2837_v11 = vmul.f32 %v6954_v57, %v7949_v36  ;;  %v2843_v14 = vmul.f32 %v6954_v57, %v6101_v28  ;;  %v461_v28 = vld [vmem:[%s7355_s2 + $0x60] sm:$0xff] }
 0x29f   : > { %2280 = vmatprep.mubr.f32.mxu1 %v460_v43  ;;  %v4129_v43 = vpop.eup %4128  ;;  %v2746_v33 = vrot.slane %v2745_v20, 1  ;;  %v2783_v10 = vrot.slane %v2782_v27, 1  ;;  %v3346_v15 = vadd.f32 %v2800_v50, %v2799_v12  ;;  %v3343_v17 = vadd.f32 %v2798_v41, %v2797_v51  ;;  %v7998_v36 = vld [vmem:[#allocation54_spill] sm:$0xff] }
 0x2a0   : > { %3341 = vadd.xlane.f32.xlu0 %v3340_v8  ;;  %3338 = vadd.xlane.f32.xlu1 %v3337_v24  ;;  %v4131_v39 = vpop.eup %4130  ;;  %v2808_v40 = vmul.f32 %v6968_v26, %v6448_v29  ;;  %v2806_v48 = vmul.f32 %v6968_v26, %v7998_v36  ;;  %v2845_v12 = vmul.f32 %v6954_v57, %v6115_v35  ;;  %v2788_v8 = vmul.f32 0.6931472, %v4129_v43  ;;  %v8002_v36 = vld [vmem:[#allocation61_spill] sm:$0xff] }
 0x2a1   : > { %v2851_v29 = vmul.f32 %v6954_v57, %v7979_v4  ;;  %v2849_v51 = vmul.f32 %v6954_v57, %v7976_v61  ;;  %v3352_v63 = vadd.f32 %v2804_v52, %v2803_v6  ;;  %v2855_v24 = vmul.f32 %v6954_v57, %v6193_v16  ;;  %v463_v61 = vld [vmem:[%s7355_s2 + $0x70] sm:$0xff] }
 0x2a2   : > { %2281 = vmatmul.mubr.f32.gmra.mxu1 %v459_v1  ;;  %v2853_v50 = vmul.f32 %v6954_v57, %v6183_v13  ;;  %v3349_v47 = vadd.f32 %v2802_v44, %v2801_v25  ;;  %v2747_v37 = vadd.f32 %v2746_v33, %v2745_v20  ;;  %v2784_v35 = vadd.f32 %v2783_v10, %v2782_v27  ;;  %v8000_v25 = vld [vmem:[#allocation30_spill] sm:$0xff] }
 0x2a3   : > { %2286 = vmatprep.mubr.f32.mxu1 %v462_v3  ;;  %v2790_v41 = vmul.f32 0.6931472, %v4131_v39  ;;  %v3358_v1 = vadd.f32 %v2808_v40, %v2807_v21  ;;  %v3355_v4 = vadd.f32 %v2806_v48, %v2805_v53  ;;  %v2834_v6 = vmul.f32 %v6968_v26, %v6658_v58 }
 0x2a4   : > { %3347 = vadd.xlane.f32.xlu0 %v3346_v15  ;;  %3344 = vadd.xlane.f32.xlu1 %v3343_v17  ;;  %v2836_v16 = vmul.f32 %v6968_v26, %v6676_v60  ;;  %v2812_v13 = vmul.f32 %v6968_v26, %v7999_v59  ;;  %v2810_v20 = vmul.f32 %v6968_v26, %v8000_v25  ;;  %v8001_v17 = vld [vmem:[#allocation102_spill] sm:$0xff] }
 0x2a5   : > { %v2785_v21 = vmul.f32 %v6954_v57, %v2747_v37  ;;  %v2786_v53 = vmul.f32 %v6968_v26, %v2784_v35  ;;  %v7064_v27 = vadd.f32 %v2834_v6, %v2833_v23  ;;  %v2840_v58 = vmul.f32 %v6968_v26, %v6699_v0 }
 0x2a6   : > { %2287 = vmatmul.mubr.f32.gmra.mxu1 %v461_v28  ;;  %v7066_v3 = vadd.f32 %v2836_v16, %v2835_v5  ;;  %v2838_v43 = vmul.f32 %v6968_v26, %v6688_v46  ;;  %v2844_v44 = vmul.f32 %v6968_v26, %v6740_v19  ;;  %v2842_v23 = vmul.f32 %v6968_v26, %v6712_v45  ;;  %v8012_v16 = vld [vmem:[#allocation21_spill] sm:$0xff] }
 0x2a7   : > { %2292 = vmatprep.mubr.f32.mxu1 %v464_v34  ;;  %v2791_v60 = vsub.f32 %v2785_v21, %v2788_v8  ;;  %v2792_v52 = vsub.f32 %v2786_v53, %v2790_v41  ;;  %v7074_v33 = vadd.f32 %v2840_v58, %v2839_v42  ;;  %v2848_v5 = vmul.f32 %v6968_v26, %v6785_v55  ;;  %v8014_v53 = vld [vmem:[#allocation111_spill] sm:$0xff] }
 0x2a8   : > { %3353 = vadd.xlane.f32.xlu0 %v3352_v63  ;;  %3350 = vadd.xlane.f32.xlu1 %v3349_v47  ;;  %v2846_v0 = vmul.f32 %v6968_v26, %v6764_v18  ;;  %v7082_v39 = vadd.f32 %v2838_v43, %v2837_v11  ;;  %v7084_v15 = vadd.f32 %v2844_v44, %v2843_v14  ;;  %v8006_v63 = vld [vmem:[#allocation23_spill] sm:$0xff]  ;;  %v8008_v47 = vld [vmem:[#allocation64_spill] sm:$0xff]  ;;  %v8016_v43 = vld [vmem:[#allocation26_spill] sm:$0xff] }
 0x2a9   : > { %v3320_v10 = vadd.f32 %v2792_v52, %v2791_v60  ;;  %v2852_v46 = vmul.f32 %v6968_v26, %v6812_v38  ;;  %v7088_v19 = vadd.f32 %v2842_v23, %v2841_v7  ;;  %v7090_v42 = vadd.f32 %v2848_v5, %v2847_v9  ;;  %v8015_v60 = vld [vmem:[#allocation27_spill] sm:$0xff] }
 0x2aa   : > { %2293 = vmatmul.mubr.f32.gmra.mxu1 %v463_v61  ;;  %v7092_v45 = vadd.f32 %v2846_v0, %v2845_v12  ;;  %v2850_v18 = vmul.f32 %v6968_v26, %v6799_v31  ;;  %v2856_v11 = vmul.f32 %v6968_v26, %v6839_v32  ;;  %v2854_v14 = vmul.f32 %v6968_v26, %v6825_v2  ;;  %v8003_v32 = vld [vmem:[#allocation63_spill] sm:$0xff]  ;;  %v8011_v61 = vld [vmem:[#allocation22_spill] sm:$0xff] }
 0x2ab   : > { %v7094_v55 = vadd.f32 %v2852_v46, %v2851_v29  ;;  %v3364_v38 = vadd.f32 %v2812_v13, %v6989_v22  ;;  %v3361_v7 = vadd.f32 %v2810_v20, %v6993_v54  ;;  %v2816_v40 = vmul.f32 %v6968_v26, %v8001_v17  ;;  %v8004_v22 = vld [vmem:[#allocation137_spill] sm:$0xff]  ;;  %v8005_v29 = vld [vmem:[#allocation48_spill] sm:$0xff]  ;;  %v8013_v20 = vld [vmem:[#allocation79_spill] sm:$0xff] }
 0x2ac   : > { %3359 = vadd.xlane.f32.xlu0 %v3358_v1  ;;  %3356 = vadd.xlane.f32.xlu1 %v3355_v4  ;;  %v2814_v48 = vmul.f32 %v6968_v26, %v8002_v36  ;;  %v7108_v28 = vadd.f32 %v2850_v18, %v2849_v51  ;;  %v7110_v34 = vadd.f32 %v2856_v11, %v2855_v24  ;;  %v8007_v24 = vld [vmem:[#allocation138_spill] sm:$0xff]  ;;  %v8009_v1 = vld [vmem:[#allocation40_spill] sm:$0xff] }
 0x2ad   : > { %v7112_v31 = vadd.f32 %v2854_v14, %v2853_v50  ;;  %v2819_v2 = vmul.f32 %v6954_v57, %v8003_v32  ;;  %v2817_v54 = vmul.f32 %v6954_v57, %v8004_v22  ;;  %v3370_v9 = vadd.f32 %v2816_v40, %v6997_v30  ;;  %v8017_v0 = vld [vmem:[#allocation134_spill] sm:$0xff]  ;;  %v3123_v40 = vpop.xlane.xlu1 %3122 }
 0x2ae   : > { %v3367_v12 = vadd.f32 %v2814_v48, %v7008_v49  ;;  %v2820_v51 = vmul.f32 %v6968_v26, %v8005_v29  ;;  %v2818_v8 = vmul.f32 %v6968_v26, %v8006_v63  ;;  %v2823_v50 = vmul.f32 %v6954_v57, %v8007_v24  ;;  %v8010_v49 = vld [vmem:[#allocation80_spill] sm:$0xff]  ;;  %v8018_v18 = vld [vmem:[#allocation78_spill] sm:$0xff] }
 0x2af   : > { %v2821_v37 = vmul.f32 %v6954_v57, %v8008_v47  ;;  %v2824_v30 = vmul.f32 %v6968_v26, %v8009_v1  ;;  %v2822_v4 = vmul.f32 %v6968_v26, %v8010_v49  ;;  %v2827_v6 = vmul.f32 %v6954_v57, %v8011_v61  ;;  %v8019_v22 = vld [vmem:[#allocation34_spill] sm:$0xff]  ;;  %v8028_v49 = vld [vmem:[#allocation123_spill] sm:$0xff]  ;;  %v8029_v61 = vld [vmem:[#allocation29_spill] sm:$0xff] }
 0x2b0   : > { %3365 = vadd.xlane.f32.xlu0 %v3364_v38  ;;  %3362 = vadd.xlane.f32.xlu1 %v3361_v7  ;;  %v3376_v35 = vadd.f32 %v2820_v51, %v2819_v2  ;;  %v3373_v41 = vadd.f32 %v2818_v8, %v2817_v54  ;;  %v2825_v59 = vmul.f32 %v6954_v57, %v8012_v16  ;;  %v3016_v7 = vpop.xlane.xlu0 %3015  ;;  %v8022_v51 = vld [vmem:[#allocation36_spill] sm:$0xff]  ;;  %v8023_v8 = vld [vmem:[#allocation106_spill] sm:$0xff]  ;;  %v8030_v16 = vld [vmem:[#allocation71_spill] sm:$0xff] }
 0x2b1   : > { %v3382_v13 = vadd.f32 %v2824_v30, %v2823_v50  ;;  %v3379_v25 = vadd.f32 %v2822_v4, %v2821_v37  ;;  %v2828_v21 = vmul.f32 %v6968_v26, %v8013_v20  ;;  %v2826_v58 = vmul.f32 %v6968_v26, %v8014_v53  ;;  %v8024_v50 = vld [vmem:[#allocation45_spill] sm:$0xff]  ;;  %v8027_v1 = vld [vmem:[#allocation62_spill] sm:$0xff]  ;;  %v8032_v20 = vld [vmem:[#allocation31_spill] sm:$0xff] }
 0x2b2   : > { %v2831_v52 = vmul.f32 %v6954_v57, %v8015_v60  ;;  %v2829_v44 = vmul.f32 %v6954_v57, %v8016_v43  ;;  %v2832_v46 = vmul.f32 %v6968_v26, %v8017_v0  ;;  %v2830_v11 = vmul.f32 %v6968_v26, %v8018_v18  ;;  %v8021_v26 = vld [vmem:[#allocation42_spill] sm:$0xff]  ;;  %v8033_v53 = vld [vmem:[#allocation53_spill] sm:$0xff]  ;;  %v8035_v43 = vld [vmem:[#allocation56_spill] sm:$0xff] }
 0x2b3   : > { %v3388_v23 = vadd.f32 %v2828_v21, %v2827_v6  ;;  %v3385_v5 = vadd.f32 %v2826_v58, %v2825_v59  ;;  %v8034_v60 = vld [vmem:[#allocation49_spill] sm:$0xff]  ;;  %v8037_v0 = vld [vmem:[#allocation67_spill] sm:$0xff] }
 0x2b4   : > { %3371 = vadd.xlane.f32.xlu0 %v3370_v9  ;;  %3368 = vadd.xlane.f32.xlu1 %v3367_v12  ;;  %v3394_v14 = vadd.f32 %v2832_v46, %v2831_v52  ;;  %v3391_v38 = vadd.f32 %v2830_v11, %v2829_v44  ;;  %v3120_v17 = vpop.xlane.xlu0 %3119  ;;  %v8020_v9 = vld [vmem:[#allocation97_spill] sm:$0xff] }
 0x2b5   : > { %v3214_v36 = vadd.f32 %v3123_v40, %v3120_v17  ;;  %v8038_v18 = vld [vmem:[#allocation57_spill] sm:$0xff]  ;;  %v8040_v40 = vld [vmem:[#allocation52_spill] sm:$0xff] }
 0x2b8   : > { %3377 = vadd.xlane.f32.xlu0 %v3376_v35  ;;  %3374 = vadd.xlane.f32.xlu1 %v3373_v41  ;;  %v8026_v35 = vld [vmem:[#allocation107_spill] sm:$0xff] }
 0x2bc   : > { %3383 = vadd.xlane.f32.xlu0 %v3382_v13  ;;  %3380 = vadd.xlane.f32.xlu1 %v3379_v25  ;;  %v8031_v13 = vld [vmem:[#allocation47_spill] sm:$0xff] }
 0x2c0   : > { %3389 = vadd.xlane.f32.xlu0 %v3388_v23  ;;  %3386 = vadd.xlane.f32.xlu1 %v3385_v5  ;;  %v8036_v23 = vld [vmem:[#allocation55_spill] sm:$0xff] }
 0x2c4   : > { %3395 = vadd.xlane.f32.xlu0 %v3394_v14  ;;  %3392 = vadd.xlane.f32.xlu1 %v3391_v38  ;;  %v3047_v14 = vadd.f32 %v6827_v56, %v3016_v7  ;;  %v8039_v38 = vld [vmem:[#allocation81_spill] sm:$0xff] }
 0x2c8   : > { %3321 = vadd.xlane.f32.xlu0 %v3320_v10  ;;  %v8025_v10 = vld [vmem:[#allocation122_spill] sm:$0xff] }
 0x2cb   : > { %v3126_v57 = vpop.xlane.xlu0 %3125 }
 0x2cc   : > { %v3215_v48 = vadd.f32 %v3214_v36, %v3126_v57  ;;  %v3048_v57 = vrot.slane %v3047_v14, 4 }
 0x2cd   : > { %v3129_v32 = vpop.xlane.xlu1 %3128 }
 0x2ce   : > { %v3216_v2 = vadd.f32 %v3215_v48, %v3129_v32  ;;  %v8041_v48 = vld [vmem:[#allocation50_spill] sm:$0xff] }
 0x2d0   : > { %v3217_v54 = vadd.f32 %v3216_v2, %v8019_v22  ;;  %v8042_v2 = vld [vmem:[#allocation32_spill] sm:$0xff] }
 0x2d2   : > { %v3218_v12 = vadd.f32 %v3217_v54, %v8020_v9  ;;  %v3049_v54 = vadd.f32 %v3048_v57, %v3047_v14  ;;  %v8043_v9 = vld [vmem:[#allocation72_spill] sm:$0xff]  ;;  %v8047_v57 = vld [vmem:[#allocation19_spill] sm:$0xff] }
 0x2d4   : > { %v3219_v29 = vadd.f32 %v3218_v12, %v8021_v26  ;;  %v8044_v26 = vld [vmem:[#allocation112_spill] sm:$0xff] }
 0x2d6   : > { %v3220_v63 = vadd.f32 %v3219_v29, %v8022_v51  ;;  %v3050_v51 = vrot.slane %v3049_v54, 2 }
 0x2d8   : > { %v3221_v24 = vadd.f32 %v3220_v63, %v8023_v8  ;;  %v8045_v63 = vld [vmem:[#allocation77_spill] sm:$0xff]  ;;  %v3051_v56 = vadd.f32 %v3050_v51, %v3049_v54  ;;  %v8048_v54 = vld [vmem:[#allocation18_spill] sm:$0xff] }
 0x2da   : > { %v3222_v47 = vadd.f32 %v3221_v24, %v8024_v50  ;;  %v3213_v24 = vpop.xlane.xlu1 %3212 }
 0x2dc   : > { %v3223_v37 = vadd.f32 %v3222_v47, %v8025_v10  ;;  %v3052_v10 = vrot.slane %v3051_v56, 1 }
 0x2de   : > { %v3224_v41 = vadd.f32 %v3223_v37, %v8026_v35  ;;  %v7177_v35 = vand.u32 127, %v7972_v62 }
 0x2e0   : > { %v3225_v30 = vadd.f32 %v3224_v41, %v8027_v1  ;;  %v3053_v1 = vadd.f32 %v3052_v10, %v3051_v56  ;;  %vm3325_vm4 = vcmp.eq.s32.totalorder %v7177_v35, 0  ;;  %vm3327_vm5 = vcmp.eq.s32.totalorder %v7177_v35, 1 }
 0x2e2   : > { %v3226_v4 = vadd.f32 %v3225_v30, %v8028_v49 }
 0x2e4   : > { %v3227_v6 = vadd.f32 %v3226_v4, %v8029_v61  ;;  %v3326_v4 = vsel %vm3325_vm4, %v3053_v1, 0.0 }
 0x2e6   : > { %v3228_v59 = vadd.f32 %v3227_v6, %v8030_v16 }
 0x2e8   : > { %v3229_v25 = vadd.f32 %v3228_v59, %v8031_v13 }
 0x2ea   : > { %v3230_v21 = vadd.f32 %v3229_v25, %v8032_v20 }
 0x2ec   : > { %v3231_v58 = vadd.f32 %v3230_v21, %v8033_v53 }
 0x2ee   : > { %v3232_v52 = vadd.f32 %v3231_v58, %v8034_v60 }
 0x2f0   : > { %v3233_v44 = vadd.f32 %v3232_v52, %v8035_v43 }
 0x2f2   : > { %v3234_v5 = vadd.f32 %v3233_v44, %v8036_v23 }
 0x2f4   : > { %v3235_v46 = vadd.f32 %v3234_v5, %v8037_v0 }
 0x2f6   : > { %v3236_v11 = vadd.f32 %v3235_v46, %v8038_v18 }
 0x2f8   : > { %v3237_v17 = vadd.f32 %v3236_v11, %v8039_v38 }
 0x2fa   : > { %v3238_v36 = vadd.f32 %v3237_v17, %v8040_v40  ;;  %v8046_v17 = vld [vmem:[#allocation20_spill] sm:$0xff] }
 0x2fc   : > { %v3239_v32 = vadd.f32 %v3238_v36, %v8041_v48 }
 0x2fe   : > { %v3240_v22 = vadd.f32 %v3239_v32, %v8042_v2 }
 0x300   : > { %v3241_v12 = vadd.f32 %v3240_v22, %v8043_v9 }
 0x302   : > { %v3242_v29 = vadd.f32 %v3241_v12, %v8044_v26  ;;  %v8049_v26 = vld [vmem:[#allocation17_spill] sm:$0xff] }
 0x304   : > { %v3243_v8 = vadd.f32 %v3242_v29, %v8045_v63 }
 0x306   : > { %v3244_v50 = vadd.f32 %v3243_v8, %v3213_v24 }
 0x308   : > { %v3245_v7 = vrot.slane %v3244_v50, 4 }
 0x30a   : > { %v3246_v47 = vadd.f32 %v3245_v7, %v3244_v50  ;;  %v8050_v50 = vld [vmem:[#allocation16_spill] sm:$0xff] }
 0x30c   : > { %v3247_v37 = vrot.slane %v3246_v47, 2 }
 0x30e   : > { %v3248_v41 = vadd.f32 %v3247_v37, %v3246_v47  ;;  %v8051_v47 = vld [vmem:[#allocation15_spill] sm:$0xff] }
 0x310   : > { %v3249_v30 = vrot.slane %v3248_v41, 1 }
 0x312   : > { %v3250_v49 = vadd.f32 %v3249_v30, %v3248_v41 }
 0x314   : > { %v3328_v61 = vsel %vm3327_vm5, %v3250_v49, 0.0  ;;  %v8052_v49 = vld [vmem:[#allocation14_spill] sm:$0xff] }
 0x315   : > { %v7181_v6 = vadd.f32 %v3328_v61, %v3326_v4 }
 0x329   : > { %v3342_v62 = vpop.xlane.xlu0 %3341  ;;  %v3339_v16 = vpop.xlane.xlu1 %3338 }
 0x32a   : > { %3435 = vst.msk [vmem:[%s7187_s9 + $0x8] sm:$0xff] %vm3433_vm6, %v3342_v62  ;;  %3434 = vst.msk [vmem:[%s7187_s9] sm:$0xff] %vm3433_vm6, %v3339_v16  ;;  %v8053_v62 = vld [vmem:[#allocation13_spill] sm:$0xff] }
 0x32d   : > { %v3348_v59 = vpop.xlane.xlu0 %3347  ;;  %v3345_v13 = vpop.xlane.xlu1 %3344 }
 0x32e   : > { %3437 = vst.msk [vmem:[%s7187_s9 + $0x18] sm:$0xff] %vm3433_vm6, %v3348_v59  ;;  %3436 = vst.msk [vmem:[%s7187_s9 + $0x10] sm:$0xff] %vm3433_vm6, %v3345_v13 }
 0x331   : > { %v3354_v25 = vpop.xlane.xlu0 %3353  ;;  %v3351_v20 = vpop.xlane.xlu1 %3350 }
 0x332   : > { %3439 = vst.msk [vmem:[%s7187_s9 + $0x28] sm:$0xff] %vm3433_vm6, %v3354_v25  ;;  %3438 = vst.msk [vmem:[%s7187_s9 + $0x20] sm:$0xff] %vm3433_vm6, %v3351_v20 }
 0x335   : > { %v3360_v21 = vpop.xlane.xlu0 %3359  ;;  %v3357_v53 = vpop.xlane.xlu1 %3356 }
 0x336   : > { %3441 = vst.msk [vmem:[%s7187_s9 + $0x38] sm:$0xff] %vm3433_vm6, %v3360_v21  ;;  %3440 = vst.msk [vmem:[%s7187_s9 + $0x30] sm:$0xff] %vm3433_vm6, %v3357_v53  ;;  %v8054_v21 = vld [vmem:[#allocation12_spill] sm:$0xff] }
 0x339   : > { %v3366_v58 = vpop.xlane.xlu0 %3365  ;;  %v3363_v60 = vpop.xlane.xlu1 %3362 }
 0x33a   : > { %3443 = vst.msk [vmem:[%s7187_s9 + $0x48] sm:$0xff] %vm3433_vm6, %v3366_v58  ;;  %3442 = vst.msk [vmem:[%s7187_s9 + $0x40] sm:$0xff] %vm3433_vm6, %v3363_v60  ;;  %v8055_v60 = vld [vmem:[#allocation11_spill] sm:$0xff] }
 0x33d   : > { %v3372_v52 = vpop.xlane.xlu0 %3371  ;;  %v3369_v43 = vpop.xlane.xlu1 %3368 }
 0x33e   : > { %3445 = vst.msk [vmem:[%s7187_s9 + $0x58] sm:$0xff] %vm3433_vm6, %v3372_v52  ;;  %3444 = vst.msk [vmem:[%s7187_s9 + $0x50] sm:$0xff] %vm3433_vm6, %v3369_v43 }
 0x341   : > { %v3378_v44 = vpop.xlane.xlu0 %3377  ;;  %v3375_v23 = vpop.xlane.xlu1 %3374 }
 0x342   : > { %3447 = vst.msk [vmem:[%s7187_s9 + $0x68] sm:$0xff] %vm3433_vm6, %v3378_v44  ;;  %3446 = vst.msk [vmem:[%s7187_s9 + $0x60] sm:$0xff] %vm3433_vm6, %v3375_v23 }
 0x345   : > { %v3384_v5 = vpop.xlane.xlu0 %3383  ;;  %v3381_v0 = vpop.xlane.xlu1 %3380 }
 0x346   : > { %3449 = vst.msk [vmem:[%s7187_s9 + $0x78] sm:$0xff] %vm3433_vm6, %v3384_v5  ;;  %3448 = vst.msk [vmem:[%s7187_s9 + $0x70] sm:$0xff] %vm3433_vm6, %v3381_v0  ;;  %v8056_v5 = vld [vmem:[#allocation10_spill] sm:$0xff] }
 0x349   : > { %v3390_v46 = vpop.xlane.xlu0 %3389  ;;  %v3387_v18 = vpop.xlane.xlu1 %3386 }
 0x34a   : > { %3451 = vst.msk [vmem:[%s7187_s9 + $0x88] sm:$0xff] %vm3433_vm6, %v3390_v46  ;;  %3450 = vst.msk [vmem:[%s7187_s9 + $0x80] sm:$0xff] %vm3433_vm6, %v3387_v18  ;;  %v8057_v18 = vld [vmem:[#allocation9_spill] sm:$0xff] }
 0x34d   : > { %v3396_v11 = vpop.xlane.xlu0 %3395  ;;  %v3393_v14 = vpop.xlane.xlu1 %3392 }
 0x34e   : > { %3453 = vst.msk [vmem:[%s7187_s9 + $0x98] sm:$0xff] %vm3433_vm6, %v3396_v11  ;;  %3452 = vst.msk [vmem:[%s7187_s9 + $0x90] sm:$0xff] %vm3433_vm6, %v3393_v14  ;;  %v2252_v38 = vpop.f32.mrf.mxu1 }
 0x34f   : > { %2299 = vst [vmem:[%s7230_s19] sm:$0xff] %v2252_v38  ;;  %v3251_v40 = vsub.f32 %v2252_v38, %v8046_v17 }
 0x350   : > { %v2254_v36 = vpop.f32.mrf.mxu1 }
 0x351   : > { %2300 = vst [vmem:[%s7230_s19 + $0x8] sm:$0xff] %v2254_v36  ;;  %v3252_v48 = vsub.f32 %v2254_v36, %v8047_v57  ;;  %v3267_v2 = vmul.f32 %v3251_v40, %v3251_v40  ;;  %v8058_v36 = vld [vmem:[#allocation8_spill] sm:$0xff] }
 0x352   : > { %v2258_v32 = vpop.f32.mrf.mxu1 }
 0x353   : > { %v3268_v22 = vmul.f32 %v3252_v48, %v3252_v48  ;;  %2301 = vst [vmem:[%s7230_s19 + $0x10] sm:$0xff] %v2258_v32  ;;  %v3253_v9 = vsub.f32 %v2258_v32, %v8048_v54  ;;  %v8059_v32 = vld [vmem:[#allocation6_spill] sm:$0xff] }
 0x354   : > { %v2260_v12 = vpop.f32.mrf.mxu1 }
 0x355   : > { %2302 = vst [vmem:[%s7230_s19 + $0x18] sm:$0xff] %v2260_v12  ;;  %v3254_v29 = vsub.f32 %v2260_v12, %v8049_v26  ;;  %v3283_v51 = vadd.f32 %v3268_v22, %v3267_v2  ;;  %v3269_v8 = vmul.f32 %v3253_v9, %v3253_v9  ;;  %v8060_v26 = vld [vmem:[#allocation7_spill] sm:$0xff] }
 0x356   : > { %v2264_v63 = vpop.f32.mrf.mxu1 }
 0x357   : > { %v3270_v24 = vmul.f32 %v3254_v29, %v3254_v29  ;;  %2303 = vst [vmem:[%s7230_s19 + $0x20] sm:$0xff] %v2264_v63  ;;  %v3255_v56 = vsub.f32 %v2264_v63, %v8050_v50  ;;  %3284 = vadd.xlane.f32.xlu1 %v3283_v51  ;;  %v8061_v63 = vld [vmem:[#allocation5_spill] sm:$0xff] }
 0x358   : > { %v2266_v7 = vpop.f32.mrf.mxu1 }
 0x359   : > { %2304 = vst [vmem:[%s7230_s19 + $0x28] sm:$0xff] %v2266_v7  ;;  %v3256_v10 = vsub.f32 %v2266_v7, %v8051_v47  ;;  %v3286_v37 = vadd.f32 %v3270_v24, %v3269_v8  ;;  %v3271_v1 = vmul.f32 %v3255_v56, %v3255_v56 }
 0x35a   : > { %v2270_v41 = vpop.f32.mrf.mxu1 }
 0x35b   : > { %v3272_v30 = vmul.f32 %v3256_v10, %v3256_v10  ;;  %2305 = vst [vmem:[%s7230_s19 + $0x30] sm:$0xff] %v2270_v41  ;;  %v3257_v4 = vsub.f32 %v2270_v41, %v8052_v49  ;;  %3398 = vadd.xlane.f32.xlu1 %v7064_v27  ;;  %3287 = vadd.xlane.f32.xlu0 %v3286_v37 }
 0x35c   : > { %v2272_v61 = vpop.f32.mrf.mxu1 }
 0x35d   : > { %2306 = vst [vmem:[%s7230_s19 + $0x38] sm:$0xff] %v2272_v61  ;;  %v3258_v16 = vsub.f32 %v2272_v61, %v8053_v62  ;;  %v3289_v59 = vadd.f32 %v3272_v30, %v3271_v1  ;;  %v3273_v25 = vmul.f32 %v3257_v4, %v3257_v4 }
 0x35e   : > { %v2276_v13 = vpop.f32.mrf.mxu1 }
 0x35f   : > { %v3274_v20 = vmul.f32 %v3258_v16, %v3258_v16  ;;  %2307 = vst [vmem:[%s7230_s19 + $0x40] sm:$0xff] %v2276_v13  ;;  %v3259_v53 = vsub.f32 %v2276_v13, %v8054_v21  ;;  %3290 = vadd.xlane.f32.xlu0 %v3289_v59 }
 0x360   : > { %v2278_v58 = vpop.f32.mrf.mxu1 }
 0x361   : > { %2308 = vst [vmem:[%s7230_s19 + $0x48] sm:$0xff] %v2278_v58  ;;  %v3260_v27 = vsub.f32 %v2278_v58, %v8055_v60  ;;  %v3292_v52 = vadd.f32 %v3274_v20, %v3273_v25  ;;  %v3275_v44 = vmul.f32 %v3259_v53, %v3259_v53 }
 0x362   : > { %v2282_v43 = vpop.f32.mrf.mxu1 }
 0x363   : > { %v3276_v23 = vmul.f32 %v3260_v27, %v3260_v27  ;;  %2309 = vst [vmem:[%s7230_s19 + $0x50] sm:$0xff] %v2282_v43  ;;  %v3261_v0 = vsub.f32 %v2282_v43, %v8056_v5  ;;  %3293 = vadd.xlane.f32.xlu0 %v3292_v52 }
 0x364   : > { %v2284_v46 = vpop.f32.mrf.mxu1 }
 0x365   : > { %2310 = vst [vmem:[%s7230_s19 + $0x58] sm:$0xff] %v2284_v46  ;;  %v3262_v11 = vsub.f32 %v2284_v46, %v8057_v18  ;;  %v3295_v14 = vadd.f32 %v3276_v23, %v3275_v44  ;;  %v3277_v17 = vmul.f32 %v3261_v0, %v3261_v0 }
 0x366   : > { %v2288_v38 = vpop.f32.mrf.mxu1 }
 0x367   : > { %v3278_v40 = vmul.f32 %v3262_v11, %v3262_v11  ;;  %2311 = vst [vmem:[%s7230_s19 + $0x60] sm:$0xff] %v2288_v38  ;;  %v3263_v57 = vsub.f32 %v2288_v38, %v8058_v36  ;;  %3296 = vadd.xlane.f32.xlu0 %v3295_v14 }
 0x368   : > { %v2290_v48 = vpop.f32.mrf.mxu1 }
 0x369   : > { %2312 = vst [vmem:[%s7230_s19 + $0x68] sm:$0xff] %v2290_v48  ;;  %v3264_v2 = vsub.f32 %v2290_v48, %v8059_v32  ;;  %v3298_v22 = vadd.f32 %v3278_v40, %v3277_v17  ;;  %v3279_v9 = vmul.f32 %v3263_v57, %v3263_v57 }
 0x36a   : > { %v2294_v54 = vpop.f32.mrf.mxu1 }
 0x36b   : > { %v3280_v12 = vmul.f32 %v3264_v2, %v3264_v2  ;;  %2313 = vst [vmem:[%s7230_s19 + $0x70] sm:$0xff] %v2294_v54  ;;  %v3265_v29 = vsub.f32 %v2294_v54, %v8060_v26  ;;  %3299 = vadd.xlane.f32.xlu1 %v3298_v22 }
 0x36c   : > { %v2296_v51 = vpop.f32.mrf.mxu1 }
 0x36d   : > { %2314 = vst [vmem:[%s7230_s19 + $0x78] sm:$0xff] %v2296_v51  ;;  %v3266_v8 = vsub.f32 %v2296_v51, %v8061_v63  ;;  %v3301_v24 = vadd.f32 %v3280_v12, %v3279_v9  ;;  %v3281_v50 = vmul.f32 %v3265_v29, %v3265_v29  ;;  %s4136_s19 = sshll.u32 %s4213_s16, 4  ;;  %s4137_s19 = int_to_ptr.vmem [resolvable:$false] %s4136_s19 }
 0x36e   : > { %s4138_s0 = scalar_lea.vmem %s4137_s19, 64  ;;  %p4139_p1 = scmp.lt.s32.totalorder %s3508_s29, %s4137_s19 }
 0x36f   : > { %v3282_v56 = vmul.f32 %v3266_v8, %v3266_v8  ;;  %3302 = vadd.xlane.f32.xlu0 %v3301_v24  ;;  %p4140_p2 = scmp.lt.s32.totalorder %s4138_s0, %s4132_s11 }
 0x371   : > { %v3304_v7 = vadd.f32 %v3282_v56, %v3281_v50  ;;  %p4141_p3 = por %p4140_p2, %p4139_p1 }
 0x373   : > { %3401 = vadd.xlane.f32.xlu0 %v7066_v3  ;;  %3305 = vadd.xlane.f32.xlu1 %v3304_v7  ;;  %p4142_p5 = pnand %p4141_p3, %p4135_p0 }
 0x377   : > { %3407 = vadd.xlane.f32.xlu0 %v7074_v33  ;;  %3404 = vadd.xlane.f32.xlu1 %v7082_v39 }
 0x37b   : > { %3413 = vadd.xlane.f32.xlu0 %v7084_v15  ;;  %3410 = vadd.xlane.f32.xlu1 %v7088_v19 }
 0x37f   : > { %3419 = vadd.xlane.f32.xlu0 %v7090_v42  ;;  %3416 = vadd.xlane.f32.xlu1 %v7092_v45 }
 0x383   : > { %3425 = vadd.xlane.f32.xlu0 %v7094_v55  ;;  %3422 = vadd.xlane.f32.xlu1 %v7108_v28 }
 0x387   : > { %3431 = vadd.xlane.f32.xlu0 %v7110_v34  ;;  %3428 = vadd.xlane.f32.xlu1 %v7112_v31 }
 0x388   : > { %4145 = shalt.err (!%p4142_p5)
}
 0x389   : > { %s4146_s3 = scalar_lea.hbm %s3505_s23, 32  ;;  %s4150_s21 = scalar_lea.hbm %s7357_s4, 64 }
 0x38a   : > { %p4147_p6 = scmp.ne.s32.totalorder %s3505_s23, %s4146_s3  ;;  %p4151_p10 = scmp.lt.s32.totalorder %s3505_s23, %s7357_s4 }
 0x38b   : > { %p4152_p11 = scmp.lt.s32.totalorder %s4150_s21, %s4146_s3 }
 0x38c   : > { %p4148_p7 = pnand %p4147_p6, %p4294_p4 }
 0x38d   : > { %p4153_p12 = por %p4152_p11, %p4151_p10 }
 0x38e   : > { %p4149_p9 = pneg %p4148_p7 }
 0x390   : > { %p4154_p13 = pnand %p4153_p12, %p4149_p9 }
 0x392   : > { %4157 = shalt.err (!%p4154_p13)
}
 0x393   : > { %3930 = dma.vmem_to_hbm [thread:$0]  (%p4294_p4), %s3508_s29, 32, %s3505_s23, %s3467_s30   ;;  %v3322_v3 = vpop.xlane.xlu0 %3321  ;;  %vm3330_vm9 = vcmp.eq.s32.totalorder %v7177_v35, 2  ;;  %vm3333_vm10 = vcmp.eq.s32.totalorder %v7177_v35, 3 }
 0x394   : > { %v3334_v23 = vsel %vm3333_vm10, %v3322_v3, 0.0  ;;  %s359_s22 = scalar_lea.vmem %s7359_s6, %s4313_s14 }
 0x3e0   : > { %v3285_v33 = vpop.xlane.xlu1 %3284 }
 0x3e4   : > { %v3399_v39 = vpop.xlane.xlu1 %3398  ;;  %v3288_v15 = vpop.xlane.xlu0 %3287 }
 0x3e5   : > { %3454 = vst.msk [vmem:[%s7187_s9 + $0xa0] sm:$0xff] %vm3433_vm6, %v3399_v39  ;;  %v3307_v45 = vadd.f32 %v3288_v15, %v3285_v33 }
 0x3e8   : > { %v3291_v19 = vpop.xlane.xlu0 %3290 }
 0x3e9   : > { %v3308_v55 = vadd.f32 %v3307_v45, %v3291_v19 }
 0x3ec   : > { %v3294_v42 = vpop.xlane.xlu0 %3293 }
 0x3ed   : > { %v3309_v34 = vadd.f32 %v3308_v55, %v3294_v42 }
 0x3f0   : > { %v3297_v28 = vpop.xlane.xlu0 %3296 }
 0x3f1   : > { %v3310_v47 = vadd.f32 %v3309_v34, %v3297_v28 }
 0x3f4   : > { %v3300_v31 = vpop.xlane.xlu1 %3299 }
 0x3f5   : > { %v3311_v37 = vadd.f32 %v3310_v47, %v3300_v31 }
 0x3f8   : > { %v3303_v10 = vpop.xlane.xlu0 %3302 }
 0x3f9   : > { %v3312_v41 = vadd.f32 %v3311_v37, %v3303_v10 }
 0x3fc   : > { %v3402_v1 = vpop.xlane.xlu0 %3401  ;;  %v3306_v30 = vpop.xlane.xlu1 %3305 }
 0x3fd   : > { %3455 = vst.msk [vmem:[%s7187_s9 + $0xa8] sm:$0xff] %vm3433_vm6, %v3402_v1  ;;  %v3313_v49 = vadd.f32 %v3312_v41, %v3306_v30 }
 0x3ff   : > { %v3314_v4 = vrot.slane %v3313_v49, 4 }
 0x400   : > { %v3408_v61 = vpop.xlane.xlu0 %3407  ;;  %v3405_v62 = vpop.xlane.xlu1 %3404 }
 0x401   : > { %v3315_v16 = vadd.f32 %v3314_v4, %v3313_v49  ;;  %3457 = vst.msk [vmem:[%s7187_s9 + $0xb8] sm:$0xff] %vm3433_vm6, %v3408_v61  ;;  %3456 = vst.msk [vmem:[%s7187_s9 + $0xb0] sm:$0xff] %vm3433_vm6, %v3405_v62 }
 0x403   : > { %v3316_v59 = vrot.slane %v3315_v16, 2 }
 0x404   : > { %v3414_v13 = vpop.xlane.xlu0 %3413  ;;  %v3411_v25 = vpop.xlane.xlu1 %3410 }
 0x405   : > { %v3317_v20 = vadd.f32 %v3316_v59, %v3315_v16  ;;  %3459 = vst.msk [vmem:[%s7187_s9 + $0xc8] sm:$0xff] %vm3433_vm6, %v3414_v13  ;;  %3458 = vst.msk [vmem:[%s7187_s9 + $0xc0] sm:$0xff] %vm3433_vm6, %v3411_v25 }
 0x407   : > { %v3318_v21 = vrot.slane %v3317_v20, 1 }
 0x408   : > { %v3420_v53 = vpop.xlane.xlu0 %3419  ;;  %v3417_v58 = vpop.xlane.xlu1 %3416 }
 0x409   : > { %v3319_v60 = vadd.f32 %v3318_v21, %v3317_v20  ;;  %3461 = vst.msk [vmem:[%s7187_s9 + $0xd8] sm:$0xff] %vm3433_vm6, %v3420_v53  ;;  %3460 = vst.msk [vmem:[%s7187_s9 + $0xd0] sm:$0xff] %vm3433_vm6, %v3417_v58 }
 0x40b   : > { %v3331_v27 = vsel %vm3330_vm9, %v3319_v60, 0.0 }
 0x40c   : > { %v3332_v52 = vadd.f32 %v3331_v27, %v7181_v6  ;;  %v3426_v43 = vpop.xlane.xlu0 %3425  ;;  %v3423_v44 = vpop.xlane.xlu1 %3422 }
 0x40d   : > { %3463 = vst.msk [vmem:[%s7187_s9 + $0xe8] sm:$0xff] %vm3433_vm6, %v3426_v43  ;;  %3462 = vst.msk [vmem:[%s7187_s9 + $0xe0] sm:$0xff] %vm3433_vm6, %v3423_v44 }
 0x40e   : > { %v3335_v5 = vadd.f32 %v3334_v23, %v3332_v52 }
 0x410   : > { %3336 = vst [vmem:[%s359_s22] sm:$0x1] %v3335_v5  ;;  %v3432_v0 = vpop.xlane.xlu0 %3431  ;;  %v3429_v46 = vpop.xlane.xlu1 %3428 }
 0x411   : > { %3465 = vst.msk [vmem:[%s7187_s9 + $0xf8] sm:$0xff] %vm3433_vm6, %v3432_v0  ;;  %3464 = vst.msk [vmem:[%s7187_s9 + $0xf0] sm:$0xff] %vm3433_vm6, %v3429_v46 }
 0x412 PF: > { %p3936_p4 = scmp.ge.s32.totalorder %s4208_s28, 2  ;;  %s3529_s23 = sand.u32 1, %s4188_s24  }
 0x413   : > { %s3530_s14 = scalar_lea.sflag [#allocation3], %s3529_s23 }
 0x414   : > { %p3933_p0 = pnand %p3936_p4, %p4301_p8 }
 0x416   : > { %p3934_p1 = pneg %p3933_p0 }
 0x418   : > { %4183 = dma.done.wait (%p3934_p1), %s3530_s14, 32  }
 0x419   : > { %4185 = vsyncadd (%p3934_p1), %s3530_s14, 4294967264  ;;  %s21_s28 = sadd.s32 1, %s4208_s28   ;;  %s8062_s24 = smov %s4192_s25 }
 0x41a   : > { %p18_p2 = scmp.ge.s32.totalorder %s21_s28, 4   ;;  %s8063_s25 = smov %s4196_s26 }
 0x41b   : > { %s8064_s26 = smov %s4307_s13  ;;  %s8065_s3 = smov %s4204_s27 }
 0x41c   : > { %s8066_s27 = smov %s8068_s8  ;;  %20 = sbr.rel (!%p18_p2) target bundleno = 6 (0x6), region = 107 }
 0x421   :  { %3568 = vsyncpa [#allocation3], 1 }
 0x422   :  { %3570 = vsyncpa [#allocation3 + $0x1], 1 }

</bundles_post_ra>
